<compile_context>
chip_gen: v6e
topology: v6e:2x2x1
jax: 0.10.0
libtpu: 0.0.40
codegen_flags: <defaults>
</compile_context>

<pallas_src>
import functools

import jax
import jax.numpy as jnp
import numpy as np
from jax import lax
from jax.experimental import pallas as pl
from jax.experimental.pallas import tpu as pltpu


def lstm_predictor_kernel(
    x_ref, mask_ref,
    w_fe_ref, b_fe_ref, ln_w_ref, ln_b_ref,
    w_in_ref, w_out_ref,
    w_ih_f_ref, b_f_ref, w_comb_f_ref,
    w_ih_b_ref, b_b_ref,
    w_reg_f_ref, w_reg_b_ref, w_r2_ref, b_r2_ref,
    out_ref,
    *, num_heads,
):
    Bt, S, I = x_ref.shape
    H = w_fe_ref.shape[1]          # hidden_size
    hd = H // num_heads            # head dim
    H4 = 4 * H
    bf16 = jnp.bfloat16

    # ---- feature_extractor: Linear -> LayerNorm -> SiLU -> (Dropout = id) ----
    x = x_ref[...].reshape(Bt * S, I)
    feat = jnp.dot(x.astype(bf16), w_fe_ref[...],
                   preferred_element_type=jnp.float32) + b_fe_ref[...]
    mu = jnp.mean(feat, axis=-1, keepdims=True)
    var = jnp.mean(jnp.square(feat - mu), axis=-1, keepdims=True)
    feat = (feat - mu) * lax.rsqrt(var + 1e-5) * ln_w_ref[...] + ln_b_ref[...]
    feat = feat * jax.nn.sigmoid(feat)                      # SiLU (f32)

    # ---- MultiheadAttention (self-attn, bias=False, attn dropout = id) ------
    # All heads at once: replicate queries num_heads times along the sequence
    # axis and mask each replica to its head's feature columns.  One score
    # matmul, one softmax, one value matmul, one output projection.
    qkv = jnp.dot(feat.astype(bf16), w_in_ref[...],
                  preferred_element_type=jnp.float32)       # (Bt*S, 3H)
    q = qkv[:, 0:H].reshape(Bt, S, H)
    k = qkv[:, H:2 * H].reshape(Bt, S, H)
    v = qkv[:, 2 * H:3 * H].reshape(Bt, S, H)

    mask = mask_ref[...]                                    # (num_heads*S, H)
    q_rep = jnp.concatenate([q] * num_heads, axis=1) * mask # (Bt, NH*S, H)

    scale = 1.0 / (hd ** 0.5)
    s = jnp.einsum('bqd,bkd->bqk', q_rep.astype(bf16), k.astype(bf16),
                   preferred_element_type=jnp.float32) * scale   # (Bt, NH*S, S)
    s = s - jnp.max(s, axis=-1, keepdims=True)
    p = jnp.exp(s)
    p = p * pl.reciprocal(jnp.sum(p, axis=-1, keepdims=True), approx=True)
    o = jnp.einsum('bqk,bkd->bqd', p.astype(bf16), v.astype(bf16),
                   preferred_element_type=jnp.float32)      # (Bt, NH*S, H)
    o = o * mask
    z = jnp.dot(o.reshape(Bt * num_heads * S, H).astype(bf16), w_out_ref[...],
                preferred_element_type=jnp.float32).reshape(Bt, num_heads * S, H)
    attn = z[:, 0:S]
    for h in range(1, num_heads):                           # sum head contributions
        attn = attn + z[:, h * S:(h + 1) * S]               # (Bt, S, H)

    # ---- bidirectional LSTM with projection (proj_size = H // 2) ------------
    # Forward direction: input-path gates precomputed in one matmul; the
    # recurrence carries hc_t = o_t * tanh(c_t) and uses the folded weight
    # W_comb = (w_hh @ w_hr).T so each step has a single dependent matmul.
    attn2d = attn.reshape(Bt * S, H)
    gates_x = (jnp.dot(attn2d.astype(bf16), w_ih_f_ref[...],
                       preferred_element_type=jnp.float32)
               + b_f_ref[...]).reshape(Bt, S, H4)

    w_comb = w_comb_f_ref[...]
    c = jnp.zeros((Bt, H), jnp.float32)
    hc = jnp.zeros((Bt, H), jnp.float32)
    for t in range(S):                                      # static unroll (S small)
        g = gates_x[:, t, :] + jnp.dot(hc, w_comb, preferred_element_type=jnp.float32)
        sg = jax.nn.sigmoid(g)                              # one EUP push on 4H lanes
        i_g = sg[:, 0:H]
        f_g = sg[:, H:2 * H]
        o_g = sg[:, 3 * H:4 * H]
        g_g = jnp.tanh(g[:, 2 * H:3 * H])
        c = f_g * c + i_g * g_g
        hc = o_g * jnp.tanh(c)
    # h_f = hc @ w_hr_f.T is folded into w_reg_f below.

    # Reverse direction: the regressor only consumes lstm_out[:, -1, :], and for
    # the reverse direction that timestep is exactly the *first* reverse step
    # (input x_{S-1}, zero initial state) -> a single step is mathematically exact.
    # (Validated against the full bidirectional reference in __main__.)
    xt = attn[:, S - 1, :]
    gb = (jnp.dot(xt.astype(bf16), w_ih_b_ref[...],
                  preferred_element_type=jnp.float32) + b_b_ref[...])
    sgb = jax.nn.sigmoid(gb)
    c_b = sgb[:, 0:H] * jnp.tanh(gb[:, 2 * H:3 * H])        # f-gate * c0 == 0
    hc_b = sgb[:, 3 * H:4 * H] * jnp.tanh(c_b)
    # h_b = hc_b @ w_hr_b.T is folded into w_reg_b below.

    # ---- regressor: Linear(no bias) -> SiLU -> (Dropout = id) -> Linear -----
    # concat([h_f, h_b]) @ w_r1.T  ==  hc @ (w_hr_f.T @ w_r1.T[:P])
    #                                + hc_b @ (w_hr_b.T @ w_r1.T[P:])
    zr = (jnp.dot(hc, w_reg_f_ref[...], preferred_element_type=jnp.float32)
          + jnp.dot(hc_b, w_reg_b_ref[...], preferred_element_type=jnp.float32))
    zr = zr * jax.nn.sigmoid(zr)
    out_ref[...] = (jnp.dot(zr, w_r2_ref[...], preferred_element_type=jnp.float32)
                    + b_r2_ref[...])


def prepare_params(p):
    """One-time weight preparation (transpose / fuse / fold).  Cache the result."""
    H = p['w_fe'].shape[0]
    P = H // 2
    bf16 = jnp.bfloat16
    w_r1_T = p['w_r1'].T                                    # (H, P)
    return dict(
        w_fe_T=p['w_fe'].T.astype(bf16),
        b_fe=p['b_fe'].reshape(1, H),
        ln_w=p['ln_w'].reshape(1, H),
        ln_b=p['ln_b'].reshape(1, H),
        w_in_T=p['w_in'].T.astype(bf16),
        w_out_T=p['w_out'].T.astype(bf16),
        # forward LSTM direction
        w_ih_f_T=p['w_ih_f'].T.astype(bf16),
        b_f=(p['b_ih_f'] + p['b_hh_f']).reshape(1, 4 * H),
        w_comb_f=(p['w_hh_f'] @ p['w_hr_f']).T,             # (H, 4H), f32
        # reverse LSTM direction (only the single exact last-timestep step is needed)
        w_ih_b_T=p['w_ih_b'].T.astype(bf16),
        b_b=(p['b_ih_b'] + p['b_hh_b']).reshape(1, 4 * H),
        # regressor first layer with the LSTM output projections folded in
        w_reg_f=p['w_hr_f'].T @ w_r1_T[:P, :],              # (H, P)
        w_reg_b=p['w_hr_b'].T @ w_r1_T[P:, :],              # (H, P)
        w_r2_T=p['w_r2'].T,
        b_r2=p['b_r2'].reshape(1, 1),
    )


def lightweight_lstm_predictor(x, prep, num_heads=4, batch_tile=8):
    """Pallas wrapper. x: (batch, seq, input_size) f32 -> (batch, 1) f32."""
    B, S, I = x.shape
    H = prep['w_fe_T'].shape[1]
    hd = H // num_heads

    # Head mask for the batched (all-heads-at-once) attention: row h*S+i selects
    # the feature columns of head h.
    rows = np.arange(num_heads * S) // S
    cols = np.arange(H) // hd
    head_mask = jnp.asarray((rows[:, None] == cols[None, :]).astype(np.float32))

    bt = B if B <= batch_tile else batch_tile
    grid = (pl.cdiv(B, bt),)

    weights = (
        head_mask,
        prep['w_fe_T'], prep['b_fe'], prep['ln_w'], prep['ln_b'],
        prep['w_in_T'], prep['w_out_T'],
        prep['w_ih_f_T'], prep['b_f'], prep['w_comb_f'],
        prep['w_ih_b_T'], prep['b_b'],
        prep['w_reg_f'], prep['w_reg_b'], prep['w_r2_T'], prep['b_r2'],
    )

    def full_spec(a):
        nd = a.ndim
        return pl.BlockSpec(a.shape, lambda i, nd=nd: (0,) * nd)

    in_specs = [pl.BlockSpec((bt, S, I), lambda i: (i, 0, 0))]
    in_specs += [full_spec(w) for w in weights]
    out_spec = pl.BlockSpec((bt, 1), lambda i: (i, 0))

    kernel = functools.partial(lstm_predictor_kernel, num_heads=num_heads)
    return pl.pallas_call(
        kernel,
        out_shape=jax.ShapeDtypeStruct((B, 1), jnp.float32),
        grid=grid,
        in_specs=in_specs,
        out_specs=out_spec,
        compiler_params=pltpu.CompilerParams(dimension_semantics=("parallel",)),
    )(x, *weights)


def init_params(key, input_size, hidden_size, num_heads):
    """Deterministic synthetic parameters with the exact shapes of the module."""
    H, I = hidden_size, input_size
    P = H // 2
    ks = jax.random.split(key, 24)

    def n(k, shape, scale=0.1):
        return (scale * jax.random.normal(k, shape)).astype(jnp.float32)

    return dict(
        # feature_extractor
        w_fe=n(ks[0], (H, I)), b_fe=n(ks[1], (H,)),
        ln_w=(1.0 + n(ks[2], (H,))).astype(jnp.float32), ln_b=n(ks[3], (H,)),
        # MultiheadAttention (bias=False)
        w_in=n(ks[4], (3 * H, H)), w_out=n(ks[5], (H, H)),
        # LSTM, forward direction (proj_size = P)
        w_ih_f=n(ks[6], (4 * H, H)), w_hh_f=n(ks[7], (4 * H, P)),
        b_ih_f=n(ks[8], (4 * H,)), b_hh_f=n(ks[9], (4 * H,)),
        w_hr_f=n(ks[10], (P, H)),
        # LSTM, reverse direction
        w_ih_b=n(ks[11], (4 * H, H)), w_hh_b=n(ks[12], (4 * H, P)),
        b_ih_b=n(ks[13], (4 * H,)), b_hh_b=n(ks[14], (4 * H,)),
        w_hr_b=n(ks[15], (P, H)),
        # regressor
        w_r1=n(ks[16], (P, H)), w_r2=n(ks[17], (1, P)), b_r2=n(ks[18], (1,)),
    )


def reference_forward(x, p, num_heads=4):
    """Pure-JAX f32 reference with the full bidirectional LSTM (for validation)."""
    B, S, _ = x.shape
    H = p['w_fe'].shape[0]
    P = H // 2
    hd = H // num_heads

    feat = x @ p['w_fe'].T + p['b_fe']
    mu = feat.mean(-1, keepdims=True)
    var = ((feat - mu) ** 2).mean(-1, keepdims=True)
    feat = (feat - mu) / jnp.sqrt(var + 1e-5) * p['ln_w'] + p['ln_b']
    feat = feat * jax.nn.sigmoid(feat)

    qkv = feat @ p['w_in'].T
    q, k, v = qkv[..., :H], qkv[..., H:2 * H], qkv[..., 2 * H:]

    def split(t):
        return t.reshape(B, S, num_heads, hd).transpose(0, 2, 1, 3)

    qh, kh, vh = split(q), split(k), split(v)
    s = jnp.einsum('bhqd,bhkd->bhqk', qh, kh) / jnp.sqrt(hd)
    pw = jax.nn.softmax(s, axis=-1)
    o = jnp.einsum('bhqk,bhkd->bhqd', pw, vh).transpose(0, 2, 1, 3).reshape(B, S, H)
    attn = o @ p['w_out'].T

    def lstm_dir(xseq, w_ih, w_hh, b_ih, b_hh, w_hr):
        h = jnp.zeros((B, P))
        c = jnp.zeros((B, H))
        outs = []
        for t in range(xseq.shape[1]):
            g = xseq[:, t] @ w_ih.T + h @ w_hh.T + b_ih + b_hh
            i_g = jax.nn.sigmoid(g[:, :H])
            f_g = jax.nn.sigmoid(g[:, H:2 * H])
            g_g = jnp.tanh(g[:, 2 * H:3 * H])
            o_g = jax.nn.sigmoid(g[:, 3 * H:])
            c = f_g * c + i_g * g_g
            h = (o_g * jnp.tanh(c)) @ w_hr.T
            outs.append(h)
        return jnp.stack(outs, axis=1)

    fwd = lstm_dir(attn, p['w_ih_f'], p['w_hh_f'], p['b_ih_f'], p['b_hh_f'], p['w_hr_f'])
    bwd = lstm_dir(attn[:, ::-1], p['w_ih_b'], p['w_hh_b'], p['b_ih_b'], p['b_hh_b'],
                   p['w_hr_b'])[:, ::-1]
    lstm_out = jnp.concatenate([fwd, bwd], axis=-1)
    last = lstm_out[:, -1]
    z = last @ p['w_r1'].T
    z = z * jax.nn.sigmoid(z)
    return z @ p['w_r2'].T + p['b_r2']


if __name__ == "__main__":
    # batch >= 8 to fill the f32 sublane dimension (per perf review); still small.
    B, S, I, H, NH = 8, 8, 16, 32, 4   # batch, seq, input_size, hidden_size, heads
    key = jax.random.PRNGKey(0)
    pkey, xkey = jax.random.split(key)
    params = init_params(pkey, I, H, NH)
    prep = prepare_params(params)       # one-time weight prep (cache across calls)
    x = jax.random.normal(xkey, (B, S, I), dtype=jnp.float32)

    out = lightweight_lstm_predictor(x, prep, num_heads=NH)
    out = jax.block_until_ready(out)
    assert out.shape == (B, 1)

    ref = reference_forward(x, params, num_heads=NH)
    np.testing.assert_allclose(np.asarray(out), np.asarray(ref), rtol=2e-2, atol=2e-2)

    # TODO(synk): dropout layers are treated as identity (eval-mode semantics);
    # training-mode dropout masks are not implemented.
    print("KERNEL_OK")
</pallas_src>

<mosaic_0001>
module attributes {stable_mosaic.version = 11 : i64} {
  func.func @lstm_predictor_kernel(%arg0: i32, %arg1: memref<8x8x16xf32, #tpu.memory_space<vmem>>, %arg2: memref<32x32xf32, #tpu.memory_space<vmem>>, %arg3: memref<16x32xbf16, #tpu.memory_space<vmem>>, %arg4: memref<1x32xf32, #tpu.memory_space<vmem>>, %arg5: memref<1x32xf32, #tpu.memory_space<vmem>>, %arg6: memref<1x32xf32, #tpu.memory_space<vmem>>, %arg7: memref<32x96xbf16, #tpu.memory_space<vmem>>, %arg8: memref<32x32xbf16, #tpu.memory_space<vmem>>, %arg9: memref<32x128xbf16, #tpu.memory_space<vmem>>, %arg10: memref<1x128xf32, #tpu.memory_space<vmem>>, %arg11: memref<32x128xf32, #tpu.memory_space<vmem>>, %arg12: memref<32x128xbf16, #tpu.memory_space<vmem>>, %arg13: memref<1x128xf32, #tpu.memory_space<vmem>>, %arg14: memref<32x16xf32, #tpu.memory_space<vmem>>, %arg15: memref<32x16xf32, #tpu.memory_space<vmem>>, %arg16: memref<16x1xf32, #tpu.memory_space<vmem>>, %arg17: memref<1x1xf32, #tpu.memory_space<vmem>>, %arg18: memref<8x1xf32, #tpu.memory_space<vmem>>) attributes {dimension_semantics = [#tpu.dimension_semantics<parallel>], iteration_bounds = array<i64: 1>, scalar_prefetch = 0 : i64, scratch_operands = 0 : i64, tpu.core_type = #tpu.core_type<tc>, window_params = [{transform_indices = @transform_0, window_bounds = array<i64: 8, 8, 16>}, {pipeline_mode = #tpu.pipeline_mode<synchronous>, transform_indices = @transform_1, window_bounds = array<i64: 32, 32>}, {pipeline_mode = #tpu.pipeline_mode<synchronous>, transform_indices = @transform_2, window_bounds = array<i64: 16, 32>}, {pipeline_mode = #tpu.pipeline_mode<synchronous>, transform_indices = @transform_3, window_bounds = array<i64: 1, 32>}, {pipeline_mode = #tpu.pipeline_mode<synchronous>, transform_indices = @transform_4, window_bounds = array<i64: 1, 32>}, {pipeline_mode = #tpu.pipeline_mode<synchronous>, transform_indices = @transform_5, window_bounds = array<i64: 1, 32>}, {pipeline_mode = #tpu.pipeline_mode<synchronous>, transform_indices = @transform_6, window_bounds = array<i64: 32, 96>}, {pipeline_mode = #tpu.pipeline_mode<synchronous>, transform_indices = @transform_7, window_bounds = array<i64: 32, 32>}, {pipeline_mode = #tpu.pipeline_mode<synchronous>, transform_indices = @transform_8, window_bounds = array<i64: 32, 128>}, {pipeline_mode = #tpu.pipeline_mode<synchronous>, transform_indices = @transform_9, window_bounds = array<i64: 1, 128>}, {pipeline_mode = #tpu.pipeline_mode<synchronous>, transform_indices = @transform_10, window_bounds = array<i64: 32, 128>}, {pipeline_mode = #tpu.pipeline_mode<synchronous>, transform_indices = @transform_11, window_bounds = array<i64: 32, 128>}, {pipeline_mode = #tpu.pipeline_mode<synchronous>, transform_indices = @transform_12, window_bounds = array<i64: 1, 128>}, {pipeline_mode = #tpu.pipeline_mode<synchronous>, transform_indices = @transform_13, window_bounds = array<i64: 32, 16>}, {pipeline_mode = #tpu.pipeline_mode<synchronous>, transform_indices = @transform_14, window_bounds = array<i64: 32, 16>}, {pipeline_mode = #tpu.pipeline_mode<synchronous>, transform_indices = @transform_15, window_bounds = array<i64: 16, 1>}, {pipeline_mode = #tpu.pipeline_mode<synchronous>, transform_indices = @transform_16, window_bounds = array<i64: 1, 1>}, {transform_indices = @transform_17, window_bounds = array<i64: 8, 1>}]} {
    %c0 = arith.constant 0 : index
    %c0_0 = arith.constant 0 : index
    %c0_1 = arith.constant 0 : index
    %0 = vector.load %arg1[%c0, %c0_0, %c0_1] : memref<8x8x16xf32, #tpu.memory_space<vmem>>, vector<8x8x16xf32>
    %1 = vector.shape_cast %0 : vector<8x8x16xf32> to vector<64x16xf32>
    %2 = arith.truncf %1 : vector<64x16xf32> to vector<64x16xbf16>
    %c0_2 = arith.constant 0 : index
    %c0_3 = arith.constant 0 : index
    %3 = vector.load %arg3[%c0_2, %c0_3] : memref<16x32xbf16, #tpu.memory_space<vmem>>, vector<16x32xbf16>
    %cst = arith.constant dense<0.000000e+00> : vector<64x32xf32>
    %4 = tpu.matmul %2, %3, %cst {dimension_numbers = #tpu.dot_dimension_numbers<[1], [0], [0], [1], [0, 0, 1, 1], [], []>} : vector<64x16xbf16>, vector<16x32xbf16>, vector<64x32xf32> -> vector<64x32xf32>
    %c0_4 = arith.constant 0 : index
    %c0_5 = arith.constant 0 : index
    %5 = vector.load %arg4[%c0_4, %c0_5] : memref<1x32xf32, #tpu.memory_space<vmem>>, vector<1x32xf32>
    %6 = vector.broadcast %5 : vector<1x32xf32> to vector<64x32xf32>
    %7 = arith.addf %4, %6 : vector<64x32xf32>
    %cst_6 = arith.constant dense<0.000000e+00> : vector<64xf32>
    %8 = vector.multi_reduction <add>, %7, %cst_6 [1] : vector<64x32xf32> to vector<64xf32>
    %9 = vector.shape_cast %8 : vector<64xf32> to vector<64x1xf32>
    %cst_7 = arith.constant 3.200000e+01 : f32
    %10 = vector.broadcast %cst_7 : f32 to vector<64x1xf32>
    %11 = arith.divf %9, %10 : vector<64x1xf32>
    %12 = vector.broadcast %11 : vector<64x1xf32> to vector<64x32xf32>
    %13 = arith.subf %7, %12 : vector<64x32xf32>
    %14 = arith.mulf %13, %13 : vector<64x32xf32>
    %cst_8 = arith.constant dense<0.000000e+00> : vector<64xf32>
    %15 = vector.multi_reduction <add>, %14, %cst_8 [1] : vector<64x32xf32> to vector<64xf32>
    %16 = vector.shape_cast %15 : vector<64xf32> to vector<64x1xf32>
    %cst_9 = arith.constant 3.200000e+01 : f32
    %17 = vector.broadcast %cst_9 : f32 to vector<64x1xf32>
    %18 = arith.divf %16, %17 : vector<64x1xf32>
    %19 = vector.broadcast %11 : vector<64x1xf32> to vector<64x32xf32>
    %20 = arith.subf %7, %19 : vector<64x32xf32>
    %cst_10 = arith.constant 9.99999974E-6 : f32
    %21 = vector.broadcast %cst_10 : f32 to vector<64x1xf32>
    %22 = arith.addf %18, %21 : vector<64x1xf32>
    %23 = math.rsqrt %22 : vector<64x1xf32>
    %24 = vector.broadcast %23 : vector<64x1xf32> to vector<64x32xf32>
    %25 = arith.mulf %20, %24 : vector<64x32xf32>
    %c0_11 = arith.constant 0 : index
    %c0_12 = arith.constant 0 : index
    %26 = vector.load %arg5[%c0_11, %c0_12] : memref<1x32xf32, #tpu.memory_space<vmem>>, vector<1x32xf32>
    %27 = vector.broadcast %26 : vector<1x32xf32> to vector<64x32xf32>
    %28 = arith.mulf %25, %27 : vector<64x32xf32>
    %c0_13 = arith.constant 0 : index
    %c0_14 = arith.constant 0 : index
    %29 = vector.load %arg6[%c0_13, %c0_14] : memref<1x32xf32, #tpu.memory_space<vmem>>, vector<1x32xf32>
    %30 = vector.broadcast %29 : vector<1x32xf32> to vector<64x32xf32>
    %31 = arith.addf %28, %30 : vector<64x32xf32>
    %32 = arith.negf %31 : vector<64x32xf32>
    %33 = math.exp %32 : vector<64x32xf32>
    %cst_15 = arith.constant 1.000000e+00 : f32
    %34 = vector.broadcast %cst_15 : f32 to vector<64x32xf32>
    %35 = arith.addf %34, %33 : vector<64x32xf32>
    %36 = arith.divf %34, %35 : vector<64x32xf32>
    %37 = arith.mulf %31, %36 : vector<64x32xf32>
    %38 = arith.truncf %37 : vector<64x32xf32> to vector<64x32xbf16>
    %c0_16 = arith.constant 0 : index
    %c0_17 = arith.constant 0 : index
    %39 = vector.load %arg7[%c0_16, %c0_17] : memref<32x96xbf16, #tpu.memory_space<vmem>>, vector<32x96xbf16>
    %cst_18 = arith.constant dense<0.000000e+00> : vector<64x96xf32>
    %40 = tpu.matmul %38, %39, %cst_18 {dimension_numbers = #tpu.dot_dimension_numbers<[1], [0], [0], [1], [0, 0, 1, 1], [], []>} : vector<64x32xbf16>, vector<32x96xbf16>, vector<64x96xf32> -> vector<64x96xf32>
    %41 = vector.extract_strided_slice %40 {offsets = [0, 0], sizes = [64, 32], strides = [1, 1]} : vector<64x96xf32> to vector<64x32xf32>
    %42 = vector.shape_cast %41 : vector<64x32xf32> to vector<8x8x32xf32>
    %43 = vector.extract_strided_slice %40 {offsets = [0, 32], sizes = [64, 32], strides = [1, 1]} : vector<64x96xf32> to vector<64x32xf32>
    %44 = vector.shape_cast %43 : vector<64x32xf32> to vector<8x8x32xf32>
    %45 = vector.extract_strided_slice %40 {offsets = [0, 64], sizes = [64, 32], strides = [1, 1]} : vector<64x96xf32> to vector<64x32xf32>
    %46 = vector.shape_cast %45 : vector<64x32xf32> to vector<8x8x32xf32>
    %c0_19 = arith.constant 0 : index
    %c0_20 = arith.constant 0 : index
    %47 = vector.load %arg2[%c0_19, %c0_20] : memref<32x32xf32, #tpu.memory_space<vmem>>, vector<32x32xf32>
    %48 = tpu.concatenate %42, %42, %42, %42 in 1 : vector<8x8x32xf32>, vector<8x8x32xf32>, vector<8x8x32xf32>, vector<8x8x32xf32> -> vector<8x32x32xf32>
    %49 = vector.shape_cast %47 : vector<32x32xf32> to vector<1x32x32xf32>
    %50 = vector.broadcast %49 : vector<1x32x32xf32> to vector<8x32x32xf32>
    %51 = arith.mulf %48, %50 : vector<8x32x32xf32>
    %52 = arith.truncf %51 : vector<8x32x32xf32> to vector<8x32x32xbf16>
    %53 = arith.truncf %44 : vector<8x8x32xf32> to vector<8x8x32xbf16>
    "tpu.trace_start"() <{level = 10 : i32, message = "bqd,bkd->bqk"}> : () -> ()
    %cst_21 = arith.constant dense<0.000000e+00> : vector<8x32x8xf32>
    %54 = tpu.matmul %52, %53, %cst_21 {dimension_numbers = #tpu.dot_dimension_numbers<[2], [2], [1], [1], [0, 0, 0, 1, 1, 1], [0], [0]>} : vector<8x32x32xbf16>, vector<8x8x32xbf16>, vector<8x32x8xf32> -> vector<8x32x8xf32>
    "tpu.trace_stop"() : () -> ()
    %cst_22 = arith.constant 0.353553385 : f32
    %55 = vector.broadcast %cst_22 : f32 to vector<8x32x8xf32>
    %56 = arith.mulf %54, %55 : vector<8x32x8xf32>
    %cst_23 = arith.constant dense<0xFF800000> : vector<8x32xf32>
    %57 = vector.multi_reduction <maximumf>, %56, %cst_23 [2] : vector<8x32x8xf32> to vector<8x32xf32>
    %58 = vector.shape_cast %57 : vector<8x32xf32> to vector<8x32x1xf32>
    %59 = vector.broadcast %58 : vector<8x32x1xf32> to vector<8x32x8xf32>
    %60 = arith.subf %56, %59 : vector<8x32x8xf32>
    %61 = math.exp %60 : vector<8x32x8xf32>
    %cst_24 = arith.constant dense<0.000000e+00> : vector<8x32xf32>
    %62 = vector.multi_reduction <add>, %61, %cst_24 [2] : vector<8x32x8xf32> to vector<8x32xf32>
    %63 = vector.shape_cast %62 : vector<8x32xf32> to vector<8x32x1xf32>
    %64 = tpu.reciprocal %63 {approx = true} : vector<8x32x1xf32> -> vector<8x32x1xf32>
    %65 = vector.broadcast %64 : vector<8x32x1xf32> to vector<8x32x8xf32>
    %66 = arith.mulf %61, %65 : vector<8x32x8xf32>
    %67 = arith.truncf %66 : vector<8x32x8xf32> to vector<8x32x8xbf16>
    %68 = arith.truncf %46 : vector<8x8x32xf32> to vector<8x8x32xbf16>
    "tpu.trace_start"() <{level = 10 : i32, message = "bqk,bkd->bqd"}> : () -> ()
    %cst_25 = arith.constant dense<0.000000e+00> : vector<8x32x32xf32>
    %69 = tpu.matmul %67, %68, %cst_25 {dimension_numbers = #tpu.dot_dimension_numbers<[2], [1], [1], [2], [0, 0, 0, 1, 1, 2], [0], [0]>} : vector<8x32x8xbf16>, vector<8x8x32xbf16>, vector<8x32x32xf32> -> vector<8x32x32xf32>
    "tpu.trace_stop"() : () -> ()
    %70 = vector.shape_cast %47 : vector<32x32xf32> to vector<1x32x32xf32>
    %71 = vector.broadcast %70 : vector<1x32x32xf32> to vector<8x32x32xf32>
    %72 = arith.mulf %69, %71 : vector<8x32x32xf32>
    %73 = vector.shape_cast %72 : vector<8x32x32xf32> to vector<256x32xf32>
    %74 = arith.truncf %73 : vector<256x32xf32> to vector<256x32xbf16>
    %c0_26 = arith.constant 0 : index
    %c0_27 = arith.constant 0 : index
    %75 = vector.load %arg8[%c0_26, %c0_27] : memref<32x32xbf16, #tpu.memory_space<vmem>>, vector<32x32xbf16>
    %cst_28 = arith.constant dense<0.000000e+00> : vector<256x32xf32>
    %76 = tpu.matmul %74, %75, %cst_28 {dimension_numbers = #tpu.dot_dimension_numbers<[1], [0], [0], [1], [0, 0, 1, 1], [], []>} : vector<256x32xbf16>, vector<32x32xbf16>, vector<256x32xf32> -> vector<256x32xf32>
    %77 = vector.shape_cast %76 : vector<256x32xf32> to vector<8x32x32xf32>
    %78 = vector.extract_strided_slice %77 {offsets = [0, 0, 0], sizes = [8, 8, 32], strides = [1, 1, 1]} : vector<8x32x32xf32> to vector<8x8x32xf32>
    %79 = vector.extract_strided_slice %77 {offsets = [0, 8, 0], sizes = [8, 8, 32], strides = [1, 1, 1]} : vector<8x32x32xf32> to vector<8x8x32xf32>
    %80 = arith.addf %78, %79 : vector<8x8x32xf32>
    %81 = vector.extract_strided_slice %77 {offsets = [0, 16, 0], sizes = [8, 8, 32], strides = [1, 1, 1]} : vector<8x32x32xf32> to vector<8x8x32xf32>
    %82 = arith.addf %80, %81 : vector<8x8x32xf32>
    %83 = vector.extract_strided_slice %77 {offsets = [0, 24, 0], sizes = [8, 8, 32], strides = [1, 1, 1]} : vector<8x32x32xf32> to vector<8x8x32xf32>
    %84 = arith.addf %82, %83 : vector<8x8x32xf32>
    %85 = vector.shape_cast %84 : vector<8x8x32xf32> to vector<64x32xf32>
    %86 = arith.truncf %85 : vector<64x32xf32> to vector<64x32xbf16>
    %c0_29 = arith.constant 0 : index
    %c0_30 = arith.constant 0 : index
    %87 = vector.load %arg9[%c0_29, %c0_30] : memref<32x128xbf16, #tpu.memory_space<vmem>>, vector<32x128xbf16>
    %cst_31 = arith.constant dense<0.000000e+00> : vector<64x128xf32>
    %88 = tpu.matmul %86, %87, %cst_31 {dimension_numbers = #tpu.dot_dimension_numbers<[1], [0], [0], [1], [0, 0, 1, 1], [], []>} : vector<64x32xbf16>, vector<32x128xbf16>, vector<64x128xf32> -> vector<64x128xf32>
    %c0_32 = arith.constant 0 : index
    %c0_33 = arith.constant 0 : index
    %89 = vector.load %arg10[%c0_32, %c0_33] : memref<1x128xf32, #tpu.memory_space<vmem>>, vector<1x128xf32>
    %90 = vector.broadcast %89 : vector<1x128xf32> to vector<64x128xf32>
    %91 = arith.addf %88, %90 : vector<64x128xf32>
    %92 = vector.shape_cast %91 : vector<64x128xf32> to vector<8x8x128xf32>
    %c0_34 = arith.constant 0 : index
    %c0_35 = arith.constant 0 : index
    %93 = vector.load %arg11[%c0_34, %c0_35] : memref<32x128xf32, #tpu.memory_space<vmem>>, vector<32x128xf32>
    %cst_36 = arith.constant 0.000000e+00 : f32
    %94 = vector.broadcast %cst_36 : f32 to vector<8x32xf32>
    %cst_37 = arith.constant 0.000000e+00 : f32
    %95 = vector.broadcast %cst_37 : f32 to vector<8x32xf32>
    %96 = vector.extract_strided_slice %92 {offsets = [0, 0, 0], sizes = [8, 1, 128], strides = [1, 1, 1]} : vector<8x8x128xf32> to vector<8x1x128xf32>
    %97 = vector.shape_cast %96 : vector<8x1x128xf32> to vector<8x128xf32>
    %cst_38 = arith.constant dense<0.000000e+00> : vector<8x128xf32>
    %98 = tpu.matmul %95, %93, %cst_38 {dimension_numbers = #tpu.dot_dimension_numbers<[1], [0], [0], [1], [0, 0, 1, 1], [], []>} : vector<8x32xf32>, vector<32x128xf32>, vector<8x128xf32> -> vector<8x128xf32>
    %99 = arith.addf %97, %98 : vector<8x128xf32>
    %100 = arith.negf %99 : vector<8x128xf32>
    %101 = math.exp %100 : vector<8x128xf32>
    %cst_39 = arith.constant 1.000000e+00 : f32
    %102 = vector.broadcast %cst_39 : f32 to vector<8x128xf32>
    %103 = arith.addf %102, %101 : vector<8x128xf32>
    %104 = arith.divf %102, %103 : vector<8x128xf32>
    %105 = vector.extract_strided_slice %104 {offsets = [0, 0], sizes = [8, 32], strides = [1, 1]} : vector<8x128xf32> to vector<8x32xf32>
    %106 = vector.extract_strided_slice %104 {offsets = [0, 32], sizes = [8, 32], strides = [1, 1]} : vector<8x128xf32> to vector<8x32xf32>
    %107 = vector.extract_strided_slice %104 {offsets = [0, 96], sizes = [8, 32], strides = [1, 1]} : vector<8x128xf32> to vector<8x32xf32>
    %108 = vector.extract_strided_slice %99 {offsets = [0, 64], sizes = [8, 32], strides = [1, 1]} : vector<8x128xf32> to vector<8x32xf32>
    %109 = math.tanh %108 : vector<8x32xf32>
    %110 = arith.mulf %106, %94 : vector<8x32xf32>
    %111 = arith.mulf %105, %109 : vector<8x32xf32>
    %112 = arith.addf %110, %111 : vector<8x32xf32>
    %113 = math.tanh %112 : vector<8x32xf32>
    %114 = arith.mulf %107, %113 : vector<8x32xf32>
    %115 = vector.extract_strided_slice %92 {offsets = [0, 1, 0], sizes = [8, 1, 128], strides = [1, 1, 1]} : vector<8x8x128xf32> to vector<8x1x128xf32>
    %116 = vector.shape_cast %115 : vector<8x1x128xf32> to vector<8x128xf32>
    %cst_40 = arith.constant dense<0.000000e+00> : vector<8x128xf32>
    %117 = tpu.matmul %114, %93, %cst_40 {dimension_numbers = #tpu.dot_dimension_numbers<[1], [0], [0], [1], [0, 0, 1, 1], [], []>} : vector<8x32xf32>, vector<32x128xf32>, vector<8x128xf32> -> vector<8x128xf32>
    %118 = arith.addf %116, %117 : vector<8x128xf32>
    %119 = arith.negf %118 : vector<8x128xf32>
    %120 = math.exp %119 : vector<8x128xf32>
    %cst_41 = arith.constant 1.000000e+00 : f32
    %121 = vector.broadcast %cst_41 : f32 to vector<8x128xf32>
    %122 = arith.addf %121, %120 : vector<8x128xf32>
    %123 = arith.divf %121, %122 : vector<8x128xf32>
    %124 = vector.extract_strided_slice %123 {offsets = [0, 0], sizes = [8, 32], strides = [1, 1]} : vector<8x128xf32> to vector<8x32xf32>
    %125 = vector.extract_strided_slice %123 {offsets = [0, 32], sizes = [8, 32], strides = [1, 1]} : vector<8x128xf32> to vector<8x32xf32>
    %126 = vector.extract_strided_slice %123 {offsets = [0, 96], sizes = [8, 32], strides = [1, 1]} : vector<8x128xf32> to vector<8x32xf32>
    %127 = vector.extract_strided_slice %118 {offsets = [0, 64], sizes = [8, 32], strides = [1, 1]} : vector<8x128xf32> to vector<8x32xf32>
    %128 = math.tanh %127 : vector<8x32xf32>
    %129 = arith.mulf %125, %112 : vector<8x32xf32>
    %130 = arith.mulf %124, %128 : vector<8x32xf32>
    %131 = arith.addf %129, %130 : vector<8x32xf32>
    %132 = math.tanh %131 : vector<8x32xf32>
    %133 = arith.mulf %126, %132 : vector<8x32xf32>
    %134 = vector.extract_strided_slice %92 {offsets = [0, 2, 0], sizes = [8, 1, 128], strides = [1, 1, 1]} : vector<8x8x128xf32> to vector<8x1x128xf32>
    %135 = vector.shape_cast %134 : vector<8x1x128xf32> to vector<8x128xf32>
    %cst_42 = arith.constant dense<0.000000e+00> : vector<8x128xf32>
    %136 = tpu.matmul %133, %93, %cst_42 {dimension_numbers = #tpu.dot_dimension_numbers<[1], [0], [0], [1], [0, 0, 1, 1], [], []>} : vector<8x32xf32>, vector<32x128xf32>, vector<8x128xf32> -> vector<8x128xf32>
    %137 = arith.addf %135, %136 : vector<8x128xf32>
    %138 = arith.negf %137 : vector<8x128xf32>
    %139 = math.exp %138 : vector<8x128xf32>
    %cst_43 = arith.constant 1.000000e+00 : f32
    %140 = vector.broadcast %cst_43 : f32 to vector<8x128xf32>
    %141 = arith.addf %140, %139 : vector<8x128xf32>
    %142 = arith.divf %140, %141 : vector<8x128xf32>
    %143 = vector.extract_strided_slice %142 {offsets = [0, 0], sizes = [8, 32], strides = [1, 1]} : vector<8x128xf32> to vector<8x32xf32>
    %144 = vector.extract_strided_slice %142 {offsets = [0, 32], sizes = [8, 32], strides = [1, 1]} : vector<8x128xf32> to vector<8x32xf32>
    %145 = vector.extract_strided_slice %142 {offsets = [0, 96], sizes = [8, 32], strides = [1, 1]} : vector<8x128xf32> to vector<8x32xf32>
    %146 = vector.extract_strided_slice %137 {offsets = [0, 64], sizes = [8, 32], strides = [1, 1]} : vector<8x128xf32> to vector<8x32xf32>
    %147 = math.tanh %146 : vector<8x32xf32>
    %148 = arith.mulf %144, %131 : vector<8x32xf32>
    %149 = arith.mulf %143, %147 : vector<8x32xf32>
    %150 = arith.addf %148, %149 : vector<8x32xf32>
    %151 = math.tanh %150 : vector<8x32xf32>
    %152 = arith.mulf %145, %151 : vector<8x32xf32>
    %153 = vector.extract_strided_slice %92 {offsets = [0, 3, 0], sizes = [8, 1, 128], strides = [1, 1, 1]} : vector<8x8x128xf32> to vector<8x1x128xf32>
    %154 = vector.shape_cast %153 : vector<8x1x128xf32> to vector<8x128xf32>
    %cst_44 = arith.constant dense<0.000000e+00> : vector<8x128xf32>
    %155 = tpu.matmul %152, %93, %cst_44 {dimension_numbers = #tpu.dot_dimension_numbers<[1], [0], [0], [1], [0, 0, 1, 1], [], []>} : vector<8x32xf32>, vector<32x128xf32>, vector<8x128xf32> -> vector<8x128xf32>
    %156 = arith.addf %154, %155 : vector<8x128xf32>
    %157 = arith.negf %156 : vector<8x128xf32>
    %158 = math.exp %157 : vector<8x128xf32>
    %cst_45 = arith.constant 1.000000e+00 : f32
    %159 = vector.broadcast %cst_45 : f32 to vector<8x128xf32>
    %160 = arith.addf %159, %158 : vector<8x128xf32>
    %161 = arith.divf %159, %160 : vector<8x128xf32>
    %162 = vector.extract_strided_slice %161 {offsets = [0, 0], sizes = [8, 32], strides = [1, 1]} : vector<8x128xf32> to vector<8x32xf32>
    %163 = vector.extract_strided_slice %161 {offsets = [0, 32], sizes = [8, 32], strides = [1, 1]} : vector<8x128xf32> to vector<8x32xf32>
    %164 = vector.extract_strided_slice %161 {offsets = [0, 96], sizes = [8, 32], strides = [1, 1]} : vector<8x128xf32> to vector<8x32xf32>
    %165 = vector.extract_strided_slice %156 {offsets = [0, 64], sizes = [8, 32], strides = [1, 1]} : vector<8x128xf32> to vector<8x32xf32>
    %166 = math.tanh %165 : vector<8x32xf32>
    %167 = arith.mulf %163, %150 : vector<8x32xf32>
    %168 = arith.mulf %162, %166 : vector<8x32xf32>
    %169 = arith.addf %167, %168 : vector<8x32xf32>
    %170 = math.tanh %169 : vector<8x32xf32>
    %171 = arith.mulf %164, %170 : vector<8x32xf32>
    %172 = vector.extract_strided_slice %92 {offsets = [0, 4, 0], sizes = [8, 1, 128], strides = [1, 1, 1]} : vector<8x8x128xf32> to vector<8x1x128xf32>
    %173 = vector.shape_cast %172 : vector<8x1x128xf32> to vector<8x128xf32>
    %cst_46 = arith.constant dense<0.000000e+00> : vector<8x128xf32>
    %174 = tpu.matmul %171, %93, %cst_46 {dimension_numbers = #tpu.dot_dimension_numbers<[1], [0], [0], [1], [0, 0, 1, 1], [], []>} : vector<8x32xf32>, vector<32x128xf32>, vector<8x128xf32> -> vector<8x128xf32>
    %175 = arith.addf %173, %174 : vector<8x128xf32>
    %176 = arith.negf %175 : vector<8x128xf32>
    %177 = math.exp %176 : vector<8x128xf32>
    %cst_47 = arith.constant 1.000000e+00 : f32
    %178 = vector.broadcast %cst_47 : f32 to vector<8x128xf32>
    %179 = arith.addf %178, %177 : vector<8x128xf32>
    %180 = arith.divf %178, %179 : vector<8x128xf32>
    %181 = vector.extract_strided_slice %180 {offsets = [0, 0], sizes = [8, 32], strides = [1, 1]} : vector<8x128xf32> to vector<8x32xf32>
    %182 = vector.extract_strided_slice %180 {offsets = [0, 32], sizes = [8, 32], strides = [1, 1]} : vector<8x128xf32> to vector<8x32xf32>
    %183 = vector.extract_strided_slice %180 {offsets = [0, 96], sizes = [8, 32], strides = [1, 1]} : vector<8x128xf32> to vector<8x32xf32>
    %184 = vector.extract_strided_slice %175 {offsets = [0, 64], sizes = [8, 32], strides = [1, 1]} : vector<8x128xf32> to vector<8x32xf32>
    %185 = math.tanh %184 : vector<8x32xf32>
    %186 = arith.mulf %182, %169 : vector<8x32xf32>
    %187 = arith.mulf %181, %185 : vector<8x32xf32>
    %188 = arith.addf %186, %187 : vector<8x32xf32>
    %189 = math.tanh %188 : vector<8x32xf32>
    %190 = arith.mulf %183, %189 : vector<8x32xf32>
    %191 = vector.extract_strided_slice %92 {offsets = [0, 5, 0], sizes = [8, 1, 128], strides = [1, 1, 1]} : vector<8x8x128xf32> to vector<8x1x128xf32>
    %192 = vector.shape_cast %191 : vector<8x1x128xf32> to vector<8x128xf32>
    %cst_48 = arith.constant dense<0.000000e+00> : vector<8x128xf32>
    %193 = tpu.matmul %190, %93, %cst_48 {dimension_numbers = #tpu.dot_dimension_numbers<[1], [0], [0], [1], [0, 0, 1, 1], [], []>} : vector<8x32xf32>, vector<32x128xf32>, vector<8x128xf32> -> vector<8x128xf32>
    %194 = arith.addf %192, %193 : vector<8x128xf32>
    %195 = arith.negf %194 : vector<8x128xf32>
    %196 = math.exp %195 : vector<8x128xf32>
    %cst_49 = arith.constant 1.000000e+00 : f32
    %197 = vector.broadcast %cst_49 : f32 to vector<8x128xf32>
    %198 = arith.addf %197, %196 : vector<8x128xf32>
    %199 = arith.divf %197, %198 : vector<8x128xf32>
    %200 = vector.extract_strided_slice %199 {offsets = [0, 0], sizes = [8, 32], strides = [1, 1]} : vector<8x128xf32> to vector<8x32xf32>
    %201 = vector.extract_strided_slice %199 {offsets = [0, 32], sizes = [8, 32], strides = [1, 1]} : vector<8x128xf32> to vector<8x32xf32>
    %202 = vector.extract_strided_slice %199 {offsets = [0, 96], sizes = [8, 32], strides = [1, 1]} : vector<8x128xf32> to vector<8x32xf32>
    %203 = vector.extract_strided_slice %194 {offsets = [0, 64], sizes = [8, 32], strides = [1, 1]} : vector<8x128xf32> to vector<8x32xf32>
    %204 = math.tanh %203 : vector<8x32xf32>
    %205 = arith.mulf %201, %188 : vector<8x32xf32>
    %206 = arith.mulf %200, %204 : vector<8x32xf32>
    %207 = arith.addf %205, %206 : vector<8x32xf32>
    %208 = math.tanh %207 : vector<8x32xf32>
    %209 = arith.mulf %202, %208 : vector<8x32xf32>
    %210 = vector.extract_strided_slice %92 {offsets = [0, 6, 0], sizes = [8, 1, 128], strides = [1, 1, 1]} : vector<8x8x128xf32> to vector<8x1x128xf32>
    %211 = vector.shape_cast %210 : vector<8x1x128xf32> to vector<8x128xf32>
    %cst_50 = arith.constant dense<0.000000e+00> : vector<8x128xf32>
    %212 = tpu.matmul %209, %93, %cst_50 {dimension_numbers = #tpu.dot_dimension_numbers<[1], [0], [0], [1], [0, 0, 1, 1], [], []>} : vector<8x32xf32>, vector<32x128xf32>, vector<8x128xf32> -> vector<8x128xf32>
    %213 = arith.addf %211, %212 : vector<8x128xf32>
    %214 = arith.negf %213 : vector<8x128xf32>
    %215 = math.exp %214 : vector<8x128xf32>
    %cst_51 = arith.constant 1.000000e+00 : f32
    %216 = vector.broadcast %cst_51 : f32 to vector<8x128xf32>
    %217 = arith.addf %216, %215 : vector<8x128xf32>
    %218 = arith.divf %216, %217 : vector<8x128xf32>
    %219 = vector.extract_strided_slice %218 {offsets = [0, 0], sizes = [8, 32], strides = [1, 1]} : vector<8x128xf32> to vector<8x32xf32>
    %220 = vector.extract_strided_slice %218 {offsets = [0, 32], sizes = [8, 32], strides = [1, 1]} : vector<8x128xf32> to vector<8x32xf32>
    %221 = vector.extract_strided_slice %218 {offsets = [0, 96], sizes = [8, 32], strides = [1, 1]} : vector<8x128xf32> to vector<8x32xf32>
    %222 = vector.extract_strided_slice %213 {offsets = [0, 64], sizes = [8, 32], strides = [1, 1]} : vector<8x128xf32> to vector<8x32xf32>
    %223 = math.tanh %222 : vector<8x32xf32>
    %224 = arith.mulf %220, %207 : vector<8x32xf32>
    %225 = arith.mulf %219, %223 : vector<8x32xf32>
    %226 = arith.addf %224, %225 : vector<8x32xf32>
    %227 = math.tanh %226 : vector<8x32xf32>
    %228 = arith.mulf %221, %227 : vector<8x32xf32>
    %229 = vector.extract_strided_slice %92 {offsets = [0, 7, 0], sizes = [8, 1, 128], strides = [1, 1, 1]} : vector<8x8x128xf32> to vector<8x1x128xf32>
    %230 = vector.shape_cast %229 : vector<8x1x128xf32> to vector<8x128xf32>
    %cst_52 = arith.constant dense<0.000000e+00> : vector<8x128xf32>
    %231 = tpu.matmul %228, %93, %cst_52 {dimension_numbers = #tpu.dot_dimension_numbers<[1], [0], [0], [1], [0, 0, 1, 1], [], []>} : vector<8x32xf32>, vector<32x128xf32>, vector<8x128xf32> -> vector<8x128xf32>
    %232 = arith.addf %230, %231 : vector<8x128xf32>
    %233 = arith.negf %232 : vector<8x128xf32>
    %234 = math.exp %233 : vector<8x128xf32>
    %cst_53 = arith.constant 1.000000e+00 : f32
    %235 = vector.broadcast %cst_53 : f32 to vector<8x128xf32>
    %236 = arith.addf %235, %234 : vector<8x128xf32>
    %237 = arith.divf %235, %236 : vector<8x128xf32>
    %238 = vector.extract_strided_slice %237 {offsets = [0, 0], sizes = [8, 32], strides = [1, 1]} : vector<8x128xf32> to vector<8x32xf32>
    %239 = vector.extract_strided_slice %237 {offsets = [0, 32], sizes = [8, 32], strides = [1, 1]} : vector<8x128xf32> to vector<8x32xf32>
    %240 = vector.extract_strided_slice %237 {offsets = [0, 96], sizes = [8, 32], strides = [1, 1]} : vector<8x128xf32> to vector<8x32xf32>
    %241 = vector.extract_strided_slice %232 {offsets = [0, 64], sizes = [8, 32], strides = [1, 1]} : vector<8x128xf32> to vector<8x32xf32>
    %242 = math.tanh %241 : vector<8x32xf32>
    %243 = arith.mulf %239, %226 : vector<8x32xf32>
    %244 = arith.mulf %238, %242 : vector<8x32xf32>
    %245 = arith.addf %243, %244 : vector<8x32xf32>
    %246 = math.tanh %245 : vector<8x32xf32>
    %247 = arith.mulf %240, %246 : vector<8x32xf32>
    %248 = vector.extract_strided_slice %84 {offsets = [0, 7, 0], sizes = [8, 1, 32], strides = [1, 1, 1]} : vector<8x8x32xf32> to vector<8x1x32xf32>
    %249 = vector.shape_cast %248 : vector<8x1x32xf32> to vector<8x32xf32>
    %250 = arith.truncf %249 : vector<8x32xf32> to vector<8x32xbf16>
    %c0_54 = arith.constant 0 : index
    %c0_55 = arith.constant 0 : index
    %251 = vector.load %arg12[%c0_54, %c0_55] : memref<32x128xbf16, #tpu.memory_space<vmem>>, vector<32x128xbf16>
    %cst_56 = arith.constant dense<0.000000e+00> : vector<8x128xf32>
    %252 = tpu.matmul %250, %251, %cst_56 {dimension_numbers = #tpu.dot_dimension_numbers<[1], [0], [0], [1], [0, 0, 1, 1], [], []>} : vector<8x32xbf16>, vector<32x128xbf16>, vector<8x128xf32> -> vector<8x128xf32>
    %c0_57 = arith.constant 0 : index
    %c0_58 = arith.constant 0 : index
    %253 = vector.load %arg13[%c0_57, %c0_58] : memref<1x128xf32, #tpu.memory_space<vmem>>, vector<1x128xf32>
    %254 = vector.broadcast %253 : vector<1x128xf32> to vector<8x128xf32>
    %255 = arith.addf %252, %254 : vector<8x128xf32>
    %256 = arith.negf %255 : vector<8x128xf32>
    %257 = math.exp %256 : vector<8x128xf32>
    %cst_59 = arith.constant 1.000000e+00 : f32
    %258 = vector.broadcast %cst_59 : f32 to vector<8x128xf32>
    %259 = arith.addf %258, %257 : vector<8x128xf32>
    %260 = arith.divf %258, %259 : vector<8x128xf32>
    %261 = vector.extract_strided_slice %260 {offsets = [0, 0], sizes = [8, 32], strides = [1, 1]} : vector<8x128xf32> to vector<8x32xf32>
    %262 = vector.extract_strided_slice %255 {offsets = [0, 64], sizes = [8, 32], strides = [1, 1]} : vector<8x128xf32> to vector<8x32xf32>
    %263 = math.tanh %262 : vector<8x32xf32>
    %264 = arith.mulf %261, %263 : vector<8x32xf32>
    %265 = vector.extract_strided_slice %260 {offsets = [0, 96], sizes = [8, 32], strides = [1, 1]} : vector<8x128xf32> to vector<8x32xf32>
    %266 = math.tanh %264 : vector<8x32xf32>
    %267 = arith.mulf %265, %266 : vector<8x32xf32>
    %c0_60 = arith.constant 0 : index
    %c0_61 = arith.constant 0 : index
    %268 = vector.load %arg14[%c0_60, %c0_61] : memref<32x16xf32, #tpu.memory_space<vmem>>, vector<32x16xf32>
    %cst_62 = arith.constant dense<0.000000e+00> : vector<8x16xf32>
    %269 = tpu.matmul %247, %268, %cst_62 {dimension_numbers = #tpu.dot_dimension_numbers<[1], [0], [0], [1], [0, 0, 1, 1], [], []>} : vector<8x32xf32>, vector<32x16xf32>, vector<8x16xf32> -> vector<8x16xf32>
    %c0_63 = arith.constant 0 : index
    %c0_64 = arith.constant 0 : index
    %270 = vector.load %arg15[%c0_63, %c0_64] : memref<32x16xf32, #tpu.memory_space<vmem>>, vector<32x16xf32>
    %cst_65 = arith.constant dense<0.000000e+00> : vector<8x16xf32>
    %271 = tpu.matmul %267, %270, %cst_65 {dimension_numbers = #tpu.dot_dimension_numbers<[1], [0], [0], [1], [0, 0, 1, 1], [], []>} : vector<8x32xf32>, vector<32x16xf32>, vector<8x16xf32> -> vector<8x16xf32>
    %272 = arith.addf %269, %271 : vector<8x16xf32>
    %273 = arith.negf %272 : vector<8x16xf32>
    %274 = math.exp %273 : vector<8x16xf32>
    %cst_66 = arith.constant 1.000000e+00 : f32
    %275 = vector.broadcast %cst_66 : f32 to vector<8x16xf32>
    %276 = arith.addf %275, %274 : vector<8x16xf32>
    %277 = arith.divf %275, %276 : vector<8x16xf32>
    %278 = arith.mulf %272, %277 : vector<8x16xf32>
    %c0_67 = arith.constant 0 : index
    %c0_68 = arith.constant 0 : index
    %279 = vector.load %arg16[%c0_67, %c0_68] : memref<16x1xf32, #tpu.memory_space<vmem>>, vector<16x1xf32>
    %cst_69 = arith.constant dense<0.000000e+00> : vector<8x1xf32>
    %280 = tpu.matmul %278, %279, %cst_69 {dimension_numbers = #tpu.dot_dimension_numbers<[1], [0], [0], [1], [0, 0, 1, 1], [], []>} : vector<8x16xf32>, vector<16x1xf32>, vector<8x1xf32> -> vector<8x1xf32>
    %c0_70 = arith.constant 0 : index
    %c0_71 = arith.constant 0 : index
    %281 = vector.load %arg17[%c0_70, %c0_71] : memref<1x1xf32, #tpu.memory_space<vmem>>, vector<1x1xf32>
    %282 = vector.broadcast %281 : vector<1x1xf32> to vector<8x1xf32>
    %283 = arith.addf %280, %282 : vector<8x1xf32>
    %c0_72 = arith.constant 0 : index
    %c0_73 = arith.constant 0 : index
    %284 = vector.load %arg18[%c0_72, %c0_73] : memref<8x1xf32, #tpu.memory_space<vmem>>, vector<8x1xf32>
    tpu.vector_store %arg18[%c0_72, %c0_73], %283 {strides = array<i32>} : memref<8x1xf32, #tpu.memory_space<vmem>>, vector<8x1xf32>,
    return
  }
  func.func @transform_0(%arg0: i32) -> (i32, i32, i32) {
    %c0_i32 = arith.constant 0 : i32
    %c0_i32_0 = arith.constant 0 : i32
    %c0_i32_1 = arith.constant 0 : i32
    return %arg0, %c0_i32, %c0_i32_0 : i32, i32, i32
  }
  func.func @transform_1(%arg0: i32) -> (i32, i32) {
    %c0_i32 = arith.constant 0 : i32
    %c0_i32_0 = arith.constant 0 : i32
    %c0_i32_1 = arith.constant 0 : i32
    return %c0_i32, %c0_i32_0 : i32, i32
  }
  func.func @transform_2(%arg0: i32) -> (i32, i32) {
    %c0_i32 = arith.constant 0 : i32
    %c0_i32_0 = arith.constant 0 : i32
    %c0_i32_1 = arith.constant 0 : i32
    return %c0_i32, %c0_i32_0 : i32, i32
  }
  func.func @transform_3(%arg0: i32) -> (i32, i32) {
    %c0_i32 = arith.constant 0 : i32
    %c0_i32_0 = arith.constant 0 : i32
    %c0_i32_1 = arith.constant 0 : i32
    return %c0_i32, %c0_i32_0 : i32, i32
  }
  func.func @transform_4(%arg0: i32) -> (i32, i32) {
    %c0_i32 = arith.constant 0 : i32
    %c0_i32_0 = arith.constant 0 : i32
    %c0_i32_1 = arith.constant 0 : i32
    return %c0_i32, %c0_i32_0 : i32, i32
  }
  func.func @transform_5(%arg0: i32) -> (i32, i32) {
    %c0_i32 = arith.constant 0 : i32
    %c0_i32_0 = arith.constant 0 : i32
    %c0_i32_1 = arith.constant 0 : i32
    return %c0_i32, %c0_i32_0 : i32, i32
  }
  func.func @transform_6(%arg0: i32) -> (i32, i32) {
    %c0_i32 = arith.constant 0 : i32
    %c0_i32_0 = arith.constant 0 : i32
    %c0_i32_1 = arith.constant 0 : i32
    return %c0_i32, %c0_i32_0 : i32, i32
  }
  func.func @transform_7(%arg0: i32) -> (i32, i32) {
    %c0_i32 = arith.constant 0 : i32
    %c0_i32_0 = arith.constant 0 : i32
    %c0_i32_1 = arith.constant 0 : i32
    return %c0_i32, %c0_i32_0 : i32, i32
  }
  func.func @transform_8(%arg0: i32) -> (i32, i32) {
    %c0_i32 = arith.constant 0 : i32
    %c0_i32_0 = arith.constant 0 : i32
    %c0_i32_1 = arith.constant 0 : i32
    return %c0_i32, %c0_i32_0 : i32, i32
  }
  func.func @transform_9(%arg0: i32) -> (i32, i32) {
    %c0_i32 = arith.constant 0 : i32
    %c0_i32_0 = arith.constant 0 : i32
    %c0_i32_1 = arith.constant 0 : i32
    return %c0_i32, %c0_i32_0 : i32, i32
  }
  func.func @transform_10(%arg0: i32) -> (i32, i32) {
    %c0_i32 = arith.constant 0 : i32
    %c0_i32_0 = arith.constant 0 : i32
    %c0_i32_1 = arith.constant 0 : i32
    return %c0_i32, %c0_i32_0 : i32, i32
  }
  func.func @transform_11(%arg0: i32) -> (i32, i32) {
    %c0_i32 = arith.constant 0 : i32
    %c0_i32_0 = arith.constant 0 : i32
    %c0_i32_1 = arith.constant 0 : i32
    return %c0_i32, %c0_i32_0 : i32, i32
  }
  func.func @transform_12(%arg0: i32) -> (i32, i32) {
    %c0_i32 = arith.constant 0 : i32
    %c0_i32_0 = arith.constant 0 : i32
    %c0_i32_1 = arith.constant 0 : i32
    return %c0_i32, %c0_i32_0 : i32, i32
  }
  func.func @transform_13(%arg0: i32) -> (i32, i32) {
    %c0_i32 = arith.constant 0 : i32
    %c0_i32_0 = arith.constant 0 : i32
    %c0_i32_1 = arith.constant 0 : i32
    return %c0_i32, %c0_i32_0 : i32, i32
  }
  func.func @transform_14(%arg0: i32) -> (i32, i32) {
    %c0_i32 = arith.constant 0 : i32
    %c0_i32_0 = arith.constant 0 : i32
    %c0_i32_1 = arith.constant 0 : i32
    return %c0_i32, %c0_i32_0 : i32, i32
  }
  func.func @transform_15(%arg0: i32) -> (i32, i32) {
    %c0_i32 = arith.constant 0 : i32
    %c0_i32_0 = arith.constant 0 : i32
    %c0_i32_1 = arith.constant 0 : i32
    return %c0_i32, %c0_i32_0 : i32, i32
  }
  func.func @transform_16(%arg0: i32) -> (i32, i32) {
    %c0_i32 = arith.constant 0 : i32
    %c0_i32_0 = arith.constant 0 : i32
    %c0_i32_1 = arith.constant 0 : i32
    return %c0_i32, %c0_i32_0 : i32, i32
  }
  func.func @transform_17(%arg0: i32) -> (i32, i32) {
    %c0_i32 = arith.constant 0 : i32
    %c0_i32_0 = arith.constant 0 : i32
    return %arg0, %c0_i32 : i32, i32
  }
}

</mosaic_0001>

<bundles_post_ra>
// kernel: tpu_custom_call.1
= control target key start
LH: loop header
LB: loop body
LE: loop exit
PB: predicated region body
PF: predicated region fallthrough
CT: control target
= control target key end

     0   :  { %s8865_s0 = inlined_call_operand.vmem [shape: f32[8,8,16], index: 0, kind: input, shape index: {}]   ;;  %s8866_s1 = inlined_call_operand.vmem [shape: f32[32,32], index: 1, kind: input, shape index: {}]   ;;  %s8867_s2 = inlined_call_operand.hbm [shape: bf16[16,32], index: 2, kind: input, shape index: {}]   ;;  %s8868_s3 = inlined_call_operand.vmem [shape: f32[1,32], index: 3, kind: input, shape index: {}]   ;;  %s8869_s4 = inlined_call_operand.hbm [shape: f32[1,32], index: 4, kind: input, shape index: {}]   ;;  %s8870_s5 = inlined_call_operand.hbm [shape: f32[1,32], index: 5, kind: input, shape index: {}]   ;;  %s8871_s6 = inlined_call_operand.hbm [shape: bf16[32,96], index: 6, kind: input, shape index: {}]   ;;  %s8872_s7 = inlined_call_operand.hbm [shape: bf16[32,32], index: 7, kind: input, shape index: {}]   ;;  %s8873_s8 = inlined_call_operand.hbm [shape: bf16[32,128], index: 8, kind: input, shape index: {}]   ;;  %s8874_s9 = inlined_call_operand.vmem [shape: f32[1,128], index: 9, kind: input, shape index: {}]   ;;  %s8875_s10 = inlined_call_operand.vmem [shape: f32[32,128], index: 10, kind: input, shape index: {}]   ;;  %s8876_s11 = inlined_call_operand.hbm [shape: bf16[32,128], index: 11, kind: input, shape index: {}]   ;;  %s8877_s12 = inlined_call_operand.vmem [shape: f32[1,128], index: 12, kind: input, shape index: {}]   ;;  %s8878_s13 = inlined_call_operand.vmem [shape: f32[32,16], index: 13, kind: input, shape index: {}]   ;;  %s8879_s14 = inlined_call_operand.vmem [shape: f32[32,16], index: 14, kind: input, shape index: {}]   ;;  %s8880_s15 = inlined_call_operand.vmem [shape: f32[16,1], index: 15, kind: input, shape index: {}]   ;;  %s8881_s16 = inlined_call_operand.<no memory space> [shape: f32[1,1], index: 16, kind: input, shape index: {}]   ;;  %s8882_s17 = inlined_call_operand.vmem [shape: f32[8,1], index: 17, kind: output, shape index: {}]  }
   0x1   :  { %8885 = sst [smem:[#allocation18_spill]] %s8865_s0  ;;  %v22_v0 = vstv %s8881_s16 }
   0x2   :  { %8886 = sst [smem:[#allocation19_spill]] %s8866_s1  ;;  %23 = vst [vmem:[#allocation2] sm:$0x1] %v22_v0 }
   0x3   :  { %24 = vsyncpa [#allocation4], 0 }
   0x4   :  { %25 = vsyncpa [#allocation6], 0 }
   0x5   :  { %26 = vsyncpa [#allocation9], 0 }
   0x6   :  { %27 = vsyncpa [#allocation12], 0  ;;  %s6916_s26 = smov [#allocation5]  }
   0x7   :  { %s52_s27 = sshll.u32 %s6916_s26, 4  ;;  %s53_s27 = int_to_ptr.vmem [resolvable:$true] %s52_s27 }
   0x8   :  { %s6776_s28 = scalar_lea.vmem %s53_s27, 16  ;;  %s6780_s29 = scalar_lea.vmem %s53_s27, 32 }
   0x9   :  { %p6777_p0 = scmp.ne.s32.totalorder %s53_s27, %s6776_s28  ;;  %p6781_p1 = scmp.lt.s32.totalorder %s53_s27, %s53_s27 }
   0xa   :  { %p6782_p2 = scmp.lt.s32.totalorder %s6780_s29, %s6776_s28 }
   0xc   :  { %p6783_p3 = por %p6782_p2, %p6781_p1 }
   0xe   :  { %p6784_p4 = pnand %p6783_p3, %p6777_p0 }
  0x10   :  { %6787 = shalt.err (!%p6784_p4)
}
  0x11   :  { %55 = dma.hbm_to_vmem [thread:$0]  %s8869_s4, 16, %s53_s27, [#allocation6]  }
  0x12   :  { %s6917_s16 = smov [#allocation8]   ;;  %s6918_s19 = smov [#allocation11]  }
  0x13   :  { %s71_s18 = sshll.u32 %s6917_s16, 4  ;;  %s95_s1 = sshll.u32 %s6918_s19, 4  ;;  %s72_s18 = int_to_ptr.vmem [resolvable:$true] %s71_s18  ;;  %s96_s1 = int_to_ptr.vmem [resolvable:$true] %s95_s1 }
  0x14   :  { %s6796_s20 = scalar_lea.vmem %s72_s18, 256  ;;  %p6801_p6 = scmp.lt.s32.totalorder %s72_s18, %s72_s18 }
  0x15   :  { %p6797_p5 = scmp.ne.s32.totalorder %s72_s18, %s6796_s20  ;;  %p6802_p7 = scmp.lt.s32.totalorder %s6796_s20, %s6796_s20 }
  0x17   :  { %p6803_p8 = por %p6802_p7, %p6801_p6 }
  0x19   :  { %p6804_p9 = pnand %p6803_p8, %p6797_p5 }
  0x1b   :  { %6807 = shalt.err (!%p6804_p9)
}
  0x1c   :  { %s6919_s21 = smov 64   ;;  %s6920_s22 = smov 4  }
  0x1d   :  { %77 = dma.hbm_to_vmem [thread:$0]  %s8871_s6, 256, %s72_s18, [#allocation9], %s6919_s21, %s6919_s21, %s6920_s22  }
  0x1e   :  { %s6816_s4 = scalar_lea.vmem %s96_s1, 256  ;;  %p6821_p11 = scmp.lt.s32.totalorder %s96_s1, %s96_s1 }
  0x1f   :  { %p6817_p10 = scmp.ne.s32.totalorder %s96_s1, %s6816_s4  ;;  %p6822_p12 = scmp.lt.s32.totalorder %s6816_s4, %s6816_s4 }
  0x21   :  { %p6823_p13 = por %p6822_p12, %p6821_p11 }
  0x23   :  { %p6824_p0 = pnand %p6823_p13, %p6817_p10 }
  0x25   :  { %6827 = shalt.err (!%p6824_p0)
}
  0x26   :  { %101 = dma.hbm_to_vmem [thread:$0]  %s8873_s8, 256, %s96_s1, [#allocation12], %s6919_s21, %s6919_s21, %s6920_s22  }
  0x27   :  { %s6921_s27 = smov [#allocation3]   ;;  %s6922_s29 = smov [#allocation7]  }
  0x28   :  { %s37_s28 = sshll.u32 %s6921_s27, 4  ;;  %s62_s6 = sshll.u32 %s6922_s29, 4  ;;  %s38_s28 = int_to_ptr.vmem [resolvable:$true] %s37_s28  ;;  %s63_s6 = int_to_ptr.vmem [resolvable:$true] %s62_s6 }
  0x29   :  { %s6836_s0 = scalar_lea.vmem %s38_s28, 128  ;;  %p6841_p2 = scmp.lt.s32.totalorder %s38_s28, %s38_s28 }
  0x2a   :  { %p6837_p1 = scmp.ne.s32.totalorder %s38_s28, %s6836_s0  ;;  %p6842_p3 = scmp.lt.s32.totalorder %s6836_s0, %s6836_s0 }
  0x2c   :  { %p6843_p4 = por %p6842_p3, %p6841_p2 }
  0x2e   :  { %p6844_p5 = pnand %p6843_p4, %p6837_p1 }
  0x30   :  { %6847 = shalt.err (!%p6844_p5)
}
  0x31   :  { %43 = dma.hbm_to_vmem [thread:$0]  %s8867_s2, 128, %s38_s28, [#allocation4], %s6919_s21, %s6919_s21, %s6920_s22  }
  0x32   :  { %s6856_s8 = scalar_lea.vmem %s63_s6, 16  ;;  %s6860_s18 = scalar_lea.vmem %s63_s6, 32 }
  0x33   :  { %p6857_p6 = scmp.ne.s32.totalorder %s63_s6, %s6856_s8  ;;  %p6861_p7 = scmp.lt.s32.totalorder %s63_s6, %s63_s6 }
  0x34   :  { %p6862_p8 = scmp.lt.s32.totalorder %s6860_s18, %s6856_s8 }
  0x36   :  { %p6863_p9 = por %p6862_p8, %p6861_p7 }
  0x38   :  { %p6864_p10 = pnand %p6863_p9, %p6857_p6 }
  0x3a   :  { %6867 = shalt.err (!%p6864_p10)
}
  0x3b   :  { %65 = dma.hbm_to_vmem [thread:$0]  %s8870_s5, 16, %s63_s6, [#allocation6]  }
  0x3c   :  { %s6923_s20 = smov [#allocation10]   ;;  %s6924_s24 = smov [#allocation13]  }
  0x3d   :  { %s83_s23 = sshll.u32 %s6923_s20, 4  ;;  %s111_s4 = sshll.u32 %s6924_s24, 4  ;;  %s84_s23 = int_to_ptr.vmem [resolvable:$true] %s83_s23  ;;  %s112_s4 = int_to_ptr.vmem [resolvable:$true] %s111_s4 }
  0x3e   :  { %s6876_s25 = scalar_lea.vmem %s84_s23, 256  ;;  %p6881_p12 = scmp.lt.s32.totalorder %s84_s23, %s84_s23 }
  0x3f   :  { %p6877_p11 = scmp.ne.s32.totalorder %s84_s23, %s6876_s25  ;;  %p6882_p13 = scmp.lt.s32.totalorder %s6876_s25, %s6876_s25 }
  0x41   :  { %p6883_p0 = por %p6882_p13, %p6881_p12 }
  0x43   :  { %p6884_p1 = pnand %p6883_p0, %p6877_p11 }
  0x45   :  { %6887 = shalt.err (!%p6884_p1)
}
  0x46   :  { %89 = dma.hbm_to_vmem [thread:$0]  %s8872_s7, 256, %s84_s23, [#allocation9], %s6919_s21, %s6919_s21, %s6920_s22  }
  0x47   :  { %s6896_s5 = scalar_lea.vmem %s112_s4, 256  ;;  %p6901_p3 = scmp.lt.s32.totalorder %s112_s4, %s112_s4 }
  0x48   :  { %p6897_p2 = scmp.ne.s32.totalorder %s112_s4, %s6896_s5  ;;  %p6902_p4 = scmp.lt.s32.totalorder %s6896_s5, %s6896_s5 }
  0x4a   :  { %p6903_p5 = por %p6902_p4, %p6901_p3 }
  0x4c   :  { %p6904_p6 = pnand %p6903_p5, %p6897_p2 }
  0x4e   :  { %6907 = shalt.err (!%p6904_p6)
}
  0x4f   :  { %117 = dma.hbm_to_vmem [thread:$0]  %s8876_s11, 256, %s112_s4, [#allocation12], %s6919_s21, %s6919_s21, %s6920_s22  }
  0x50   :  { %6908 = dma.done.wait [#allocation4], 128  }
  0x51   :  { %6909 = vsyncadd [#allocation4], 4294967168 }
  0x52   :  { %6910 = dma.done.wait [#allocation6], 32  }
  0x53   :  { %6911 = vsyncadd [#allocation6], 4294967264 }
  0x54   :  { %6912 = dma.done.wait [#allocation9], 512  }
  0x55   :  { %6913 = vsyncadd [#allocation9], 4294966784 }
  0x56   :  { %6914 = dma.done.wait [#allocation12], 512  }
  0x57   :  { %6915 = vsyncadd [#allocation12], 4294966784  ;;  %v6047_v1 = vld [vmem:[#allocation3] sm:$0xff]   ;;  %s8887_s6 = sld [smem:[#allocation18_spill]]  ;;  %vm177_vm0 = vcmask 130048   ;;  %vm255_vm1 = vcmask 261120  }
  0x58   :  { %5727 = vmatprep.subr.bf16.mxu0 %v6047_v1  ;;  %v5428_v14 = vld [vmem:[%s8868_s3] ss:$0 sm:$0xff]  ;;  %s8888_s27 = sld [smem:[#allocation19_spill]]  ;;  %s6925_s29 = smov 96   ;;  %vm1501_vm2 = vcmask 1043456   ;;  %vm1124_vm3 = vcmask 64512  }
  0x59   :  { %5728 = vmatpush3.bf16.msra.mxu0 %v6047_v1  ;;  %vm6927_vm4 = vmmov 0   ;;  %vm2677_vm5 = vcmask 1041409   ;;  %vm2680_vm6 = vcmask 1042434   ;;  %vm2683_vm7 = vcmask 1043459  }
  0x5a   :  { %vm2686_vm8 = vcmask 1044484   ;;  %vm2689_vm9 = vcmask 1045509   ;;  %vm2692_vm10 = vcmask 1046534   ;;  %vm2695_vm11 = vcmask 1047559  }
  0x5b   :  { %vm5418_vm12 = vcmask 7168  }
  0x5d   :  { %v150_v2 = vld [vmem:[%s8887_s6] sm:$0xff]  ;;  %v151_v3 = vld [vmem:[%s8887_s6 + $0x8] sm:$0xff]  ;;  %v152_v4 = vld [vmem:[%s8887_s6 + $0x10] sm:$0xff] }
  0x5e   :  { %v158_v5 = vpack.c.bf16 %v151_v3, %v150_v2  ;;  %v153_v6 = vld [vmem:[%s8887_s6 + $0x18] sm:$0xff]  ;;  %v154_v7 = vld [vmem:[%s8887_s6 + $0x20] sm:$0xff]  ;;  %v155_v8 = vld [vmem:[%s8887_s6 + $0x28] sm:$0xff] }
  0x5f   :  { %v159_v9 = vpack.c.bf16 %v153_v6, %v152_v4  ;;  %v160_v10 = vpack.c.bf16 %v155_v8, %v154_v7  ;;  %v156_v11 = vld [vmem:[%s8887_s6 + $0x30] sm:$0xff]  ;;  %v157_v12 = vld [vmem:[%s8887_s6 + $0x38] sm:$0xff] }
  0x60   :  { %5729 = vmatprep.mubr.msk.bf16.mxu0 %vm177_vm0, %v158_v5  ;;  %v161_v13 = vpack.c.bf16 %v157_v12, %v156_v11 }
  0x61   :  { %5730 = vmatmul.mubr.msk.bf16.vlgmr.msra.gmra.mxu0 %vm177_vm0, %v159_v9 }
  0x62   :  { %5733 = vmatprep.mubr.msk.bf16.mxu0 %vm177_vm0, %v160_v10 }
  0x69   :  { %5734 = vmatmul.mubr.msk.bf16.gmra.mxu0 %vm177_vm0, %v161_v13 }
 0x121   :  { %v5731_v15 = vpop.f32.mrf.mxu0 }
 0x122   :  { %v233_v16 = vadd.f32 %v5731_v15, %v5428_v14  ;;  %v6048_v15 = vld [vmem:[#allocation8 + $0x8] sm:$0xff]  }
 0x123   :  { %v224_v17 = vpop.f32.mrf.mxu0  ;;  %5737 = vmatprep.subr.bf16.mxu1 %v6048_v15 }
 0x124   :  { %v225_v18 = vadd.f32 %v5428_v14, %v224_v17  ;;  %v262_v19 = vsel %vm255_vm1, %v233_v16, 0.0  ;;  %5738 = vmatpush3.bf16.msra.mxu1 %v6048_v15 }
 0x125   :  { %263 = vadd.xlane.f32.xlu1 %v262_v19  ;;  %v5732_v20 = vpop.f32.mrf.mxu0 }
 0x126   :  { %v236_v21 = vadd.f32 %v5732_v20, %v5428_v14  ;;  %v256_v22 = vsel %vm255_vm1, %v225_v18, 0.0 }
 0x127   :  { %v227_v23 = vpop.f32.mrf.mxu0  ;;  %257 = vadd.xlane.f32.xlu0 %v256_v22 }
 0x128   :  { %v228_v24 = vadd.f32 %v5428_v14, %v227_v23  ;;  %v265_v25 = vsel %vm255_vm1, %v236_v21, 0.0 }
 0x129   :  { %266 = vadd.xlane.f32.xlu1 %v265_v25  ;;  %v5735_v26 = vpop.f32.mrf.mxu0 }
 0x12a   :  { %v259_v27 = vsel %vm255_vm1, %v228_v24, 0.0  ;;  %v249_v29 = vadd.f32 %v5735_v26, %v5428_v14 }
 0x12b   :  { %v240_v28 = vpop.f32.mrf.mxu0  ;;  %260 = vadd.xlane.f32.xlu0 %v259_v27 }
 0x12c   :  { %v241_v30 = vadd.f32 %v5428_v14, %v240_v28  ;;  %v274_v36 = vsel %vm255_vm1, %v249_v29, 0.0 }
 0x12d   :  { %v5736_v31 = vpop.f32.mrf.mxu0 }
 0x12e   :  { %v268_v32 = vsel %vm255_vm1, %v241_v30, 0.0  ;;  %v252_v34 = vadd.f32 %v5736_v31, %v5428_v14 }
 0x12f   :  { %v243_v33 = vpop.f32.mrf.mxu0  ;;  %269 = vadd.xlane.f32.xlu0 %v268_v32 }
 0x130   :  { %v244_v35 = vadd.f32 %v5428_v14, %v243_v33  ;;  %v277_v38 = vsel %vm255_vm1, %v252_v34, 0.0 }
 0x132   :  { %v271_v37 = vsel %vm255_vm1, %v244_v35, 0.0 }
 0x133   :  { %272 = vadd.xlane.f32.xlu1 %v271_v37  ;;  %275 = vadd.xlane.f32.xlu0 %v274_v36 }
 0x137   :  { %278 = vadd.xlane.f32.xlu1 %v277_v38 }
 0x1ae   :  { %v264_v39 = vpop.xlane.xlu1 %263 }
 0x1af   :  { %v283_v40 = vmul.f32 0.03125, %v264_v39 }
 0x1b0   :  { %v258_v41 = vpop.xlane.xlu0 %257 }
 0x1b1   :  { %v281_v42 = vmul.f32 0.03125, %v258_v41  ;;  %v7097_v44 = vsub.f32 %v233_v16, %v283_v40  ;;  %v6049_v16 = vld [vmem:[#allocation8] sm:$0xff]   ;;  %v5434_v41 = vld [vmem:[#allocation5] ss:$0 sm:$0xff] }
 0x1b2   :  { %v267_v43 = vpop.xlane.xlu1 %266  ;;  %5739 = vmatprep.subr.bf16.mxu1 %v6049_v16 }
 0x1b3   :  { %v7099_v45 = vsub.f32 %v225_v18, %v281_v42  ;;  %v284_v46 = vmul.f32 0.03125, %v267_v43  ;;  %v299_v53 = vmul.f32 %v7097_v44, %v7097_v44  ;;  %5740 = vmatpush3.bf16.msra.mxu1 %v6049_v16 }
 0x1b4   :  { %v261_v47 = vpop.xlane.xlu0 %260 }
 0x1b5   :  { %v282_v48 = vmul.f32 0.03125, %v261_v47  ;;  %v297_v49 = vmul.f32 %v7099_v45, %v7099_v45  ;;  %v7103_v50 = vsub.f32 %v236_v21, %v284_v46  ;;  %v311_v58 = vsel %vm255_vm1, %v299_v53, 0.0  ;;  %v5435_v46 = vld [vmem:[#allocation7] ss:$0 sm:$0xff] }
 0x1b7   :  { %v7105_v51 = vsub.f32 %v228_v24, %v282_v48  ;;  %v305_v52 = vsel %vm255_vm1, %v297_v49, 0.0  ;;  %v300_v60 = vmul.f32 %v7103_v50, %v7103_v50 }
 0x1b8   :  { %306 = vadd.xlane.f32.xlu0 %v305_v52  ;;  %v270_v54 = vpop.xlane.xlu0 %269 }
 0x1b9   :  { %v285_v55 = vmul.f32 0.03125, %v270_v54  ;;  %v298_v56 = vmul.f32 %v7105_v51, %v7105_v51  ;;  %v314_v4 = vsel %vm255_vm1, %v300_v60, 0.0 }
 0x1bb   :  { %v7112_v57 = vsub.f32 %v241_v30, %v285_v55  ;;  %v308_v59 = vsel %vm255_vm1, %v298_v56, 0.0 }
 0x1bc   :  { %v273_v61 = vpop.xlane.xlu1 %272  ;;  %312 = vadd.xlane.f32.xlu0 %v311_v58  ;;  %309 = vadd.xlane.f32.xlu1 %v308_v59  ;;  %v276_v62 = vpop.xlane.xlu0 %275 }
 0x1bd   :  { %v286_v63 = vmul.f32 0.03125, %v273_v61  ;;  %v287_v0 = vmul.f32 0.03125, %v276_v62  ;;  %v301_v1 = vmul.f32 %v7112_v57, %v7112_v57 }
 0x1bf   :  { %v7120_v2 = vsub.f32 %v244_v35, %v286_v63  ;;  %v7122_v3 = vsub.f32 %v249_v29, %v287_v0  ;;  %v317_v5 = vsel %vm255_vm1, %v301_v1, 0.0 }
 0x1c0   :  { %v279_v6 = vpop.xlane.xlu1 %278  ;;  %315 = vadd.xlane.f32.xlu1 %v314_v4  ;;  %318 = vadd.xlane.f32.xlu0 %v317_v5 }
 0x1c1   :  { %v288_v7 = vmul.f32 0.03125, %v279_v6  ;;  %v302_v8 = vmul.f32 %v7120_v2, %v7120_v2  ;;  %v303_v9 = vmul.f32 %v7122_v3, %v7122_v3 }
 0x1c3   :  { %v7130_v10 = vsub.f32 %v252_v34, %v288_v7  ;;  %v320_v11 = vsel %vm255_vm1, %v302_v8, 0.0  ;;  %v323_v12 = vsel %vm255_vm1, %v303_v9, 0.0 }
 0x1c4   :  { %321 = vadd.xlane.f32.xlu1 %v320_v11  ;;  %324 = vadd.xlane.f32.xlu0 %v323_v12 }
 0x1c5   :  { %v304_v13 = vmul.f32 %v7130_v10, %v7130_v10 }
 0x1c7   :  { %v326_v14 = vsel %vm255_vm1, %v304_v13, 0.0 }
 0x1c8   :  { %327 = vadd.xlane.f32.xlu1 %v326_v14 }
 0x241   :  { %v307_v17 = vpop.xlane.xlu0 %306 }
 0x242   :  { %v329_v18 = vmul.f32 0.03125, %v307_v17 }
 0x244   :  { %v337_v19 = vadd.f32 1e-05, %v329_v18 }
 0x245   :  { %v310_v20 = vpop.xlane.xlu1 %309  ;;  %v313_v21 = vpop.xlane.xlu0 %312 }
 0x246   :  { %6056 = vrsqrt.f32 %v337_v19  ;;  %v330_v22 = vmul.f32 0.03125, %v310_v20  ;;  %v331_v23 = vmul.f32 0.03125, %v313_v21 }
 0x248   :  { %v338_v24 = vadd.f32 1e-05, %v330_v22  ;;  %v339_v25 = vadd.f32 1e-05, %v331_v23 }
 0x249   :  { %v316_v26 = vpop.xlane.xlu1 %315  ;;  %v319_v27 = vpop.xlane.xlu0 %318 }
 0x24a   :  { %6058 = vrsqrt.f32 %v338_v24  ;;  %v332_v28 = vmul.f32 0.03125, %v316_v26  ;;  %v333_v29 = vmul.f32 0.03125, %v319_v27 }
 0x24b   :  { %6060 = vrsqrt.f32 %v339_v25 }
 0x24c   :  { %v340_v30 = vadd.f32 1e-05, %v332_v28  ;;  %v341_v31 = vadd.f32 1e-05, %v333_v29 }
 0x24d   :  { %v322_v32 = vpop.xlane.xlu1 %321  ;;  %v325_v33 = vpop.xlane.xlu0 %324 }
 0x24e   :  { %6062 = vrsqrt.f32 %v340_v30  ;;  %v334_v34 = vmul.f32 0.03125, %v322_v32  ;;  %v335_v35 = vmul.f32 0.03125, %v325_v33 }
 0x24f   :  { %6064 = vrsqrt.f32 %v341_v31 }
 0x250   :  { %v342_v36 = vadd.f32 1e-05, %v334_v34  ;;  %v343_v37 = vadd.f32 1e-05, %v335_v35 }
 0x251   :  { %v328_v38 = vpop.xlane.xlu1 %327 }
 0x252   :  { %6066 = vrsqrt.f32 %v342_v36  ;;  %v336_v39 = vmul.f32 0.03125, %v328_v38 }
 0x253   :  { %v6057_v40 = vpop.eup %6056  ;;  %6068 = vrsqrt.f32 %v343_v37 }
 0x254   :  { %v344_v42 = vadd.f32 1e-05, %v336_v39  ;;  %v353_v43 = vmul.f32 %v6057_v40, %v7099_v45 }
 0x256   :  { %6070 = vrsqrt.f32 %v344_v42  ;;  %v368_v47 = vmul.f32 %v5434_v41, %v353_v43 }
 0x257   :  { %v6059_v48 = vpop.eup %6058 }
 0x258   :  { %v6061_v49 = vpop.eup %6060  ;;  %v354_v52 = vmul.f32 %v6059_v48, %v7105_v51  ;;  %v7139_v53 = vadd.f32 %v5435_v46, %v368_v47 }
 0x259   :  { %v355_v54 = vmul.f32 %v6061_v49, %v7097_v44 }
 0x25a   :  { %v369_v55 = vmul.f32 %v5434_v41, %v354_v52  ;;  %v5436_v56 = vmul.f32 -1.442695, %v7139_v53 }
 0x25b   :  { %v6063_v58 = vpop.eup %6062  ;;  %v370_v59 = vmul.f32 %v5434_v41, %v355_v54 }
 0x25c   :  { %v6065_v60 = vpop.eup %6064  ;;  %v384_v61 = vadd.f32 %v5435_v46, %v369_v55  ;;  %6072 = vpow2.f32 %v5436_v56  ;;  %v356_v45 = vmul.f32 %v6063_v58, %v7103_v50 }
 0x25d   :  { %v7144_v62 = vadd.f32 %v5435_v46, %v370_v59  ;;  %v357_v63 = vmul.f32 %v6065_v60, %v7112_v57 }
 0x25e   :  { %v5437_v0 = vmul.f32 -1.442695, %v384_v61  ;;  %v371_v51 = vmul.f32 %v5434_v41, %v356_v45  ;;  %v7167_v45 = vld [vmem:[%s8888_s27 + $0x8] sm:$0xff] }
 0x25f   :  { %v6067_v1 = vpop.eup %6066  ;;  %v5438_v4 = vmul.f32 -1.442695, %v7144_v62  ;;  %v372_v44 = vmul.f32 %v5434_v41, %v357_v63 }
 0x260   :  { %v6069_v5 = vpop.eup %6068  ;;  %6074 = vpow2.f32 %v5437_v0  ;;  %v386_v6 = vadd.f32 %v5435_v46, %v371_v51  ;;  %v358_v7 = vmul.f32 %v6067_v1, %v7120_v2 }
 0x261   :  { %6076 = vpow2.f32 %v5438_v4  ;;  %v387_v8 = vadd.f32 %v5435_v46, %v372_v44  ;;  %v359_v9 = vmul.f32 %v6069_v5, %v7122_v3 }
 0x262   :  { %v5439_v50 = vmul.f32 -1.442695, %v386_v6  ;;  %v373_v11 = vmul.f32 %v5434_v41, %v358_v7 }
 0x263   :  { %v6071_v12 = vpop.eup %6070  ;;  %v5440_v13 = vmul.f32 -1.442695, %v387_v8  ;;  %v374_v57 = vmul.f32 %v5434_v41, %v359_v9 }
 0x264   :  { %6078 = vpow2.f32 %v5439_v50  ;;  %v388_v14 = vadd.f32 %v5435_v46, %v373_v11  ;;  %v360_v15 = vmul.f32 %v6071_v12, %v7130_v10 }
 0x265   :  { %6080 = vpow2.f32 %v5440_v13  ;;  %v389_v16 = vadd.f32 %v5435_v46, %v374_v57 }
 0x266   :  { %v5441_v17 = vmul.f32 -1.442695, %v388_v14  ;;  %v375_v18 = vmul.f32 %v5434_v41, %v360_v15 }
 0x267   :  { %v5442_v19 = vmul.f32 -1.442695, %v389_v16 }
 0x268   :  { %6082 = vpow2.f32 %v5441_v17  ;;  %v390_v2 = vadd.f32 %v5435_v46, %v375_v18 }
 0x269   :  { %v6073_v20 = vpop.eup %6072  ;;  %6084 = vpow2.f32 %v5442_v19 }
 0x26a   :  { %v415_v21 = vadd.f32 1.0, %v6073_v20  ;;  %v5443_v3 = vmul.f32 -1.442695, %v390_v2  ;;  %v7233_v20 = vld [vmem:[%s8888_s27 + $0x18] sm:$0xff] }
 0x26c   :  { %6086 = vpow2.f32 %v5443_v3 }
 0x26d   :  { %v6075_v22 = vpop.eup %6074  ;;  %6088 = vrcp.f32 %v415_v21 }
 0x26e   :  { %v6077_v23 = vpop.eup %6076  ;;  %v416_v24 = vadd.f32 1.0, %v6075_v22 }
 0x26f   :  { %v417_v25 = vadd.f32 1.0, %v6077_v23 }
 0x270   :  { %6090 = vrcp.f32 %v416_v24 }
 0x271   :  { %v6079_v26 = vpop.eup %6078  ;;  %6092 = vrcp.f32 %v417_v25 }
 0x272   :  { %v6081_v10 = vpop.eup %6080  ;;  %v418_v27 = vadd.f32 1.0, %v6079_v26 }
 0x273   :  { %v419_v28 = vadd.f32 1.0, %v6081_v10 }
 0x274   :  { %6094 = vrcp.f32 %v418_v27 }
 0x275   :  { %v6083_v29 = vpop.eup %6082  ;;  %6096 = vrcp.f32 %v419_v28 }
 0x276   :  { %v6085_v30 = vpop.eup %6084  ;;  %v420_v31 = vadd.f32 1.0, %v6083_v29 }
 0x277   :  { %v421_v32 = vadd.f32 1.0, %v6085_v30 }
 0x278   :  { %6098 = vrcp.f32 %v420_v31 }
 0x279   :  { %v6087_v33 = vpop.eup %6086  ;;  %6100 = vrcp.f32 %v421_v32 }
 0x27a   :  { %v6089_v34 = vpop.eup %6088  ;;  %v422_v35 = vadd.f32 1.0, %v6087_v33 }
 0x27b   :  { %v439_v37 = vmul.f32 %v6089_v34, %v7139_v53 }
 0x27c   :  { %6102 = vrcp.f32 %v422_v35 }
 0x27d   :  { %v6091_v36 = vpop.eup %6090 }
 0x27e   :  { %v440_v38 = vmul.f32 %v6091_v36, %v384_v61  ;;  %v6093_v39 = vpop.eup %6092  ;;  %v7162_v61 = vld [vmem:[%s8888_s27] sm:$0xff] }
 0x27f   :  { %v441_v42 = vmul.f32 %v6093_v39, %v7144_v62 }
 0x280   :  { %v447_v40 = vpack.c.bf16 %v440_v38, %v439_v37 }
 0x281   :  { %v6095_v41 = vpop.eup %6094 }
 0x282   :  { %5741 = vmatprep.mubr.msk.bf16.mxu1 %vm255_vm1, %v447_v40  ;;  %v442_v43 = vmul.f32 %v6095_v41, %v386_v6  ;;  %v6097_v46 = vpop.eup %6096 }
 0x283   :  { %v443_v49 = vmul.f32 %v6097_v46, %v387_v8 }
 0x284   :  { %v448_v47 = vpack.c.bf16 %v442_v43, %v441_v42 }
 0x285   :  { %v6099_v48 = vpop.eup %6098 }
 0x286   :  { %5742 = vmatmul.mubr.msk.bf16.vlgmr.msra.gmra.mxu1 %vm255_vm1, %v448_v47  ;;  %v444_v52 = vmul.f32 %v6099_v48, %v388_v14  ;;  %v6101_v54 = vpop.eup %6100 }
 0x287   :  { %v445_v53 = vmul.f32 %v6101_v54, %v389_v16 }
 0x288   :  { %v449_v55 = vpack.c.bf16 %v444_v52, %v443_v49 }
 0x289   :  { %v6103_v56 = vpop.eup %6102 }
 0x28a   :  { %5745 = vmatprep.mubr.msk.bf16.mxu1 %vm255_vm1, %v449_v55  ;;  %v446_v58 = vmul.f32 %v6103_v56, %v390_v2  ;;  %v7228_v2 = vld [vmem:[%s8888_s27 + $0x10] sm:$0xff] }
 0x28c   :  { %v450_v59 = vpack.c.bf16 %v446_v58, %v445_v53 }
 0x28e   :  { %5746 = vmatmul.mubr.msk.bf16.gmra.mxu1 %vm255_vm1, %v450_v59 }
 0x346   :  { %v7157_v60 = vpop.f32.mrf.mxu1 }
 0x347   :  { %v598_v11 = vpack.c.bf16 %v7157_v60, %v7157_v60  ;;  %v556_v22 = vmul.f32 %v7157_v60, %v7162_v61  ;;  %v557_v23 = vmul.f32 %v7157_v60, %v7167_v45  ;;  %v558_v34 = vmul.f32 %v7157_v60, %v7228_v2 }
 0x348   :  { %v513_v62 = vpop.f32.mrf.mxu1  ;;  %v559_v35 = vmul.f32 %v7157_v60, %v7233_v20 }
 0x349   :  { %v548_v63 = vmul.f32 %v7162_v61, %v513_v62  ;;  %v549_v0 = vmul.f32 %v7167_v45, %v513_v62  ;;  %v596_v1 = vpack.c.bf16 %v513_v62, %v513_v62  ;;  %v550_v21 = vmul.f32 %v7228_v2, %v513_v62 }
 0x34a   :  { %v7171_v51 = vpop.f32.mrf.mxu1  ;;  %v551_v3 = vmul.f32 %v7233_v20, %v513_v62  ;;  %v584_v31 = vpack.c.bf16 %v557_v23, %v556_v22  ;;  %v585_v42 = vpack.c.bf16 %v559_v35, %v558_v34 }
 0x34b   :  { %605 = vrot.lane.b32.xlu0 %v596_v1, %s6925_s29  ;;  %v580_v44 = vpack.c.bf16 %v549_v0, %v548_v63  ;;  %v7196_v57 = vpack.c.bf16 %v7171_v51, %v7171_v51  ;;  %v560_v28 = vmul.f32 %v7171_v51, %v7162_v61  ;;  %v561_v29 = vmul.f32 %v7171_v51, %v7167_v45 }
 0x34c   :  { %v516_v4 = vpop.f32.mrf.mxu1  ;;  %v581_v26 = vpack.c.bf16 %v551_v3, %v550_v21  ;;  %v562_v43 = vmul.f32 %v7171_v51, %v7228_v2  ;;  %v563_v46 = vmul.f32 %v7171_v51, %v7233_v20 }
 0x34d   :  { %v552_v5 = vmul.f32 %v7162_v61, %v516_v4  ;;  %v553_v6 = vmul.f32 %v7167_v45, %v516_v4  ;;  %5751 = vmatprep.mubr.msk.bf16.mxu0 %vm255_vm1, %v580_v44  ;;  %v597_v7 = vpack.c.bf16 %v516_v4, %v516_v4  ;;  %v554_v10 = vmul.f32 %v7228_v2, %v516_v4 }
 0x34e   :  { %v7177_v8 = vpop.f32.mrf.mxu1  ;;  %v555_v27 = vmul.f32 %v7233_v20, %v516_v4  ;;  %v586_v40 = vpack.c.bf16 %v561_v29, %v560_v28  ;;  %v587_v56 = vpack.c.bf16 %v563_v46, %v562_v43 }
 0x34f   :  { %v582_v9 = vpack.c.bf16 %v553_v6, %v552_v5  ;;  %666 = vrot.lane.b32.xlu1 %v597_v7, %s6925_s29  ;;  %v7202_v15 = vpack.c.bf16 %v7177_v8, %v7177_v8  ;;  %v572_v59 = vmul.f32 %v7177_v8, %v7162_v61  ;;  %v573_v60 = vmul.f32 %v7177_v8, %v7167_v45 }
 0x350   :  { %v7180_v50 = vpop.f32.mrf.mxu1  ;;  %v583_v36 = vpack.c.bf16 %v555_v27, %v554_v10 }
 0x351   :  { %5757 = vmatprep.mubr.msk.bf16.mxu1 %vm255_vm1, %v582_v9  ;;  %v7189_v13 = vpack.c.bf16 %v7180_v50, %v7180_v50  ;;  %v564_v37 = vmul.f32 %v7162_v61, %v7180_v50  ;;  %v565_v38 = vmul.f32 %v7167_v45, %v7180_v50  ;;  %v566_v53 = vmul.f32 %v7228_v2, %v7180_v50 }
 0x352   :  { %v7185_v12 = vpop.f32.mrf.mxu1  ;;  %v567_v58 = vmul.f32 %v7233_v20, %v7180_v50  ;;  %v592_v6 = vpack.c.bf16 %v573_v60, %v572_v59  ;;  %v574_v50 = vmul.f32 %v7177_v8, %v7228_v2 }
 0x353   :  { %727 = vrot.lane.b32.xlu1 %v598_v11, %s6925_s29  ;;  %849 = vrot.lane.b32.xlu0 %v7189_v13, %s6925_s29  ;;  %v7217_v17 = vpack.c.bf16 %v7185_v12, %v7185_v12  ;;  %v588_v52 = vpack.c.bf16 %v565_v38, %v564_v37  ;;  %v576_v44 = vmul.f32 %v7185_v12, %v7162_v61 }
 0x354   :  { %v7198_v14 = vpop.f32.mrf.mxu1  ;;  %v589_v51 = vpack.c.bf16 %v567_v58, %v566_v53  ;;  %v577_v5 = vmul.f32 %v7185_v12, %v7167_v45  ;;  %v578_v21 = vmul.f32 %v7185_v12, %v7228_v2  ;;  %v579_v3 = vmul.f32 %v7185_v12, %v7233_v20 }
 0x355   :  { %v7210_v16 = vpack.c.bf16 %v7198_v14, %v7198_v14  ;;  %v568_v47 = vmul.f32 %v7162_v61, %v7198_v14  ;;  %v569_v48 = vmul.f32 %v7167_v45, %v7198_v14  ;;  %v571_v4 = vmul.f32 %v7233_v20, %v7198_v14 }
 0x356   :  { %v594_v45 = vpack.c.bf16 %v577_v5, %v576_v44  ;;  %v595_v23 = vpack.c.bf16 %v579_v3, %v578_v21 }
 0x357   :  { %788 = vrot.lane.b32.xlu1 %v7196_v57, %s6925_s29  ;;  %971 = vrot.lane.b32.xlu0 %v7202_v15, %s6925_s29  ;;  %v590_v62 = vpack.c.bf16 %v569_v48, %v568_v47 }
 0x35b   :  { %910 = vrot.lane.b32.xlu1 %v7210_v16, %s6925_s29  ;;  %1493 = vrot.lane.b32.xlu0 %v596_v1, %s6919_s21  ;;  %v570_v1 = vmul.f32 %v7228_v2, %v7198_v14 }
 0x35d   :  { %v591_v61 = vpack.c.bf16 %v571_v4, %v570_v1 }
 0x35f   :  { %1032 = vrot.lane.b32.xlu1 %v7217_v17, %s6925_s29  ;;  %1614 = vrot.lane.b32.xlu0 %v598_v11, %s6919_s21  ;;  %v575_v11 = vmul.f32 %v7177_v8, %v7233_v20 }
 0x363   :  { %1554 = vrot.lane.b32.xlu1 %v597_v7, %s6919_s21 }
 0x3bd   :  { %v606_v18 = vpop.permute.xlu0 %605 }
 0x3be   :  { %6018 = vmatprep.subr.msk.bf16.mxu0 %vm255_vm1, %v606_v18  ;;  %v614_v19 = vsel %vm255_vm1, %v606_v18, 0 }
 0x3bf   :  { %5750 = vmatpush3.bf16.xpose.msra.mxu0 %v614_v19  ;;  %v593_v19 = vpack.c.bf16 %v575_v11, %v574_v50 }
 0x3c1   :  { %v667_v24 = vpop.permute.xlu1 %666 }
 0x3c2   :  { %6019 = vmatprep.subr.msk.bf16.mxu1 %vm255_vm1, %v667_v24  ;;  %v675_v25 = vsel %vm255_vm1, %v667_v24, 0 }
 0x3c3   :  { %5756 = vmatpush3.bf16.xpose.msra.mxu1 %v675_v25 }
 0x3c5   :  { %v728_v30 = vpop.permute.xlu1 %727  ;;  %v850_v33 = vpop.permute.xlu0 %849 }
 0x3c6   :  { %5752 = vmatmul.mubr.msk.bf16.vlgmr.msra.gmra.mxu0 %vm255_vm1, %v581_v26  ;;  %6020 = vmatprep.subr.msk.bf16.mxu0 %vm255_vm1, %v728_v30  ;;  %v736_v32 = vsel %vm255_vm1, %v728_v30, 0  ;;  %v858_v54 = vsel %vm255_vm1, %v850_v33, 0 }
 0x3c7   :  { %5762 = vmatpush3.bf16.xpose.msra.mxu0 %v736_v32  ;;  %5763 = vmatprep.mubr.msk.bf16.mxu0 %vm255_vm1, %v584_v31 }
 0x3c8   :  { %6022 = vmatprep.subr.msk.bf16.mxu0 %vm255_vm1, %v850_v33 }
 0x3c9   :  { %v789_v39 = vpop.permute.xlu1 %788  ;;  %v972_v55 = vpop.permute.xlu0 %971 }
 0x3ca   :  { %5758 = vmatmul.mubr.msk.bf16.vlgmr.msra.gmra.mxu1 %vm255_vm1, %v583_v36  ;;  %6021 = vmatprep.subr.msk.bf16.mxu1 %vm255_vm1, %v789_v39  ;;  %v797_v41 = vsel %vm255_vm1, %v789_v39, 0  ;;  %v980_v7 = vsel %vm255_vm1, %v972_v55, 0 }
 0x3cb   :  { %5768 = vmatpush3.bf16.xpose.msra.mxu1 %v797_v41  ;;  %5769 = vmatprep.mubr.msk.bf16.mxu1 %vm255_vm1, %v586_v40 }
 0x3cd   :  { %v911_v49 = vpop.permute.xlu1 %910  ;;  %v1494_v9 = vpop.permute.xlu0 %1493 }
 0x3ce   :  { %5764 = vmatmul.mubr.msk.bf16.vlgmr.msra.gmra.mxu0 %vm255_vm1, %v585_v42  ;;  %6023 = vmatprep.subr.msk.bf16.mxu1 %vm255_vm1, %v911_v49  ;;  %v919_v63 = vsel %vm255_vm1, %v911_v49, 0  ;;  %v1503_v8 = vsel %vm1501_vm2, %v1494_v9, 0 }
 0x3cf   :  { %5774 = vmatpush3.bf16.xpose.msra.mxu0 %v858_v54  ;;  %5775 = vmatprep.mubr.msk.bf16.mxu0 %vm255_vm1, %v588_v52 }
 0x3d0   :  { %6024 = vmatprep.subr.msk.bf16.mxu0 %vm255_vm1, %v972_v55 }
 0x3d1   :  { %v1033_v0 = vpop.permute.xlu1 %1032  ;;  %v7317_v22 = vpop.permute.xlu0 %1614 }
 0x3d2   :  { %5770 = vmatmul.mubr.msk.bf16.vlgmr.msra.gmra.mxu1 %vm255_vm1, %v587_v56  ;;  %v1041_v14 = vsel %vm255_vm1, %v1033_v0, 0 }
 0x3d3   :  { %5780 = vmatpush3.bf16.xpose.msra.mxu1 %v919_v63  ;;  %5781 = vmatprep.mubr.msk.bf16.mxu1 %vm255_vm1, %v590_v62 }
 0x3d4   :  { %6025 = vmatprep.subr.msk.bf16.mxu1 %vm255_vm1, %v1033_v0 }
 0x3d5   :  { %v1555_v18 = vpop.permute.xlu1 %1554 }
 0x3d6   :  { %5776 = vmatmul.mubr.msk.bf16.vlgmr.msra.gmra.mxu0 %vm255_vm1, %v589_v51  ;;  %v1563_v2 = vsel %vm1501_vm2, %v1555_v18, 0 }
 0x3d7   :  { %5786 = vmatpush3.bf16.xpose.msra.mxu0 %v980_v7  ;;  %5787 = vmatprep.mubr.msk.bf16.mxu0 %vm255_vm1, %v592_v6 }
 0x3d8   :  { %6026 = vmatprep.subr.msk.bf16.mxu0 %vm1501_vm2, %v1494_v9 }
 0x3da   :  { %5782 = vmatmul.mubr.msk.bf16.vlgmr.msra.gmra.mxu1 %vm255_vm1, %v591_v61 }
 0x3db   :  { %5792 = vmatpush3.bf16.xpose.msra.mxu1 %v1041_v14  ;;  %5793 = vmatprep.mubr.msk.bf16.mxu1 %vm255_vm1, %v594_v45 }
 0x3dc   :  { %6027 = vmatprep.subr.msk.bf16.mxu1 %vm1501_vm2, %v1555_v18 }
 0x3de   :  { %5788 = vmatmul.mubr.msk.bf16.vlgmr.msra.gmra.mxu0 %vm255_vm1, %v593_v19 }
 0x3df   :  { %5798 = vmatpush3.bf16.msra.mxu0 %v1503_v8 }
 0x3e0   :  { %6028 = vmatprep.subr.msk.bf16.mxu0 %vm1501_vm2, %v7317_v22 }
 0x3e2   :  { %5794 = vmatmul.mubr.msk.bf16.vlgmr.msra.gmra.mxu1 %vm255_vm1, %v595_v23 }
 0x3e3   :  { %5804 = vmatpush3.bf16.msra.mxu1 %v1563_v2 }
 0x486   :  { %v5753_v24 = vpop.f32.mrf.mxu0 }
 0x487   :  { %v7323_v12 = vmul.f32 0.35355338, %v5753_v24 }
 0x488   :  { %v650_v20 = vpop.f32.mrf.mxu0 }
 0x489   :  { %v7325_v25 = vmul.f32 0.35355338, %v650_v20  ;;  %v1131_v26 = vsel %vm1124_vm3, %v7323_v12, -inf }
 0x48a   :  { %v5759_v10 = vpop.f32.mrf.mxu1  ;;  %1132 = vmax.xlane.f32.xlu0 %v1131_v26  ;;  %v5754_v27 = vpop.f32.mrf.mxu0 }
 0x48b   :  { %v7329_v30 = vmul.f32 0.35355338, %v5754_v27  ;;  %v1125_v32 = vsel %vm1124_vm3, %v7325_v25, -inf  ;;  %v7339_v39 = vmul.f32 0.35355338, %v5759_v10 }
 0x48c   :  { %v653_v28 = vpop.f32.mrf.mxu0  ;;  %v711_v29 = vpop.f32.mrf.mxu1 }
 0x48d   :  { %v7331_v31 = vmul.f32 0.35355338, %v653_v28  ;;  %v1134_v40 = vsel %vm1124_vm3, %v7329_v30, -inf  ;;  %v7347_v47 = vmul.f32 0.35355338, %v711_v29  ;;  %v1143_v48 = vsel %vm1124_vm3, %v7339_v39, -inf }
 0x48e   :  { %v5760_v33 = vpop.f32.mrf.mxu1  ;;  %1126 = vmax.xlane.f32.xlu0 %v1125_v32  ;;  %v5765_v34 = vpop.f32.mrf.mxu0 }
 0x48f   :  { %v7335_v35 = vmul.f32 0.35355338, %v5760_v33  ;;  %v1128_v36 = vsel %vm1124_vm3, %v7331_v31, -inf  ;;  %v7355_v56 = vmul.f32 0.35355338, %v5765_v34  ;;  %v1137_v53 = vsel %vm1124_vm3, %v7347_v47, -inf }
 0x490   :  { %v714_v37 = vpop.f32.mrf.mxu1  ;;  %1129 = vmax.xlane.f32.xlu1 %v1128_v36  ;;  %v772_v38 = vpop.f32.mrf.mxu0 }
 0x491   :  { %v7343_v41 = vmul.f32 0.35355338, %v714_v37  ;;  %v1146_v42 = vsel %vm1124_vm3, %v7335_v35, -inf  ;;  %v7363_v63 = vmul.f32 0.35355338, %v772_v38  ;;  %v1155_v0 = vsel %vm1124_vm3, %v7355_v56, -inf }
 0x492   :  { %1135 = vmax.xlane.f32.xlu0 %v1134_v40  ;;  %v5771_v43 = vpop.f32.mrf.mxu1  ;;  %v5766_v46 = vpop.f32.mrf.mxu0 }
 0x493   :  { %v7351_v49 = vmul.f32 0.35355338, %v5766_v46  ;;  %v1140_v52 = vsel %vm1124_vm3, %v7343_v41, -inf  ;;  %v7371_v5 = vmul.f32 0.35355338, %v5771_v43  ;;  %v1149_v6 = vsel %vm1124_vm3, %v7363_v63, -inf }
 0x494   :  { %1147 = vmax.xlane.f32.xlu1 %v1146_v42  ;;  %v833_v54 = vpop.f32.mrf.mxu1  ;;  %v775_v55 = vpop.f32.mrf.mxu0 }
 0x495   :  { %v7359_v58 = vmul.f32 0.35355338, %v775_v55  ;;  %v1158_v59 = vsel %vm1124_vm3, %v7351_v49, -inf  ;;  %v7379_v61 = vmul.f32 0.35355338, %v833_v54  ;;  %v1167_v45 = vsel %vm1124_vm3, %v7371_v5, -inf }
 0x496   :  { %1144 = vmax.xlane.f32.xlu0 %v1143_v48  ;;  %v5772_v60 = vpop.f32.mrf.mxu1  ;;  %v5777_v62 = vpop.f32.mrf.mxu0 }
 0x497   :  { %v7367_v51 = vmul.f32 0.35355338, %v5772_v60  ;;  %v1152_v1 = vsel %vm1124_vm3, %v7359_v58, -inf  ;;  %v7387_v3 = vmul.f32 0.35355338, %v5777_v62  ;;  %v1161_v8 = vsel %vm1124_vm3, %v7379_v61, -inf }
 0x498   :  { %1141 = vmax.xlane.f32.xlu1 %v1140_v52  ;;  %v836_v4 = vpop.f32.mrf.mxu1  ;;  %v894_v44 = vpop.f32.mrf.mxu0 }
 0x499   :  { %v7375_v7 = vmul.f32 0.35355338, %v836_v4  ;;  %v1170_v9 = vsel %vm1124_vm3, %v7367_v51, -inf  ;;  %v7395_v26 = vmul.f32 0.35355338, %v894_v44  ;;  %v1179_v10 = vsel %vm1124_vm3, %v7387_v3, -inf }
 0x49a   :  { %1138 = vmax.xlane.f32.xlu0 %v1137_v53  ;;  %v5783_v50 = vpop.f32.mrf.mxu1  ;;  %v5778_v11 = vpop.f32.mrf.mxu0 }
 0x49b   :  { %v7383_v14 = vmul.f32 0.35355338, %v5778_v11  ;;  %v1164_v18 = vsel %vm1124_vm3, %v7375_v7, -inf  ;;  %v7403_v33 = vmul.f32 0.35355338, %v5783_v50  ;;  %v1173_v34 = vsel %vm1124_vm3, %v7395_v26, -inf }
 0x49c   :  { %1159 = vmax.xlane.f32.xlu1 %v1158_v59  ;;  %v955_v19 = vpop.f32.mrf.mxu1  ;;  %v897_v21 = vpop.f32.mrf.mxu0 }
 0x49d   :  { %v7391_v23 = vmul.f32 0.35355338, %v897_v21  ;;  %v1182_v2 = vsel %vm1124_vm3, %v7383_v14, -inf  ;;  %v7411_v42 = vmul.f32 0.35355338, %v955_v19  ;;  %v1191_v43 = vsel %vm1124_vm3, %v7403_v33, -inf }
 0x49e   :  { %1156 = vmax.xlane.f32.xlu0 %v1155_v0  ;;  %v5784_v24 = vpop.f32.mrf.mxu1  ;;  %v5789_v20 = vpop.f32.mrf.mxu0 }
 0x49f   :  { %v7399_v27 = vmul.f32 0.35355338, %v5784_v24  ;;  %v1176_v28 = vsel %vm1124_vm3, %v7391_v23, -inf  ;;  %v7419_v55 = vmul.f32 0.35355338, %v5789_v20  ;;  %v1185_v53 = vsel %vm1124_vm3, %v7411_v42, -inf }
 0x4a0   :  { %1153 = vmax.xlane.f32.xlu1 %v1152_v1  ;;  %v958_v29 = vpop.f32.mrf.mxu1  ;;  %v1016_v32 = vpop.f32.mrf.mxu0 }
 0x4a1   :  { %v7407_v36 = vmul.f32 0.35355338, %v958_v29  ;;  %v1194_v37 = vsel %vm1124_vm3, %v7399_v27, -inf  ;;  %v7427_v0 = vmul.f32 0.35355338, %v1016_v32  ;;  %v1203_v1 = vsel %vm1124_vm3, %v7419_v55, -inf }
 0x4a2   :  { %1150 = vmax.xlane.f32.xlu0 %v1149_v6  ;;  %v5795_v38 = vpop.f32.mrf.mxu1  ;;  %v5790_v40 = vpop.f32.mrf.mxu0 }
 0x4a3   :  { %v7415_v46 = vmul.f32 0.35355338, %v5790_v40  ;;  %v1188_v48 = vsel %vm1124_vm3, %v7407_v36, -inf  ;;  %v1197_v50 = vsel %vm1124_vm3, %v7427_v0, -inf }
 0x4a4   :  { %1171 = vmax.xlane.f32.xlu1 %v1170_v9  ;;  %v1077_v52 = vpop.f32.mrf.mxu1  ;;  %v1019_v54 = vpop.f32.mrf.mxu0  ;;  %v7435_v9 = vmul.f32 0.35355338, %v5795_v38 }
 0x4a5   :  { %v7423_v59 = vmul.f32 0.35355338, %v1019_v54  ;;  %v1206_v60 = vsel %vm1124_vm3, %v7415_v46, -inf }
 0x4a6   :  { %1168 = vmax.xlane.f32.xlu0 %v1167_v45  ;;  %v5796_v62 = vpop.f32.mrf.mxu1  ;;  %v1215_v19 = vsel %vm1124_vm3, %v7435_v9, -inf }
 0x4a7   :  { %v7431_v4 = vmul.f32 0.35355338, %v5796_v62  ;;  %v1200_v44 = vsel %vm1124_vm3, %v7423_v59, -inf }
 0x4a8   :  { %1165 = vmax.xlane.f32.xlu1 %v1164_v18  ;;  %v1080_v6 = vpop.f32.mrf.mxu1  ;;  %v7443_v18 = vmul.f32 0.35355338, %v1077_v52 }
 0x4a9   :  { %v7439_v11 = vmul.f32 0.35355338, %v1080_v6  ;;  %v1218_v45 = vsel %vm1124_vm3, %v7431_v4, -inf }
 0x4aa   :  { %1162 = vmax.xlane.f32.xlu0 %v1161_v8  ;;  %v1209_v8 = vsel %vm1124_vm3, %v7443_v18, -inf }
 0x4ab   :  { %v1212_v21 = vsel %vm1124_vm3, %v7439_v11, -inf }
 0x4ac   :  { %1183 = vmax.xlane.f32.xlu1 %v1182_v2 }
 0x4ae   :  { %1180 = vmax.xlane.f32.xlu0 %v1179_v10 }
 0x4b0   :  { %1177 = vmax.xlane.f32.xlu1 %v1176_v28 }
 0x4b2   :  { %1174 = vmax.xlane.f32.xlu0 %v1173_v34 }
 0x4b4   :  { %1195 = vmax.xlane.f32.xlu1 %v1194_v37 }
 0x4b6   :  { %1192 = vmax.xlane.f32.xlu0 %v1191_v43 }
 0x4b8   :  { %1189 = vmax.xlane.f32.xlu1 %v1188_v48 }
 0x4ba   :  { %1186 = vmax.xlane.f32.xlu0 %v1185_v53 }
 0x4bc   :  { %1207 = vmax.xlane.f32.xlu1 %v1206_v60 }
 0x4be   :  { %1204 = vmax.xlane.f32.xlu0 %v1203_v1 }
 0x4c0   :  { %1201 = vmax.xlane.f32.xlu1 %v1200_v44 }
 0x4c2   :  { %1198 = vmax.xlane.f32.xlu0 %v1197_v50 }
 0x4c4   :  { %1219 = vmax.xlane.f32.xlu1 %v1218_v45 }
 0x4c6   :  { %1216 = vmax.xlane.f32.xlu0 %v1215_v19 }
 0x4c8   :  { %1213 = vmax.xlane.f32.xlu1 %v1212_v21 }
 0x4ca   :  { %1210 = vmax.xlane.f32.xlu0 %v1209_v8 }
 0x513   :  { %v1133_v2 = vpop.xlane.xlu0 %1132 }
 0x514   :  { %v1223_v24 = vsub.f32 %v7323_v12, %v1133_v2 }
 0x516   :  { %v1257_v20 = vmul.f32 1.442695, %v1223_v24 }
 0x517   :  { %v1127_v10 = vpop.xlane.xlu0 %1126 }
 0x518   :  { %6104 = vpow2.f32 %v1257_v20  ;;  %v1221_v28 = vsub.f32 %v7325_v25, %v1127_v10 }
 0x519   :  { %v1130_v29 = vpop.xlane.xlu1 %1129 }
 0x51a   :  { %v1253_v32 = vmul.f32 1.442695, %v1221_v28  ;;  %v1222_v34 = vsub.f32 %v7331_v31, %v1130_v29 }
 0x51b   :  { %v1136_v37 = vpop.xlane.xlu0 %1135 }
 0x51c   :  { %6106 = vpow2.f32 %v1253_v32  ;;  %v1224_v38 = vsub.f32 %v7329_v30, %v1136_v37  ;;  %v1255_v43 = vmul.f32 1.442695, %v1222_v34 }
 0x51d   :  { %v1148_v40 = vpop.xlane.xlu1 %1147 }
 0x51e   :  { %v1259_v48 = vmul.f32 1.442695, %v1224_v38  ;;  %v1228_v52 = vsub.f32 %v7335_v35, %v1148_v40 }
 0x51f   :  { %v1145_v54 = vpop.xlane.xlu0 %1144 }
 0x520   :  { %6108 = vpow2.f32 %v1259_v48  ;;  %v1227_v12 = vsub.f32 %v7339_v39, %v1145_v54  ;;  %v1267_v25 = vmul.f32 1.442695, %v1228_v52 }
 0x521   :  { %v1142_v53 = vpop.xlane.xlu1 %1141  ;;  %6110 = vpow2.f32 %v1255_v43 }
 0x522   :  { %v1265_v60 = vmul.f32 1.442695, %v1227_v12  ;;  %v1226_v62 = vsub.f32 %v7343_v41, %v1142_v53 }
 0x523   :  { %v1139_v31 = vpop.xlane.xlu0 %1138 }
 0x524   :  { %6112 = vpow2.f32 %v1265_v60  ;;  %v1225_v1 = vsub.f32 %v7347_v47, %v1139_v31  ;;  %v1263_v44 = vmul.f32 1.442695, %v1226_v62 }
 0x525   :  { %v7459_v30 = vpop.eup %6104  ;;  %v1160_v6 = vpop.xlane.xlu1 %1159  ;;  %6114 = vpow2.f32 %v1267_v25 }
 0x526   :  { %v1261_v35 = vmul.f32 1.442695, %v1225_v1  ;;  %v1232_v50 = vsub.f32 %v7351_v49, %v1160_v6  ;;  %v1323_v39 = vsel %vm1124_vm3, %v7459_v30, 0.0 }
 0x527   :  { %1324 = vadd.xlane.f32.xlu0 %v1323_v39  ;;  %v1157_v45 = vpop.xlane.xlu0 %1156 }
 0x528   :  { %6116 = vpow2.f32 %v1261_v35  ;;  %v1231_v41 = vsub.f32 %v7355_v56, %v1157_v45  ;;  %v1275_v21 = vmul.f32 1.442695, %v1232_v50 }
 0x529   :  { %v7465_v19 = vpop.eup %6106  ;;  %6118 = vpow2.f32 %v1263_v44  ;;  %v1154_v47 = vpop.xlane.xlu1 %1153 }
 0x52a   :  { %v1273_v8 = vmul.f32 1.442695, %v1231_v41  ;;  %v1230_v2 = vsub.f32 %v7359_v58, %v1154_v47  ;;  %v1317_v24 = vsel %vm1124_vm3, %v7465_v19, 0.0 }
 0x52b   :  { %1318 = vadd.xlane.f32.xlu0 %v1317_v24  ;;  %v1151_v49 = vpop.xlane.xlu0 %1150 }
 0x52c   :  { %6120 = vpow2.f32 %v1273_v8  ;;  %v1229_v20 = vsub.f32 %v7363_v63, %v1151_v49  ;;  %v1271_v56 = vmul.f32 1.442695, %v1230_v2 }
 0x52d   :  { %v7471_v10 = vpop.eup %6108  ;;  %6122 = vpow2.f32 %v1275_v21  ;;  %v1172_v12 = vpop.xlane.xlu1 %1171 }
 0x52e   :  { %v1269_v28 = vmul.f32 1.442695, %v1229_v20  ;;  %v1326_v29 = vsel %vm1124_vm3, %v7471_v10, 0.0  ;;  %v7475_v32 = vpop.eup %6110 }
 0x52f   :  { %1327 = vadd.xlane.f32.xlu1 %v1326_v29  ;;  %v1169_v58 = vpop.xlane.xlu0 %1168  ;;  %v1320_v63 = vsel %vm1124_vm3, %v7475_v32, 0.0 }
 0x530   :  { %6124 = vpow2.f32 %v1269_v28  ;;  %v1235_v34 = vsub.f32 %v7371_v5, %v1169_v58 }
 0x531   :  { %v7478_v37 = vpop.eup %6112  ;;  %6126 = vpow2.f32 %v1271_v56  ;;  %v1166_v44 = vpop.xlane.xlu1 %1165 }
 0x532   :  { %v1281_v38 = vmul.f32 1.442695, %v1235_v34  ;;  %v1335_v40 = vsel %vm1124_vm3, %v7478_v37, 0.0  ;;  %v7484_v43 = vpop.eup %6114 }
 0x533   :  { %1321 = vadd.xlane.f32.xlu1 %v1320_v63  ;;  %1336 = vadd.xlane.f32.xlu0 %v1335_v40  ;;  %v1163_v48 = vpop.xlane.xlu0 %1162  ;;  %v1338_v25 = vsel %vm1124_vm3, %v7484_v43, 0.0 }
 0x534   :  { %6128 = vpow2.f32 %v1281_v38  ;;  %v1233_v52 = vsub.f32 %v7379_v61, %v1163_v48  ;;  %v1236_v38 = vsub.f32 %v7367_v51, %v1172_v12 }
 0x535   :  { %v7487_v54 = vpop.eup %6116  ;;  %v1184_v41 = vpop.xlane.xlu1 %1183 }
 0x536   :  { %v7489_v5 = vpop.eup %6118  ;;  %v1277_v53 = vmul.f32 1.442695, %v1233_v52  ;;  %v1329_v60 = vsel %vm1124_vm3, %v7487_v54, 0.0  ;;  %v1283_v48 = vmul.f32 1.442695, %v1236_v38 }
 0x537   :  { %1339 = vadd.xlane.f32.xlu1 %v1338_v25  ;;  %1330 = vadd.xlane.f32.xlu0 %v1329_v60  ;;  %v1332_v61 = vsel %vm1124_vm3, %v7489_v5, 0.0  ;;  %v1181_v20 = vpop.xlane.xlu0 %1180  ;;  %v1234_v25 = vsub.f32 %v7375_v7, %v1166_v44 }
 0x538   :  { %6130 = vpow2.f32 %v1277_v53 }
 0x539   :  { %v7495_v62 = vpop.eup %6120  ;;  %v1178_v24 = vpop.xlane.xlu1 %1177  ;;  %6132 = vpow2.f32 %v1283_v48  ;;  %v1279_v12 = vmul.f32 1.442695, %v1234_v25 }
 0x53a   :  { %v1347_v31 = vsel %vm1124_vm3, %v7495_v62, 0.0  ;;  %v7501_v1 = vpop.eup %6122 }
 0x53b   :  { %1333 = vadd.xlane.f32.xlu1 %v1332_v61  ;;  %1348 = vadd.xlane.f32.xlu0 %v1347_v31  ;;  %v1350_v35 = vsel %vm1124_vm3, %v7501_v1, 0.0  ;;  %v1175_v28 = vpop.xlane.xlu0 %1174 }
 0x53d   :  { %v7503_v6 = vpop.eup %6124  ;;  %v1196_v49 = vpop.xlane.xlu1 %1195 }
 0x53e   :  { %v1341_v50 = vsel %vm1124_vm3, %v7503_v6, 0.0  ;;  %v7509_v39 = vpop.eup %6126  ;;  %v1244_v60 = vsub.f32 %v7399_v27, %v1196_v49 }
 0x53f   :  { %1351 = vadd.xlane.f32.xlu1 %v1350_v35  ;;  %1342 = vadd.xlane.f32.xlu0 %v1341_v50  ;;  %v1344_v47 = vsel %vm1124_vm3, %v7509_v39, 0.0  ;;  %v1193_v58 = vpop.xlane.xlu0 %1192  ;;  %v1238_v50 = vsub.f32 %v7391_v23, %v1178_v24 }
 0x540   :  { %v1243_v63 = vsub.f32 %v7403_v33, %v1193_v58  ;;  %v1237_v33 = vsub.f32 %v7395_v26, %v1175_v28  ;;  %v1299_v31 = vmul.f32 1.442695, %v1244_v60 }
 0x541   :  { %v7511_v45 = vpop.eup %6128  ;;  %v1190_v56 = vpop.xlane.xlu1 %1189 }
 0x542   :  { %v1359_v21 = vsel %vm1124_vm3, %v7511_v45, 0.0  ;;  %v1297_v53 = vmul.f32 1.442695, %v1243_v63  ;;  %v1285_v35 = vmul.f32 1.442695, %v1237_v33  ;;  %v1242_v23 = vsub.f32 %v7407_v36, %v1190_v56 }
 0x543   :  { %1345 = vadd.xlane.f32.xlu1 %v1344_v47  ;;  %1360 = vadd.xlane.f32.xlu0 %v1359_v21  ;;  %v1187_v40 = vpop.xlane.xlu0 %1186 }
 0x544   :  { %6134 = vpow2.f32 %v1297_v53  ;;  %v1295_v63 = vmul.f32 1.442695, %v1242_v23 }
 0x545   :  { %v7517_v8 = vpop.eup %6130  ;;  %v7525_v29 = vpop.xlane.xlu1 %1207 }
 0x546   :  { %v1353_v2 = vsel %vm1124_vm3, %v7517_v8, 0.0  ;;  %v7542_v27 = vpop.eup %6132 }
 0x547   :  { %1354 = vadd.xlane.f32.xlu0 %v1353_v2  ;;  %v1205_v26 = vpop.xlane.xlu0 %1204 }
 0x548   :  { %v1247_v2 = vsub.f32 %v7419_v55, %v1205_v26 }
 0x549   :  { %v7529_v34 = vpop.xlane.xlu1 %1201 }
 0x54b   :  { %v1199_v38 = vpop.xlane.xlu0 %1198 }
 0x54c   :  { %v1245_v36 = vsub.f32 %v7427_v0, %v1199_v38 }
 0x54d   :  { %v7534_v52 = vpop.xlane.xlu1 %1219 }
 0x54e   :  { %v1301_v25 = vmul.f32 1.442695, %v1245_v36 }
 0x54f   :  { %v1217_v60 = vpop.xlane.xlu0 %1216 }
 0x551   :  { %v1214_v51 = vpop.xlane.xlu1 %1213  ;;  %v7545_v47 = vpop.eup %6134 }
 0x554   :  { %1734 = vrot.lane.b32.xlu1 %v7189_v13, %s6919_s21  ;;  %v1239_v13 = vsub.f32 %v7387_v3, %v1181_v20  ;;  %v1250_v3 = vsub.f32 %v7439_v11, %v1214_v51  ;;  %v1287_v11 = vmul.f32 1.442695, %v1238_v50  ;;  %v1305_v20 = vmul.f32 1.442695, %v1247_v2 }
 0x555   :  { %v1251_v51 = vsub.f32 %v7435_v9, %v1217_v60 }
 0x556   :  { %v1311_v7 = vmul.f32 1.442695, %v1250_v3 }
 0x558   :  { %1794 = vrot.lane.b32.xlu1 %v7210_v16, %s6919_s21  ;;  %v1241_v16 = vsub.f32 %v7411_v42, %v1187_v40  ;;  %v1240_v42 = vsub.f32 %v7383_v14, %v1184_v41  ;;  %v1362_v14 = vsel %vm1124_vm3, %v7542_v27, 0.0  ;;  %v1383_v41 = vsel %vm1124_vm3, %v7545_v47, 0.0 }
 0x55a   :  { %v1293_v61 = vmul.f32 1.442695, %v1241_v16  ;;  %v1291_v44 = vmul.f32 1.442695, %v1240_v42  ;;  %v1248_v16 = vsub.f32 %v7415_v46, %v7525_v29  ;;  %v1246_v46 = vsub.f32 %v7423_v59, %v7529_v34  ;;  %v1211_v42 = vpop.xlane.xlu0 %1210 }
 0x55b   :  { %v1313_v29 = vmul.f32 1.442695, %v1251_v51  ;;  %v1252_v59 = vsub.f32 %v7431_v4, %v7534_v52 }
 0x55c   :  { %v1303_v9 = vmul.f32 1.442695, %v1246_v46 }
 0x55d   :  { %1674 = vrot.lane.b32.xlu0 %v7196_v57, %s6919_s21  ;;  %v1289_v57 = vmul.f32 1.442695, %v1239_v13 }
 0x55f   :  { %6136 = vpow2.f32 %v1289_v57 }
 0x560   :  { %6138 = vpow2.f32 %v1293_v61  ;;  %v1307_v61 = vmul.f32 1.442695, %v1248_v16 }
 0x561   :  { %6140 = vpow2.f32 %v1279_v12 }
 0x562   :  { %6142 = vpow2.f32 %v1299_v31 }
 0x563   :  { %6144 = vpow2.f32 %v1285_v35 }
 0x564   :  { %6146 = vpow2.f32 %v1311_v7  ;;  %v1249_v7 = vsub.f32 %v7443_v18, %v1211_v42 }
 0x565   :  { %6148 = vpow2.f32 %v1291_v44 }
 0x566   :  { %6150 = vpow2.f32 %v1287_v11  ;;  %v1309_v34 = vmul.f32 1.442695, %v1249_v7  ;;  %v1315_v11 = vmul.f32 1.442695, %v1252_v59 }
 0x567   :  { %6152 = vpow2.f32 %v1305_v20 }
 0x568   :  { %6154 = vpow2.f32 %v1295_v63 }
 0x569   :  { %6156 = vpow2.f32 %v1301_v25 }
 0x56a   :  { %6158 = vpow2.f32 %v1307_v61 }
 0x56b   :  { %6160 = vpow2.f32 %v1313_v29 }
 0x56c   :  { %v7547_v21 = vpop.eup %6136  ;;  %6162 = vpow2.f32 %v1303_v9 }
 0x56d   :  { %v7554_v49 = vpop.eup %6138  ;;  %v1371_v28 = vsel %vm1124_vm3, %v7547_v21, 0.0  ;;  %6164 = vpow2.f32 %v1309_v34 }
 0x56e   :  { %v7557_v24 = vpop.eup %6140  ;;  %v1377_v55 = vsel %vm1124_vm3, %v7554_v49, 0.0  ;;  %6166 = vpow2.f32 %v1315_v11 }
 0x56f   :  { %v7563_v58 = vpop.eup %6142  ;;  %v1356_v56 = vsel %vm1124_vm3, %v7557_v24, 0.0 }
 0x570   :  { %v7565_v40 = vpop.eup %6144  ;;  %v1386_v48 = vsel %vm1124_vm3, %v7563_v58, 0.0 }
 0x571   :  { %v7572_v13 = vpop.eup %6146  ;;  %v1365_v0 = vsel %vm1124_vm3, %v7565_v40, 0.0 }
 0x572   :  { %v7574_v53 = vpop.eup %6148  ;;  %v1404_v57 = vsel %vm1124_vm3, %v7572_v13, 0.0 }
 0x573   :  { %v1374_v12 = vsel %vm1124_vm3, %v7574_v53, 0.0  ;;  %v7585_v33 = vpop.eup %6150 }
 0x574   :  { %v1368_v31 = vsel %vm1124_vm3, %v7585_v33, 0.0  ;;  %v7591_v3 = vpop.eup %6152 }
 0x575   :  { %v7593_v35 = vpop.eup %6154  ;;  %v1395_v44 = vsel %vm1124_vm3, %v7591_v3, 0.0 }
 0x576   :  { %v1380_v50 = vsel %vm1124_vm3, %v7593_v35, 0.0  ;;  %v7602_v26 = vpop.eup %6156 }
 0x577   :  { %v1389_v18 = vsel %vm1124_vm3, %v7602_v26, 0.0  ;;  %v7606_v2 = vpop.eup %6158 }
 0x578   :  { %v1398_v4 = vsel %vm1124_vm3, %v7606_v2, 0.0  ;;  %v7612_v52 = vpop.eup %6160 }
 0x57c   :  { %1363 = vadd.xlane.f32.xlu1 %v1362_v14  ;;  %1384 = vadd.xlane.f32.xlu0 %v1383_v41  ;;  %v1407_v14 = vsel %vm1124_vm3, %v7612_v52, 0.0  ;;  %v7616_v41 = vpop.eup %6162 }
 0x57d   :  { %v1392_v23 = vsel %vm1124_vm3, %v7616_v41, 0.0  ;;  %v7620_v20 = vpop.eup %6164 }
 0x580   :  { %1372 = vadd.xlane.f32.xlu1 %v1371_v28  ;;  %1378 = vadd.xlane.f32.xlu0 %v1377_v55  ;;  %v7624_v28 = vpop.eup %6166 }
 0x581   :  { %v1410_v55 = vsel %vm1124_vm3, %v7624_v28, 0.0 }
 0x584   :  { %1357 = vadd.xlane.f32.xlu1 %v1356_v56  ;;  %1387 = vadd.xlane.f32.xlu0 %v1386_v48 }
 0x588   :  { %1366 = vadd.xlane.f32.xlu1 %v1365_v0  ;;  %1405 = vadd.xlane.f32.xlu0 %v1404_v57 }
 0x58c   :  { %1375 = vadd.xlane.f32.xlu1 %v1374_v12 }
 0x590   :  { %1369 = vadd.xlane.f32.xlu1 %v1368_v31 }
 0x594   :  { %1396 = vadd.xlane.f32.xlu1 %v1395_v44 }
 0x598   :  { %1381 = vadd.xlane.f32.xlu1 %v1380_v50 }
 0x59c   :  { %1390 = vadd.xlane.f32.xlu1 %v1389_v18 }
 0x59e   :  { %1854 = vrot.lane.b32.xlu0 %v7202_v15, %s6919_s21  ;;  %v1401_v15 = vsel %vm1124_vm3, %v7620_v20, 0.0 }
 0x5a0   :  { %1399 = vadd.xlane.f32.xlu1 %v1398_v4 }
 0x5a4   :  { %1408 = vadd.xlane.f32.xlu1 %v1407_v14 }
 0x5a8   :  { %1393 = vadd.xlane.f32.xlu1 %v1392_v23 }
 0x5ac   :  { %1402 = vadd.xlane.f32.xlu1 %v1401_v15 }
 0x5b0   :  { %1411 = vadd.xlane.f32.xlu1 %v1410_v55  ;;  %v1325_v38 = vpop.xlane.xlu0 %1324 }
 0x5b4   :  { %v1319_v63 = vpop.xlane.xlu0 %1318 }
 0x5b8   :  { %v1328_v36 = vpop.xlane.xlu1 %1327 }
 0x5b9   :  { %6168 = vrcp.f32 %v1328_v36 }
 0x5ba   :  { %6170 = vrcp.f32 %v1319_v63 }
 0x5bb   :  { %6172 = vrcp.f32 %v1325_v38 }
 0x5bc   :  { %v1322_v56 = vpop.xlane.xlu1 %1321  ;;  %v1337_v48 = vpop.xlane.xlu0 %1336 }
 0x5bd   :  { %6174 = vrcp.f32 %v1322_v56 }
 0x5c0   :  { %v1340_v16 = vpop.xlane.xlu1 %1339  ;;  %v1331_v25 = vpop.xlane.xlu0 %1330 }
 0x5c1   :  { %1914 = vrot.lane.b32.xlu1 %v7217_v17, %s6919_s21  ;;  %6176 = vrcp.f32 %v1340_v16 }
 0x5c2   :  { %6178 = vrcp.f32 %v1331_v25 }
 0x5c3   :  { %6180 = vrcp.f32 %v1337_v48 }
 0x5c4   :  { %v1334_v0 = vpop.xlane.xlu1 %1333  ;;  %v1349_v57 = vpop.xlane.xlu0 %1348 }
 0x5c5   :  { %6182 = vrcp.f32 %v1334_v0 }
 0x5c6   :  { %v6169_v60 = vpop.eup %6168 }
 0x5c7   :  { %v6171_v61 = vpop.eup %6170  ;;  %v1448_v31 = vmul.f32 %v6169_v60, %v7471_v10 }
 0x5c8   :  { %v1352_v51 = vpop.xlane.xlu1 %1351  ;;  %v1343_v12 = vpop.xlane.xlu0 %1342  ;;  %v1445_v42 = vmul.f32 %v6171_v61, %v7465_v19  ;;  %v1623_v19 = vsel %vm1501_vm2, %v7317_v22, 0 }
 0x5c9   :  { %v6173_v46 = vpop.eup %6172  ;;  %6184 = vrcp.f32 %v1352_v51 }
 0x5ca   :  { %v6175_v29 = vpop.eup %6174  ;;  %6186 = vrcp.f32 %v1343_v12  ;;  %v1447_v44 = vmul.f32 %v6173_v46, %v7459_v30 }
 0x5cb   :  { %v1446_v17 = vmul.f32 %v6175_v29, %v7475_v32  ;;  %6188 = vrcp.f32 %v1349_v57 }
 0x5cc   :  { %v1346_v9 = vpop.xlane.xlu1 %1345  ;;  %v1361_v7 = vpop.xlane.xlu0 %1360  ;;  %v1478_v34 = vpack.c.bf16 %v1448_v31, %v1447_v44 }
 0x5cd   :  { %6190 = vrcp.f32 %v1346_v9  ;;  %v1477_v59 = vpack.c.bf16 %v1446_v17, %v1445_v42 }
 0x5ce   :  { %v6177_v50 = vpop.eup %6176 }
 0x5cf   :  { %5799 = vmatprep.mubr.msk.bf16.mxu0 %vm1124_vm3, %v1477_v59  ;;  %v6179_v11 = vpop.eup %6178  ;;  %v1452_v30 = vmul.f32 %v6177_v50, %v7484_v43 }
 0x5d0   :  { %v1735_v18 = vpop.permute.xlu1 %1734  ;;  %5800 = vmatmul.mubr.msk.bf16.vlgmr.msra.gmra.mxu0 %vm1124_vm3, %v1478_v34  ;;  %v1355_v10 = vpop.xlane.xlu0 %1354  ;;  %v1449_v14 = vmul.f32 %v6179_v11, %v7487_v54 }
 0x5d1   :  { %v6181_v32 = vpop.eup %6180  ;;  %5810 = vmatpush3.bf16.msra.mxu0 %v1623_v19  ;;  %v1743_v60 = vsel %vm1501_vm2, %v1735_v18, 0 }
 0x5d2   :  { %v6183_v4 = vpop.eup %6182  ;;  %6030 = vmatprep.subr.msk.bf16.mxu0 %vm1501_vm2, %v1735_v18  ;;  %v1451_v55 = vmul.f32 %v6181_v32, %v7478_v37 }
 0x5d3   :  { %v1450_v23 = vmul.f32 %v6183_v4, %v7489_v5 }
 0x5d4   :  { %v1675_v15 = vpop.permute.xlu0 %1674  ;;  %v1480_v63 = vpack.c.bf16 %v1452_v30, %v1451_v55  ;;  %v1795_v48 = vpop.permute.xlu1 %1794 }
 0x5d5   :  { %6029 = vmatprep.subr.msk.bf16.mxu1 %vm1501_vm2, %v1675_v15  ;;  %v1479_v38 = vpack.c.bf16 %v1450_v23, %v1449_v14  ;;  %v1683_v56 = vsel %vm1501_vm2, %v1675_v15, 0  ;;  %v1803_v4 = vsel %vm1501_vm2, %v1795_v48, 0 }
 0x5d6   :  { %v6185_v22 = vpop.eup %6184 }
 0x5d7   :  { %5805 = vmatprep.mubr.msk.bf16.mxu1 %vm1124_vm3, %v1479_v38  ;;  %v6187_v36 = vpop.eup %6186  ;;  %v1456_v37 = vmul.f32 %v6185_v22, %v7501_v1 }
 0x5d8   :  { %5806 = vmatmul.mubr.msk.bf16.vlgmr.msra.gmra.mxu1 %vm1124_vm3, %v1480_v63  ;;  %v6189_v43 = vpop.eup %6188  ;;  %v1453_v5 = vmul.f32 %v6187_v36, %v7503_v6  ;;  %v6050_v36 = vld [vmem:[#allocation10 + $0x8] sm:$0xff]  }
 0x5d9   :  { %5816 = vmatpush3.bf16.msra.mxu1 %v1683_v56  ;;  %v1455_v25 = vmul.f32 %v6189_v43, %v7495_v62 }
 0x5da   :  { %v6191_v54 = vpop.eup %6190  ;;  %6031 = vmatprep.subr.msk.bf16.mxu1 %vm1501_vm2, %v1795_v48 }
 0x5db   :  { %v1454_v16 = vmul.f32 %v6191_v54, %v7509_v39  ;;  %v1482_v57 = vpack.c.bf16 %v1456_v37, %v1455_v25 }
 0x5dd   :  { %v1481_v0 = vpack.c.bf16 %v1454_v16, %v1453_v5 }
 0x5df   :  { %5811 = vmatprep.mubr.msk.bf16.mxu0 %vm1124_vm3, %v1481_v0 }
 0x5e0   :  { %5812 = vmatmul.mubr.msk.bf16.vlgmr.msra.gmra.mxu0 %vm1124_vm3, %v1482_v57 }
 0x5e1   :  { %5822 = vmatpush3.bf16.msra.mxu0 %v1743_v60 }
 0x605   :  { %v1364_v61 = vpop.xlane.xlu1 %1363  ;;  %v1385_v51 = vpop.xlane.xlu0 %1384 }
 0x606   :  { %6192 = vrcp.f32 %v1364_v61 }
 0x607   :  { %6194 = vrcp.f32 %v1355_v10 }
 0x608   :  { %6196 = vrcp.f32 %v1361_v7 }
 0x609   :  { %v1373_v12 = vpop.xlane.xlu1 %1372  ;;  %v1379_v46 = vpop.xlane.xlu0 %1378 }
 0x60d   :  { %v1358_v1 = vpop.xlane.xlu1 %1357  ;;  %v1388_v6 = vpop.xlane.xlu0 %1387 }
 0x60e   :  { %6198 = vrcp.f32 %v1358_v1 }
 0x611   :  { %v1367_v62 = vpop.xlane.xlu1 %1366  ;;  %v7655_v39 = vpop.xlane.xlu0 %1405 }
 0x613   :  { %v6193_v42 = vpop.eup %6192 }
 0x614   :  { %v6195_v17 = vpop.eup %6194  ;;  %v1460_v7 = vmul.f32 %v6193_v42, %v7542_v27  ;;  %v6051_v42 = vld [vmem:[#allocation10] sm:$0xff]  }
 0x615   :  { %v1376_v29 = vpop.xlane.xlu1 %1375  ;;  %v1855_v31 = vpop.permute.xlu0 %1854  ;;  %v1457_v34 = vmul.f32 %v6195_v17, %v7517_v8 }
 0x616   :  { %6032 = vmatprep.subr.msk.bf16.mxu0 %vm1501_vm2, %v1855_v31  ;;  %6200 = vrcp.f32 %v1376_v29  ;;  %v6197_v44 = vpop.eup %6196  ;;  %v1863_v54 = vsel %vm1501_vm2, %v1855_v31, 0 }
 0x617   :  { %6202 = vrcp.f32 %v1367_v62  ;;  %v1459_v18 = vmul.f32 %v6197_v44, %v7511_v45 }
 0x618   :  { %6204 = vrcp.f32 %v1373_v12 }
 0x619   :  { %v1370_v9 = vpop.xlane.xlu1 %1369  ;;  %v1484_v10 = vpack.c.bf16 %v1460_v7, %v1459_v18  ;;  %v7708_v18 = vld [vmem:[%s8888_s27 + $0x8] sm:$0xff] }
 0x61a   :  { %6206 = vrcp.f32 %v1370_v9 }
 0x61b   :  { %v6199_v59 = vpop.eup %6198  ;;  %6208 = vrcp.f32 %v1388_v6 }
 0x61c   :  { %v1458_v50 = vmul.f32 %v6199_v59, %v7557_v24  ;;  %6210 = vrcp.f32 %v1379_v46 }
 0x61d   :  { %v1397_v11 = vpop.xlane.xlu1 %1396  ;;  %6212 = vrcp.f32 %v1385_v51 }
 0x61e   :  { %v1483_v19 = vpack.c.bf16 %v1458_v50, %v1457_v34  ;;  %v7696_v34 = vld [vmem:[%s8888_s27 + $0x18] sm:$0xff] }
 0x620   :  { %5817 = vmatprep.mubr.msk.bf16.mxu1 %vm1124_vm3, %v1483_v19 }
 0x621   :  { %v1382_v32 = vpop.xlane.xlu1 %1381  ;;  %5818 = vmatmul.mubr.msk.bf16.vlgmr.msra.gmra.mxu1 %vm1124_vm3, %v1484_v10  ;;  %v7714_v10 = vld [vmem:[%s8888_s27 + $0x10] sm:$0xff] }
 0x622   :  { %6214 = vrcp.f32 %v1382_v32  ;;  %5828 = vmatpush3.bf16.msra.mxu1 %v1803_v4 }
 0x623   :  { %v6201_v8 = vpop.eup %6200 }
 0x624   :  { %v6203_v27 = vpop.eup %6202  ;;  %v1464_v45 = vmul.f32 %v6201_v8, %v7574_v53 }
 0x625   :  { %v1391_v24 = vpop.xlane.xlu1 %1390  ;;  %v6205_v30 = vpop.eup %6204  ;;  %v1461_v23 = vmul.f32 %v6203_v27, %v7565_v40 }
 0x626   :  { %v1463_v38 = vmul.f32 %v6205_v30, %v7547_v21 }
 0x627   :  { %v6207_v14 = vpop.eup %6206 }
 0x628   :  { %v1462_v15 = vmul.f32 %v6207_v14, %v7585_v33  ;;  %v1486_v22 = vpack.c.bf16 %v1464_v45, %v1463_v38  ;;  %v6209_v56 = vpop.eup %6208 }
 0x629   :  { %v1400_v55 = vpop.xlane.xlu1 %1399  ;;  %v6211_v43 = vpop.eup %6210  ;;  %v1468_v33 = vmul.f32 %v6209_v56, %v7563_v58 }
 0x62a   :  { %v1485_v63 = vpack.c.bf16 %v1462_v15, %v1461_v23  ;;  %v6213_v53 = vpop.eup %6212  ;;  %6216 = vrcp.f32 %v1400_v55  ;;  %v1465_v21 = vmul.f32 %v6211_v43, %v7554_v49 }
 0x62b   :  { %6218 = vrcp.f32 %v1391_v24  ;;  %v1467_v16 = vmul.f32 %v6213_v53, %v7545_v47 }
 0x62c   :  { %5823 = vmatprep.mubr.msk.bf16.mxu0 %vm1124_vm3, %v1485_v63  ;;  %6220 = vrcp.f32 %v1397_v11 }
 0x62d   :  { %v1409_v48 = vpop.xlane.xlu1 %1408  ;;  %5824 = vmatmul.mubr.msk.bf16.vlgmr.msra.gmra.mxu0 %vm1124_vm3, %v1486_v22  ;;  %v1488_v0 = vpack.c.bf16 %v1468_v33, %v1467_v16 }
 0x62e   :  { %5834 = vmatpush3.bf16.msra.mxu0 %v1863_v54 }
 0x62f   :  { %v6215_v40 = vpop.eup %6214  ;;  %5845 = vmatprep.subr.bf16.mxu0 %v6050_v36 }
 0x630   :  { %v1466_v37 = vmul.f32 %v6215_v40, %v7593_v35 }
 0x631   :  { %v1394_v5 = vpop.xlane.xlu1 %1393 }
 0x632   :  { %6222 = vrcp.f32 %v1394_v5  ;;  %v1487_v25 = vpack.c.bf16 %v1466_v37, %v1465_v21 }
 0x633   :  { %6224 = vrcp.f32 %v7655_v39 }
 0x634   :  { %5829 = vmatprep.mubr.msk.bf16.mxu1 %vm1124_vm3, %v1487_v25 }
 0x635   :  { %v1403_v57 = vpop.xlane.xlu1 %1402  ;;  %5830 = vmatmul.mubr.msk.bf16.vlgmr.msra.gmra.mxu1 %vm1124_vm3, %v1488_v0 }
 0x636   :  { %6226 = vrcp.f32 %v1403_v57 }
 0x637   :  { %6228 = vrcp.f32 %v1409_v48  ;;  %v6217_v49 = vpop.eup %6216 }
 0x638   :  { %v6219_v35 = vpop.eup %6218  ;;  %v1472_v12 = vmul.f32 %v6217_v49, %v7606_v2 }
 0x639   :  { %v1412_v58 = vpop.xlane.xlu1 %1411  ;;  %v6221_v61 = vpop.eup %6220  ;;  %v1469_v46 = vmul.f32 %v6219_v35, %v7602_v26 }
 0x63a   :  { %6230 = vrcp.f32 %v1412_v58  ;;  %v1471_v62 = vmul.f32 %v6221_v61, %v7591_v3 }
 0x63c   :  { %v1490_v31 = vpack.c.bf16 %v1472_v12, %v1471_v62 }
 0x63d   :  { %v1915_v60 = vpop.permute.xlu1 %1914 }
 0x63e   :  { %6033 = vmatprep.subr.msk.bf16.mxu1 %vm1501_vm2, %v1915_v60  ;;  %v1923_v47 = vsel %vm1501_vm2, %v1915_v60, 0 }
 0x63f   :  { %v6223_v51 = vpop.eup %6222  ;;  %5840 = vmatpush3.bf16.msra.mxu1 %v1923_v47 }
 0x640   :  { %v1470_v1 = vmul.f32 %v6223_v51, %v7616_v41  ;;  %v6225_v6 = vpop.eup %6224 }
 0x641   :  { %v1474_v9 = vmul.f32 %v6225_v6, %v7572_v13 }
 0x642   :  { %v1489_v39 = vpack.c.bf16 %v1470_v1, %v1469_v46 }
 0x643   :  { %v6227_v29 = vpop.eup %6226 }
 0x644   :  { %5835 = vmatprep.mubr.msk.bf16.mxu0 %vm1124_vm3, %v1489_v39  ;;  %v1473_v17 = vmul.f32 %v6227_v29, %v7620_v20  ;;  %v6229_v44 = vpop.eup %6228 }
 0x645   :  { %5836 = vmatmul.mubr.msk.bf16.vlgmr.msra.gmra.mxu0 %vm1124_vm3, %v1490_v31  ;;  %v1475_v3 = vmul.f32 %v6229_v44, %v7612_v52  ;;  %v7702_v52 = vld [vmem:[%s8888_s27] sm:$0xff] }
 0x646   :  { %v1491_v2 = vpack.c.bf16 %v1474_v9, %v1473_v17  ;;  %5846 = vmatpush3.bf16.msra.mxu0 %v6050_v36 }
 0x647   :  { %v6231_v26 = vpop.eup %6230  ;;  %5847 = vmatprep.subr.bf16.mxu0 %v6051_v42 }
 0x648   :  { %5841 = vmatprep.mubr.msk.bf16.mxu1 %vm1124_vm3, %v1491_v2  ;;  %v1476_v41 = vmul.f32 %v6231_v26, %v7624_v28 }
 0x64a   :  { %v1492_v59 = vpack.c.bf16 %v1476_v41, %v1475_v3  ;;  %5848 = vmatpush3.bf16.msra.mxu0 %v6051_v42 }
 0x64c   :  { %5842 = vmatmul.mubr.msk.bf16.vlgmr.msra.gmra.mxu1 %vm1124_vm3, %v1492_v59 }
 0x690   :  { %v5801_v20 = vpop.f32.mrf.mxu0 }
 0x691   :  { %v1976_v32 = vmul.f32 %v7714_v10, %v5801_v20 }
 0x692   :  { %v1539_v7 = vpop.f32.mrf.mxu0 }
 0x693   :  { %v1974_v28 = vmul.f32 %v7702_v52, %v1539_v7 }
 0x694   :  { %v5802_v13 = vpop.f32.mrf.mxu0 }
 0x695   :  { %v1977_v50 = vmul.f32 %v7696_v34, %v5802_v13 }
 0x696   :  { %v1542_v11 = vpop.f32.mrf.mxu0 }
 0x697   :  { %v1975_v19 = vmul.f32 %v7708_v18, %v1542_v11  ;;  %v2007_v27 = vpack.c.bf16 %v1977_v50, %v1976_v32 }
 0x698   :  { %v5807_v4 = vpop.f32.mrf.mxu1 }
 0x699   :  { %v2006_v8 = vpack.c.bf16 %v1975_v19, %v1974_v28  ;;  %v1980_v55 = vmul.f32 %v7714_v10, %v5807_v4 }
 0x69a   :  { %v1599_v24 = vpop.f32.mrf.mxu1 }
 0x69b   :  { %5849 = vmatprep.mubr.msk.bf16.mxu0 %vm255_vm1, %v2006_v8  ;;  %v1978_v23 = vmul.f32 %v7702_v52, %v1599_v24 }
 0x69c   :  { %v5808_v30 = vpop.f32.mrf.mxu1  ;;  %5850 = vmatmul.mubr.msk.bf16.vlgmr.msra.gmra.mxu0 %vm255_vm1, %v2007_v27 }
 0x69d   :  { %v1981_v14 = vmul.f32 %v7696_v34, %v5808_v30 }
 0x69e   :  { %v1602_v45 = vpop.f32.mrf.mxu1 }
 0x69f   :  { %v1979_v15 = vmul.f32 %v7708_v18, %v1602_v45  ;;  %v2009_v22 = vpack.c.bf16 %v1981_v14, %v1980_v55 }
 0x6a0   :  { %v5813_v38 = vpop.f32.mrf.mxu0 }
 0x6a1   :  { %v2008_v63 = vpack.c.bf16 %v1979_v15, %v1978_v23  ;;  %v1984_v40 = vmul.f32 %v7714_v10, %v5813_v38 }
 0x6a2   :  { %v1659_v36 = vpop.f32.mrf.mxu0 }
 0x6a3   :  { %5853 = vmatprep.mubr.msk.bf16.mxu0 %vm255_vm1, %v2008_v63  ;;  %v1982_v54 = vmul.f32 %v7702_v52, %v1659_v36  ;;  %v6053_v36 = vld [vmem:[#allocation11] sm:$0xff]  }
 0x6a4   :  { %v5814_v56 = vpop.f32.mrf.mxu0  ;;  %5854 = vmatmul.mubr.msk.bf16.gmra.mxu0 %vm255_vm1, %v2009_v22  ;;  %v6052_v22 = vld [vmem:[#allocation11 + $0x8] sm:$0xff]  }
 0x6a5   :  { %v1985_v43 = vmul.f32 %v7696_v34, %v5814_v56  ;;  %5881 = vmatprep.subr.bf16.mxu1 %v6052_v22 }
 0x6a6   :  { %v1662_v48 = vpop.f32.mrf.mxu0  ;;  %5882 = vmatpush3.bf16.msra.mxu1 %v6052_v22 }
 0x6a7   :  { %v1983_v53 = vmul.f32 %v7708_v18, %v1662_v48  ;;  %v2011_v21 = vpack.c.bf16 %v1985_v43, %v1984_v40  ;;  %5883 = vmatprep.subr.bf16.mxu1 %v6053_v36 }
 0x6a9   :  { %v2010_v33 = vpack.c.bf16 %v1983_v53, %v1982_v54 }
 0x6aa   :  { %5884 = vmatpush3.bf16.msra.mxu1 %v6053_v36 }
 0x6ab   :  { %5857 = vmatprep.mubr.msk.bf16.mxu0 %vm255_vm1, %v2010_v33  ;;  %v6926_v33 = vmov 0.0  }
 0x6ac   :  { %5858 = vmatmul.mubr.msk.bf16.gmra.mxu0 %vm255_vm1, %v2011_v21  ;;  %5893 = vmatprep.subr.mxu1 %v6926_v33  ;;  %v7765_v21 = vld [vmem:[%s8875_s10 + $0x18] sm:$0xff] }
 0x6ad   :  { %5959 = vmatprep.subr.mxu0 %v6926_v33 }
 0x6ae   :  { %5960 = vmatpush3.msra.mxu0 %v7765_v21 }
 0x6af   :  { %5961 = vmatprep.subr.mxu0 %v6926_v33 }
 0x6e1   :  { %v5819_v37 = vpop.f32.mrf.mxu1 }
 0x6e2   :  { %v1988_v49 = vmul.f32 %v7714_v10, %v5819_v37 }
 0x6e3   :  { %v1719_v5 = vpop.f32.mrf.mxu1 }
 0x6e4   :  { %v1986_v57 = vmul.f32 %v7702_v52, %v1719_v5 }
 0x6e5   :  { %v5820_v16 = vpop.f32.mrf.mxu1 }
 0x6e6   :  { %v1989_v25 = vmul.f32 %v7696_v34, %v5820_v16  ;;  %v7772_v16 = vld [vmem:[%s8875_s10 + $0x10] sm:$0xff] }
 0x6e7   :  { %v1722_v0 = vpop.f32.mrf.mxu1  ;;  %5962 = vmatpush3.msra.mxu0 %v7772_v16 }
 0x6e8   :  { %v1987_v58 = vmul.f32 %v7708_v18, %v1722_v0  ;;  %v2013_v60 = vpack.c.bf16 %v1989_v25, %v1988_v49  ;;  %5963 = vmatprep.subr.mxu0 %v6926_v33  ;;  %v7788_v49 = vld [vmem:[%s8875_s10] sm:$0xff] }
 0x6ea   :  { %v2012_v35 = vpack.c.bf16 %v1987_v58, %v1986_v57  ;;  %v7781_v57 = vld [vmem:[%s8875_s10 + $0x8] sm:$0xff] }
 0x6eb   :  { %5964 = vmatpush3.msra.mxu0 %v7781_v57 }
 0x6ec   :  { %5861 = vmatprep.mubr.msk.bf16.mxu0 %vm255_vm1, %v2012_v35  ;;  %5965 = vmatprep.subr.mxu0 %v6926_v33 }
 0x6ed   :  { %v5825_v61 = vpop.f32.mrf.mxu0  ;;  %5862 = vmatmul.mubr.msk.bf16.gmra.mxu0 %vm255_vm1, %v2013_v60 }
 0x6ee   :  { %v1992_v62 = vmul.f32 %v7714_v10, %v5825_v61  ;;  %5966 = vmatpush3.msra.mxu0 %v7788_v49 }
 0x6ef   :  { %v1779_v47 = vpop.f32.mrf.mxu0  ;;  %5981 = vmatprep.subr.bf16.mxu0 %v6926_v33 }
 0x6f0   :  { %v1990_v1 = vmul.f32 %v7702_v52, %v1779_v47 }
 0x6f1   :  { %v5826_v51 = vpop.f32.mrf.mxu0 }
 0x6f2   :  { %v1993_v12 = vmul.f32 %v7696_v34, %v5826_v51 }
 0x6f3   :  { %v1782_v46 = vpop.f32.mrf.mxu0 }
 0x6f4   :  { %v1991_v6 = vmul.f32 %v7708_v18, %v1782_v46  ;;  %v2015_v31 = vpack.c.bf16 %v1993_v12, %v1992_v62 }
 0x6f5   :  { %v5831_v39 = vpop.f32.mrf.mxu1 }
 0x6f6   :  { %v2014_v29 = vpack.c.bf16 %v1991_v6, %v1990_v1  ;;  %v1996_v3 = vmul.f32 %v7714_v10, %v5831_v39 }
 0x6f7   :  { %v1839_v42 = vpop.f32.mrf.mxu1 }
 0x6f8   :  { %5865 = vmatprep.mubr.msk.bf16.mxu0 %vm255_vm1, %v2014_v29  ;;  %v1994_v2 = vmul.f32 %v7702_v52, %v1839_v42 }
 0x6f9   :  { %v5832_v17 = vpop.f32.mrf.mxu1  ;;  %5866 = vmatmul.mubr.msk.bf16.gmra.mxu0 %vm255_vm1, %v2015_v31 }
 0x6fa   :  { %v1997_v9 = vmul.f32 %v7696_v34, %v5832_v17 }
 0x6fb   :  { %v1842_v44 = vpop.f32.mrf.mxu1 }
 0x6fc   :  { %v1995_v26 = vmul.f32 %v7708_v18, %v1842_v44  ;;  %v2017_v59 = vpack.c.bf16 %v1997_v9, %v1996_v3 }
 0x6fe   :  { %v2016_v41 = vpack.c.bf16 %v1995_v26, %v1994_v2 }
 0x700   :  { %5869 = vmatprep.mubr.msk.bf16.mxu0 %vm255_vm1, %v2016_v41 }
 0x701   :  { %5870 = vmatmul.mubr.msk.bf16.gmra.mxu0 %vm255_vm1, %v2017_v59 }
 0x705   :  { %v5837_v20 = vpop.f32.mrf.mxu0 }
 0x706   :  { %v2000_v4 = vmul.f32 %v7714_v10, %v5837_v20 }
 0x707   :  { %v1899_v7 = vpop.f32.mrf.mxu0 }
 0x708   :  { %v1998_v28 = vmul.f32 %v7702_v52, %v1899_v7 }
 0x709   :  { %v5838_v13 = vpop.f32.mrf.mxu0 }
 0x70a   :  { %v2001_v50 = vmul.f32 %v7696_v34, %v5838_v13 }
 0x70b   :  { %v1902_v11 = vpop.f32.mrf.mxu0 }
 0x70c   :  { %v1999_v19 = vmul.f32 %v7708_v18, %v1902_v11  ;;  %v5843_v32 = vpop.f32.mrf.mxu1  ;;  %v2019_v24 = vpack.c.bf16 %v2001_v50, %v2000_v4 }
 0x70d   :  { %v2004_v55 = vmul.f32 %v7714_v10, %v5843_v32 }
 0x70e   :  { %v2018_v8 = vpack.c.bf16 %v1999_v19, %v1998_v28  ;;  %v1959_v27 = vpop.f32.mrf.mxu1 }
 0x70f   :  { %v2002_v45 = vmul.f32 %v7702_v52, %v1959_v27 }
 0x710   :  { %v5844_v30 = vpop.f32.mrf.mxu1  ;;  %5873 = vmatprep.mubr.msk.bf16.mxu0 %vm255_vm1, %v2018_v8 }
 0x711   :  { %5874 = vmatmul.mubr.msk.bf16.gmra.mxu0 %vm255_vm1, %v2019_v24  ;;  %v2005_v23 = vmul.f32 %v7696_v34, %v5844_v30 }
 0x712   :  { %v1962_v14 = vpop.f32.mrf.mxu1 }
 0x713   :  { %v2003_v15 = vmul.f32 %v7708_v18, %v1962_v14  ;;  %v2021_v63 = vpack.c.bf16 %v2005_v23, %v2004_v55 }
 0x715   :  { %v2020_v38 = vpack.c.bf16 %v2003_v15, %v2002_v45 }
 0x717   :  { %5877 = vmatprep.mubr.msk.bf16.mxu0 %vm255_vm1, %v2020_v38 }
 0x719   :  { %5878 = vmatmul.mubr.msk.bf16.gmra.mxu0 %vm255_vm1, %v2021_v63 }
 0x71a   :  { %5967 = vmatprep.mubr.msk.f32.mxu0 %vm6927_vm4, %v6926_v33 }
 0x75c   :  { %v5851_v56 = vpop.f32.mrf.mxu0 }
 0x75e   :  { %v2120_v52 = vpop.f32.mrf.mxu0 }
 0x760   :  { %v5852_v43 = vpop.f32.mrf.mxu0 }
 0x762   :  { %v2123_v34 = vpop.f32.mrf.mxu0 }
 0x763   :  { %v2247_v48 = vadd.f32 %v2123_v34, %v2120_v52 }
 0x764   :  { %v5855_v18 = vpop.f32.mrf.mxu0 }
 0x765   :  { %v2255_v54 = vadd.f32 %v5851_v56, %v2247_v48 }
 0x766   :  { %v2136_v10 = vpop.f32.mrf.mxu0 }
 0x767   :  { %v2263_v40 = vadd.f32 %v5852_v43, %v2255_v54 }
 0x768   :  { %v5856_v53 = vpop.f32.mrf.mxu0 }
 0x769   :  { %v5027_v25 = vpack.c.bf16 %v2263_v40, %v2263_v40 }
 0x76a   :  { %v2139_v37 = vpop.f32.mrf.mxu0 }
 0x76b   :  { %v2248_v5 = vadd.f32 %v2139_v37, %v2136_v10  ;;  %v5054_v35 = vunpack.c.l.b16 %v5027_v25 }
 0x76c   :  { %v5859_v1 = vpop.f32.mrf.mxu0 }
 0x76d   :  { %v2256_v0 = vadd.f32 %v5855_v18, %v2248_v5  ;;  %v5062_v51 = vrot.slane %v5054_v35, 7 }
 0x76e   :  { %v2152_v6 = vpop.f32.mrf.mxu0 }
 0x76f   :  { %v2264_v58 = vadd.f32 %v5856_v53, %v2256_v0 }
 0x770   :  { %v5860_v62 = vpop.f32.mrf.mxu0 }
 0x771   :  { %v2271_v60 = vpack.c.bf16 %v2264_v58, %v2263_v40  ;;  %v5028_v61 = vpack.c.bf16 %v2264_v58, %v2264_v58 }
 0x772   :  { %v2155_v39 = vpop.f32.mrf.mxu0 }
 0x773   :  { %v5055_v47 = vunpack.c.l.b16 %v5028_v61  ;;  %5885 = vmatprep.mubr.msk.bf16.mxu1 %vm255_vm1, %v2271_v60  ;;  %v2249_v29 = vadd.f32 %v2155_v39, %v2152_v6 }
 0x775   :  { %v5063_v12 = vrot.slane %v5055_v47, 6  ;;  %v2257_v31 = vadd.f32 %v5859_v1, %v2249_v29 }
 0x777   :  { %v5064_v46 = vsel %vm2677_vm5, %v5063_v12, %v5062_v51  ;;  %v2265_v17 = vadd.f32 %v5860_v62, %v2257_v31 }
 0x779   :  { %v5029_v2 = vpack.c.bf16 %v2265_v17, %v2265_v17 }
 0x77b   :  { %v5056_v59 = vunpack.c.l.b16 %v5029_v2 }
 0x77d   :  { %v5065_v11 = vrot.slane %v5056_v59, 5 }
 0x77f   :  { %v5066_v8 = vsel %vm2680_vm6, %v5065_v11, %v5064_v46 }
 0x7ad   :  { %v5863_v42 = vpop.f32.mrf.mxu0 }
 0x7af   :  { %v2168_v9 = vpop.f32.mrf.mxu0 }
 0x7b1   :  { %v5864_v44 = vpop.f32.mrf.mxu0 }
 0x7b3   :  { %v2171_v26 = vpop.f32.mrf.mxu0 }
 0x7b4   :  { %v2250_v3 = vadd.f32 %v2171_v26, %v2168_v9 }
 0x7b6   :  { %v2258_v41 = vadd.f32 %v5863_v42, %v2250_v3 }
 0x7b8   :  { %v2266_v20 = vadd.f32 %v5864_v44, %v2258_v41 }
 0x7b9   :  { %v5867_v7 = vpop.f32.mrf.mxu0 }
 0x7ba   :  { %v2272_v13 = vpack.c.bf16 %v2266_v20, %v2265_v17  ;;  %v5030_v50 = vpack.c.bf16 %v2266_v20, %v2266_v20 }
 0x7bb   :  { %v2184_v28 = vpop.f32.mrf.mxu0 }
 0x7bc   :  { %v5057_v19 = vunpack.c.l.b16 %v5030_v50  ;;  %5886 = vmatmul.mubr.msk.bf16.vlgmr.msra.gmra.mxu1 %vm255_vm1, %v2272_v13  ;;  %v5500_v13 = vld [vmem:[%s8874_s9] ss:$0 sm:$0xff]  ;;  %s6928_s9 = smov 32  }
 0x7bd   :  { %v5868_v32 = vpop.f32.mrf.mxu0  ;;  %5894 = vmatpush3.msra.mxu1 %v7765_v21 }
 0x7be   :  { %v5067_v4 = vrot.slane %v5057_v19, 4  ;;  %5895 = vmatprep.subr.mxu1 %v6926_v33 }
 0x7bf   :  { %v2187_v27 = vpop.f32.mrf.mxu0  ;;  %5896 = vmatpush3.msra.mxu1 %v7772_v16 }
 0x7c0   :  { %v5068_v24 = vsel %vm2683_vm7, %v5067_v4, %v5066_v8  ;;  %v2251_v30 = vadd.f32 %v2187_v27, %v2184_v28  ;;  %5897 = vmatprep.subr.mxu1 %v6926_v33 }
 0x7c1   :  { %v5871_v14 = vpop.f32.mrf.mxu0  ;;  %5898 = vmatpush3.msra.mxu1 %v7781_v57 }
 0x7c2   :  { %v2259_v45 = vadd.f32 %v5867_v7, %v2251_v30  ;;  %5899 = vmatprep.subr.mxu1 %v6926_v33 }
 0x7c3   :  { %v2200_v23 = vpop.f32.mrf.mxu0  ;;  %5900 = vmatpush3.msra.mxu1 %v7788_v49 }
 0x7c4   :  { %v2267_v15 = vadd.f32 %v5868_v32, %v2259_v45  ;;  %5904 = vmatprep.subr.mxu1 %v6926_v33 }
 0x7c5   :  { %v5872_v55 = vpop.f32.mrf.mxu0 }
 0x7c6   :  { %v5031_v38 = vpack.c.bf16 %v2267_v15, %v2267_v15 }
 0x7c7   :  { %v2203_v63 = vpop.f32.mrf.mxu0 }
 0x7c8   :  { %v5058_v22 = vunpack.c.l.b16 %v5031_v38  ;;  %v2252_v36 = vadd.f32 %v2203_v63, %v2200_v23 }
 0x7ca   :  { %v5069_v56 = vrot.slane %v5058_v22, 3  ;;  %v2260_v52 = vadd.f32 %v5871_v14, %v2252_v36 }
 0x7cc   :  { %v5070_v43 = vsel %vm2686_vm8, %v5069_v56, %v5068_v24  ;;  %v2268_v34 = vadd.f32 %v5872_v55, %v2260_v52 }
 0x7ce   :  { %v2273_v48 = vpack.c.bf16 %v2268_v34, %v2267_v15  ;;  %v5032_v18 = vpack.c.bf16 %v2268_v34, %v2268_v34 }
 0x7d0   :  { %v5059_v54 = vunpack.c.l.b16 %v5032_v18  ;;  %5889 = vmatprep.mubr.msk.bf16.mxu1 %vm255_vm1, %v2273_v48 }
 0x7d1   :  { %v5875_v10 = vpop.f32.mrf.mxu0 }
 0x7d2   :  { %v5071_v53 = vrot.slane %v5059_v54, 2 }
 0x7d3   :  { %v2216_v40 = vpop.f32.mrf.mxu0 }
 0x7d4   :  { %v5072_v37 = vsel %vm2689_vm9, %v5071_v53, %v5070_v43 }
 0x7d5   :  { %v5876_v5 = vpop.f32.mrf.mxu0 }
 0x7d7   :  { %v2219_v25 = vpop.f32.mrf.mxu0 }
 0x7d8   :  { %v2253_v0 = vadd.f32 %v2219_v25, %v2216_v40 }
 0x7d9   :  { %v5879_v58 = vpop.f32.mrf.mxu0 }
 0x7da   :  { %v2261_v35 = vadd.f32 %v5875_v10, %v2253_v0 }
 0x7db   :  { %v2232_v60 = vpop.f32.mrf.mxu0 }
 0x7dc   :  { %v2269_v61 = vadd.f32 %v5876_v5, %v2261_v35 }
 0x7dd   :  { %v5880_v47 = vpop.f32.mrf.mxu0 }
 0x7de   :  { %v5033_v51 = vpack.c.bf16 %v2269_v61, %v2269_v61 }
 0x7df   :  { %v2235_v12 = vpop.f32.mrf.mxu0 }
 0x7e0   :  { %v5060_v46 = vunpack.c.l.b16 %v5033_v51  ;;  %v2254_v1 = vadd.f32 %v2235_v12, %v2232_v60 }
 0x7e2   :  { %v5073_v6 = vrot.slane %v5060_v46, 1  ;;  %v2262_v62 = vadd.f32 %v5879_v58, %v2254_v1 }
 0x7e4   :  { %v5074_v39 = vsel %vm2692_vm10, %v5073_v6, %v5072_v37  ;;  %v2270_v29 = vadd.f32 %v5880_v47, %v2262_v62 }
 0x7e6   :  { %v2274_v31 = vpack.c.bf16 %v2270_v29, %v2269_v61  ;;  %v5034_v42 = vpack.c.bf16 %v2270_v29, %v2270_v29 }
 0x7e8   :  { %v5061_v17 = vunpack.c.l.b16 %v5034_v42  ;;  %5890 = vmatmul.mubr.msk.bf16.gmra.mxu1 %vm255_vm1, %v2274_v31 }
 0x7e9   :  { %5901 = vmatprep.mubr.msk.f32.mxu1 %vm6927_vm4, %v6926_v33 }
 0x7ea   :  { %v7814_v9 = vsel %vm2695_vm11, %v5061_v17, %v5074_v39 }
 0x7f0   :  { %5902 = vmatmul.mubr.f32.vlgmr.msra.gmra.mxu1 %v6926_v33 }
 0x7f1   :  { %5905 = vmatpush3.msra.mxu1 %v7765_v21  ;;  %5912 = vmatprep.mubr.msk.f32.mxu1 %vm6927_vm4, %v6926_v33 }
 0x7f2   :  { %5906 = vmatprep.subr.mxu1 %v6926_v33 }
 0x7f3   :  { %5907 = vmatpush3.msra.mxu1 %v7772_v16 }
 0x7f4   :  { %5908 = vmatprep.subr.mxu1 %v6926_v33 }
 0x7f5   :  { %5909 = vmatpush3.msra.mxu1 %v7781_v57 }
 0x7f6   :  { %5910 = vmatprep.subr.mxu1 %v6926_v33 }
 0x7f7   :  { %5911 = vmatpush3.msra.mxu1 %v7788_v49 }
 0x7f8   :  { %5915 = vmatprep.subr.mxu1 %v6926_v33 }
 0x87c   :  { %v5887_v44 = vpop.f32.mrf.mxu1 }
 0x87d   :  { %v7836_v24 = vadd.f32 %v5887_v44, %v5500_v13 }
 0x87e   :  { %v2344_v2 = vpop.f32.mrf.mxu1 }
 0x87f   :  { %v7830_v50 = vadd.f32 %v5500_v13, %v2344_v2 }
 0x880   :  { %v5888_v26 = vpop.f32.mrf.mxu1 }
 0x881   :  { %v7839_v23 = vadd.f32 %v5888_v26, %v5500_v13 }
 0x882   :  { %v2347_v3 = vpop.f32.mrf.mxu1 }
 0x883   :  { %v7832_v19 = vadd.f32 %v5500_v13, %v2347_v3 }
 0x8a8   :  { %v5891_v41 = vpop.f32.mrf.mxu1 }
 0x8a9   :  { %v7851_v18 = vadd.f32 %v5891_v41, %v5500_v13 }
 0x8aa   :  { %v2360_v59 = vpop.f32.mrf.mxu1 }
 0x8ab   :  { %v7845_v36 = vadd.f32 %v5500_v13, %v2360_v59 }
 0x8ac   :  { %v5892_v20 = vpop.f32.mrf.mxu1 }
 0x8ad   :  { %v7847_v56 = vadd.f32 %v5892_v20, %v5500_v13 }
 0x8ae   :  { %v2363_v7 = vpop.f32.mrf.mxu1 }
 0x8af   :  { %v7841_v15 = vadd.f32 %v5500_v13, %v2363_v7 }
 0x8b0   :  { %v2448_v11 = vpop.f32.mrf.mxu1 }
 0x8b1   :  { %v2453_v28 = vrot.slane %v2448_v11, 1  ;;  %v2468_v32 = vadd.f32 %v2448_v11, %v7830_v50  ;;  %v2454_v8 = vrot.slane %v2448_v11, 2  ;;  %v2455_v30 = vrot.slane %v2448_v11, 3 }
 0x8b2   :  { %v5903_v4 = vpop.f32.mrf.mxu1  ;;  %v2457_v45 = vrot.slane %v2448_v11, 5  ;;  %v2456_v55 = vrot.slane %v2448_v11, 4  ;;  %v2459_v22 = vrot.slane %v2448_v11, 7  ;;  %v2458_v43 = vrot.slane %v2448_v11, 6 }
 0x8b3   :  { %v2469_v27 = vadd.f32 %v2453_v28, %v7832_v19  ;;  %6232 = vtanh.f32 %v2468_v32  ;;  %v2470_v14 = vadd.f32 %v2454_v8, %v7836_v24  ;;  %v2471_v38 = vadd.f32 %v2455_v30, %v7839_v23 }
 0x8b4   :  { %v2473_v63 = vadd.f32 %v2457_v45, %v7841_v15  ;;  %v2472_v52 = vadd.f32 %v2456_v55, %v7845_v36  ;;  %v2475_v34 = vadd.f32 %v2459_v22, %v7847_v56  ;;  %v2474_v54 = vadd.f32 %v2458_v43, %v7851_v18 }
 0x8b5   :  { %6234 = vtanh.f32 %v2469_v27  ;;  %v5507_v58 = vmul.f32 -1.442695, %v2468_v32  ;;  %v5508_v35 = vmul.f32 -1.442695, %v2469_v27  ;;  %v5509_v60 = vmul.f32 -1.442695, %v2470_v14 }
 0x8b6   :  { %6236 = vtanh.f32 %v2470_v14  ;;  %v5510_v61 = vmul.f32 -1.442695, %v2471_v38  ;;  %v5511_v47 = vmul.f32 -1.442695, %v2472_v52  ;;  %v5512_v51 = vmul.f32 -1.442695, %v2473_v63 }
 0x8b7   :  { %6238 = vtanh.f32 %v2471_v38  ;;  %v5513_v46 = vmul.f32 -1.442695, %v2474_v54  ;;  %v5514_v1 = vmul.f32 -1.442695, %v2475_v34 }
 0x8b8   :  { %6240 = vtanh.f32 %v2473_v63 }
 0x8b9   :  { %6242 = vtanh.f32 %v2472_v52 }
 0x8ba   :  { %6244 = vtanh.f32 %v2475_v34 }
 0x8bb   :  { %6246 = vtanh.f32 %v2474_v54 }
 0x8bc   :  { %6248 = vpow2.f32 %v5507_v58 }
 0x8bd   :  { %6250 = vpow2.f32 %v5508_v35 }
 0x8be   :  { %6252 = vpow2.f32 %v5509_v60 }
 0x8bf   :  { %6254 = vpow2.f32 %v5510_v61 }
 0x8c0   :  { %v6233_v48 = vpop.eup %6232  ;;  %6256 = vpow2.f32 %v5511_v47 }
 0x8c1   :  { %2548 = vrot.lane.b32.xlu1 %v6233_v48, %s6919_s21  ;;  %6258 = vpow2.f32 %v5512_v51 }
 0x8c2   :  { %v6235_v10 = vpop.eup %6234  ;;  %6260 = vpow2.f32 %v5513_v46 }
 0x8c3   :  { %v6237_v53 = vpop.eup %6236  ;;  %6262 = vpow2.f32 %v5514_v1 }
 0x8c4   :  { %v6239_v40 = vpop.eup %6238 }
 0x8c5   :  { %2550 = vrot.lane.b32.xlu1 %v6235_v10, %s6919_s21  ;;  %v6241_v37 = vpop.eup %6240 }
 0x8c6   :  { %2558 = vrot.lane.b32.xlu0 %v6241_v37, %s6919_s21  ;;  %v6243_v5 = vpop.eup %6242 }
 0x8c7   :  { %v6245_v25 = vpop.eup %6244 }
 0x8c8   :  { %v6247_v0 = vpop.eup %6246 }
 0x8c9   :  { %2552 = vrot.lane.b32.xlu1 %v6237_v53, %s6919_s21  ;;  %v6249_v12 = vpop.eup %6248 }
 0x8ca   :  { %2562 = vrot.lane.b32.xlu0 %v6245_v25, %s6919_s21  ;;  %v2500_v6 = vadd.f32 1.0, %v6249_v12  ;;  %v6251_v62 = vpop.eup %6250 }
 0x8cb   :  { %v2501_v39 = vadd.f32 1.0, %v6251_v62  ;;  %v6253_v29 = vpop.eup %6252 }
 0x8cc   :  { %6264 = vrcp.f32 %v2500_v6  ;;  %v2502_v31 = vadd.f32 1.0, %v6253_v29  ;;  %v6255_v42 = vpop.eup %6254 }
 0x8cd   :  { %2554 = vrot.lane.b32.xlu1 %v6239_v40, %s6919_s21  ;;  %6266 = vrcp.f32 %v2501_v39  ;;  %v6257_v17 = vpop.eup %6256  ;;  %v2503_v44 = vadd.f32 1.0, %v6255_v42 }
 0x8ce   :  { %6268 = vrcp.f32 %v2502_v31  ;;  %v6259_v2 = vpop.eup %6258  ;;  %v2504_v3 = vadd.f32 1.0, %v6257_v17 }
 0x8cf   :  { %v6261_v26 = vpop.eup %6260  ;;  %6270 = vrcp.f32 %v2503_v44  ;;  %v2505_v59 = vadd.f32 1.0, %v6259_v2 }
 0x8d0   :  { %v6263_v41 = vpop.eup %6262  ;;  %v2506_v11 = vadd.f32 1.0, %v6261_v26  ;;  %6272 = vrcp.f32 %v2504_v3 }
 0x8d1   :  { %2556 = vrot.lane.b32.xlu1 %v6243_v5, %s6919_s21  ;;  %6274 = vrcp.f32 %v2505_v59  ;;  %v2507_v28 = vadd.f32 1.0, %v6263_v41 }
 0x8d2   :  { %6276 = vrcp.f32 %v2506_v11 }
 0x8d3   :  { %6278 = vrcp.f32 %v2507_v28 }
 0x8d5   :  { %2560 = vrot.lane.b32.xlu1 %v6247_v0, %s6919_s21 }
 0x8d9   :  { %v7862_v20 = vpop.eup %6264 }
 0x8da   :  { %v7866_v32 = vpop.eup %6266  ;;  %v2532_v25 = vmul.f32 0.0, %v7862_v20 }
 0x8db   :  { %v7870_v27 = vpop.eup %6268  ;;  %v2533_v35 = vmul.f32 0.0, %v7866_v32 }
 0x8dc   :  { %v7874_v45 = vpop.eup %6270  ;;  %v2534_v47 = vmul.f32 0.0, %v7870_v27 }
 0x8dd   :  { %v7877_v22 = vpop.eup %6272  ;;  %v2535_v46 = vmul.f32 0.0, %v7874_v45 }
 0x8de   :  { %v7880_v52 = vpop.eup %6274  ;;  %v2536_v39 = vmul.f32 0.0, %v7877_v22 }
 0x8df   :  { %v7884_v10 = vpop.eup %6276  ;;  %v2537_v62 = vmul.f32 0.0, %v7880_v52 }
 0x8e0   :  { %v7888_v53 = vpop.eup %6278  ;;  %v2538_v26 = vmul.f32 0.0, %v7884_v10 }
 0x8e1   :  { %v2539_v2 = vmul.f32 0.0, %v7888_v53 }
 0x933   :  { %v2549_v7 = vpop.permute.xlu1 %2548 }
 0x934   :  { %v2572_v13 = vmul.f32 %v7862_v20, %v2549_v7 }
 0x936   :  { %2588 = vrot.lane.b32.xlu1 %v2572_v13, %s6928_s9 }
 0x937   :  { %v2551_v4 = vpop.permute.xlu1 %2550 }
 0x938   :  { %v2573_v8 = vmul.f32 %v7866_v32, %v2551_v4  ;;  %v2559_v55 = vpop.permute.xlu0 %2558 }
 0x939   :  { %v2577_v34 = vmul.f32 %v7880_v52, %v2559_v55 }
 0x93a   :  { %2590 = vrot.lane.b32.xlu1 %v2573_v8, %s6928_s9 }
 0x93b   :  { %v2553_v30 = vpop.permute.xlu1 %2552 }
 0x93c   :  { %v2574_v14 = vmul.f32 %v7870_v27, %v2553_v30  ;;  %v2563_v54 = vpop.permute.xlu0 %2562 }
 0x93d   :  { %v2579_v37 = vmul.f32 %v7888_v53, %v2563_v54 }
 0x93e   :  { %2592 = vrot.lane.b32.xlu0 %v2574_v14, %s6928_s9 }
 0x93f   :  { %v2555_v38 = vpop.permute.xlu1 %2554 }
 0x940   :  { %v2575_v63 = vmul.f32 %v7874_v45, %v2555_v38 }
 0x942   :  { %2594 = vrot.lane.b32.xlu0 %v2575_v63, %s6928_s9 }
 0x943   :  { %v2557_v43 = vpop.permute.xlu1 %2556 }
 0x944   :  { %v2576_v48 = vmul.f32 %v7877_v22, %v2557_v43 }
 0x946   :  { %2598 = vrot.lane.b32.xlu0 %v2577_v34, %s6928_s9  ;;  %2596 = vrot.lane.b32.xlu1 %v2576_v48, %s6928_s9 }
 0x947   :  { %v2561_v40 = vpop.permute.xlu1 %2560 }
 0x948   :  { %v2578_v5 = vmul.f32 %v7884_v10, %v2561_v40 }
 0x94a   :  { %2602 = vrot.lane.b32.xlu0 %v2579_v37, %s6928_s9  ;;  %2600 = vrot.lane.b32.xlu1 %v2578_v5, %s6928_s9 }
 0x9a8   :  { %v2589_v0 = vpop.permute.xlu1 %2588 }
 0x9a9   :  { %v7895_v58 = vadd.f32 %v2589_v0, %v2532_v25 }
 0x9ab   :  { %6280 = vtanh.f32 %v7895_v58 }
 0x9ac   :  { %v2591_v60 = vpop.permute.xlu1 %2590 }
 0x9ad   :  { %v7899_v61 = vadd.f32 %v2591_v60, %v2533_v35 }
 0x9af   :  { %6282 = vtanh.f32 %v7899_v61 }
 0x9b0   :  { %v2593_v51 = vpop.permute.xlu0 %2592 }
 0x9b1   :  { %v7903_v12 = vadd.f32 %v2593_v51, %v2534_v47 }
 0x9b3   :  { %6284 = vtanh.f32 %v7903_v12 }
 0x9b4   :  { %v2595_v1 = vpop.permute.xlu0 %2594 }
 0x9b5   :  { %v7907_v6 = vadd.f32 %v2595_v1, %v2535_v46 }
 0x9b7   :  { %6286 = vtanh.f32 %v7907_v6 }
 0x9b8   :  { %v6281_v29 = vpop.eup %6280  ;;  %v2599_v31 = vpop.permute.xlu0 %2598 }
 0x9b9   :  { %v2597_v42 = vpop.permute.xlu1 %2596  ;;  %v7912_v17 = vadd.f32 %v2599_v31, %v2537_v62  ;;  %2636 = vrot.lane.b32.xlu1 %v6281_v29, %s6919_s21 }
 0x9ba   :  { %v7914_v44 = vadd.f32 %v2597_v42, %v2536_v39 }
 0x9bb   :  { %6288 = vtanh.f32 %v7912_v17 }
 0x9bc   :  { %v6283_v3 = vpop.eup %6282  ;;  %6290 = vtanh.f32 %v7914_v44  ;;  %v2603_v41 = vpop.permute.xlu0 %2602 }
 0x9bd   :  { %v2601_v59 = vpop.permute.xlu1 %2600  ;;  %v7921_v7 = vadd.f32 %v2603_v41, %v2539_v2  ;;  %2638 = vrot.lane.b32.xlu1 %v6283_v3, %s6919_s21 }
 0x9be   :  { %v7923_v13 = vadd.f32 %v2601_v59, %v2538_v26 }
 0x9bf   :  { %6292 = vtanh.f32 %v7921_v7 }
 0x9c0   :  { %v6285_v11 = vpop.eup %6284  ;;  %6294 = vtanh.f32 %v7923_v13 }
 0x9c1   :  { %2640 = vrot.lane.b32.xlu0 %v6285_v11, %s6919_s21 }
 0x9c4   :  { %v6287_v28 = vpop.eup %6286 }
 0x9c5   :  { %2642 = vrot.lane.b32.xlu0 %v6287_v28, %s6919_s21 }
 0x9c8   :  { %v6289_v4 = vpop.eup %6288 }
 0x9c9   :  { %v6291_v8 = vpop.eup %6290  ;;  %2646 = vrot.lane.b32.xlu0 %v6289_v4, %s6919_s21 }
 0x9ca   :  { %2644 = vrot.lane.b32.xlu1 %v6291_v8, %s6919_s21 }
 0x9cc   :  { %v6293_v30 = vpop.eup %6292 }
 0x9cd   :  { %v6295_v14 = vpop.eup %6294  ;;  %2650 = vrot.lane.b32.xlu0 %v6293_v30, %s6919_s21 }
 0x9ce   :  { %2648 = vrot.lane.b32.xlu1 %v6295_v14, %s6919_s21 }
 0xa2b   :  { %v2637_v55 = vpop.permute.xlu1 %2636 }
 0xa2c   :  { %v2660_v25 = vmul.f32 %v7862_v20, %v2637_v55 }
 0xa2f   :  { %v2639_v38 = vpop.permute.xlu1 %2638 }
 0xa30   :  { %v2661_v43 = vmul.f32 %v7866_v32, %v2639_v38 }
 0xa32   :  { %v2676_v40 = vrot.slane %v2661_v43, 7 }
 0xa33   :  { %v2641_v63 = vpop.permute.xlu0 %2640 }
 0xa34   :  { %v2662_v34 = vmul.f32 %v7870_v27, %v2641_v63  ;;  %v2678_v51 = vsel %vm2677_vm5, %v2676_v40, %v2660_v25 }
 0xa36   :  { %v2679_v37 = vrot.slane %v2662_v34, 6 }
 0xa37   :  { %v2643_v48 = vpop.permute.xlu0 %2642 }
 0xa38   :  { %v2663_v54 = vmul.f32 %v7874_v45, %v2643_v48  ;;  %v2681_v32 = vsel %vm2680_vm6, %v2679_v37, %v2678_v51 }
 0xa3a   :  { %v2682_v0 = vrot.slane %v2663_v54, 5 }
 0xa3b   :  { %v2647_v5 = vpop.permute.xlu0 %2646 }
 0xa3c   :  { %v2665_v35 = vmul.f32 %v7880_v52, %v2647_v5  ;;  %v2645_v60 = vpop.permute.xlu1 %2644  ;;  %v2684_v1 = vsel %vm2683_vm7, %v2682_v0, %v2681_v32 }
 0xa3d   :  { %v2664_v47 = vmul.f32 %v7877_v22, %v2645_v60 }
 0xa3e   :  { %v2688_v45 = vrot.slane %v2665_v35, 3 }
 0xa3f   :  { %v2685_v46 = vrot.slane %v2664_v47, 4  ;;  %v2651_v27 = vpop.permute.xlu0 %2650 }
 0xa40   :  { %v2667_v62 = vmul.f32 %v7888_v53, %v2651_v27  ;;  %v2649_v39 = vpop.permute.xlu1 %2648 }
 0xa41   :  { %v2687_v20 = vsel %vm2686_vm8, %v2685_v46, %v2684_v1  ;;  %v2666_v29 = vmul.f32 %v7884_v10, %v2649_v39 }
 0xa42   :  { %v2694_v52 = vrot.slane %v2667_v62, 1  ;;  %v2690_v22 = vsel %vm2689_vm9, %v2688_v45, %v2687_v20 }
 0xa43   :  { %v2691_v31 = vrot.slane %v2666_v29, 2 }
 0xa45   :  { %v2693_v42 = vsel %vm2692_vm10, %v2691_v31, %v2690_v22 }
 0xa46   :  { %v2696_v2 = vsel %vm2695_vm11, %v2694_v52, %v2693_v42 }
 0xa47   :  { %2697 = vrot.lane.b32.xlu1 %v2696_v2, %s6928_s9 }
 0xab9   :  { %v2698_v26 = vpop.permute.xlu1 %2697 }
 0xaba   :  { %5913 = vmatmul.mubr.msk.f32.vlgmr.msra.gmra.mxu1 %vm255_vm1, %v2698_v26 }
 0xabb   :  { %5916 = vmatpush3.msra.mxu1 %v7765_v21  ;;  %5923 = vmatprep.mubr.msk.f32.mxu1 %vm6927_vm4, %v6926_v33 }
 0xabc   :  { %5917 = vmatprep.subr.mxu1 %v6926_v33 }
 0xabd   :  { %5918 = vmatpush3.msra.mxu1 %v7772_v16 }
 0xabe   :  { %5919 = vmatprep.subr.mxu1 %v6926_v33 }
 0xabf   :  { %5920 = vmatpush3.msra.mxu1 %v7781_v57 }
 0xac0   :  { %5921 = vmatprep.subr.mxu1 %v6926_v33 }
 0xac1   :  { %5922 = vmatpush3.msra.mxu1 %v7788_v49 }
 0xac2   :  { %5926 = vmatprep.subr.mxu1 %v6926_v33 }
 0xb7a   :  { %v2767_v10 = vpop.f32.mrf.mxu1 }
 0xb7b   :  { %v2773_v21 = vrot.slane %v2767_v10, 1  ;;  %v2772_v3 = vrot.slane %v2767_v10, 7  ;;  %v2788_v41 = vadd.f32 %v2767_v10, %v7832_v19  ;;  %v2774_v59 = vrot.slane %v2767_v10, 2 }
 0xb7c   :  { %v5914_v53 = vpop.f32.mrf.mxu1  ;;  %v2775_v16 = vrot.slane %v2767_v10, 3  ;;  %v2776_v57 = vrot.slane %v2767_v10, 4  ;;  %v2777_v49 = vrot.slane %v2767_v10, 5  ;;  %v2778_v30 = vrot.slane %v2767_v10, 6 }
 0xb7d   :  { %v2789_v11 = vadd.f32 %v2773_v21, %v7836_v24  ;;  %v2787_v28 = vadd.f32 %v2772_v3, %v7830_v50  ;;  %6296 = vtanh.f32 %v2788_v41  ;;  %v2790_v4 = vadd.f32 %v2774_v59, %v7839_v23 }
 0xb7e   :  { %v2791_v8 = vadd.f32 %v2775_v16, %v7845_v36  ;;  %v2792_v14 = vadd.f32 %v2776_v57, %v7841_v15  ;;  %v2793_v55 = vadd.f32 %v2777_v49, %v7851_v18  ;;  %v2794_v38 = vadd.f32 %v2778_v30, %v7847_v56 }
 0xb7f   :  { %6298 = vtanh.f32 %v2789_v11  ;;  %v5517_v25 = vmul.f32 -1.442695, %v2788_v41  ;;  %v5518_v0 = vmul.f32 -1.442695, %v2789_v11  ;;  %v5516_v35 = vmul.f32 -1.442695, %v2787_v28 }
 0xb80   :  { %6300 = vtanh.f32 %v2787_v28  ;;  %v5519_v60 = vmul.f32 -1.442695, %v2790_v4  ;;  %v5520_v47 = vmul.f32 -1.442695, %v2791_v8  ;;  %v5521_v51 = vmul.f32 -1.442695, %v2792_v14 }
 0xb81   :  { %6302 = vtanh.f32 %v2790_v4  ;;  %v5522_v32 = vmul.f32 -1.442695, %v2793_v55  ;;  %v5523_v46 = vmul.f32 -1.442695, %v2794_v38 }
 0xb82   :  { %6304 = vtanh.f32 %v2791_v8 }
 0xb83   :  { %6306 = vtanh.f32 %v2792_v14 }
 0xb84   :  { %6308 = vtanh.f32 %v2793_v55 }
 0xb85   :  { %6310 = vtanh.f32 %v2794_v38 }
 0xb86   :  { %6312 = vpow2.f32 %v5517_v25 }
 0xb87   :  { %6314 = vpow2.f32 %v5518_v0 }
 0xb88   :  { %6316 = vpow2.f32 %v5516_v35  ;;  %v2860_v35 = vrot.slane %v7899_v61, 7 }
 0xb89   :  { %6318 = vpow2.f32 %v5519_v60  ;;  %v2861_v60 = vrot.slane %v7903_v12, 7 }
 0xb8a   :  { %v6297_v63 = vpop.eup %6296  ;;  %6320 = vpow2.f32 %v5520_v47 }
 0xb8b   :  { %2893 = vrot.lane.b32.xlu0 %v6297_v63, %s6919_s21  ;;  %6322 = vpow2.f32 %v5521_v51 }
 0xb8c   :  { %v6299_v43 = vpop.eup %6298  ;;  %6324 = vpow2.f32 %v5522_v32 }
 0xb8d   :  { %2895 = vrot.lane.b32.xlu1 %v6299_v43, %s6919_s21  ;;  %v6301_v34 = vpop.eup %6300  ;;  %6326 = vpow2.f32 %v5523_v46  ;;  %v2859_v46 = vrot.slane %v7895_v58, 7 }
 0xb8e   :  { %v6303_v48 = vpop.eup %6302 }
 0xb8f   :  { %2891 = vrot.lane.b32.xlu0 %v6301_v34, %s6919_s21  ;;  %v6305_v54 = vpop.eup %6304 }
 0xb90   :  { %v6307_v40 = vpop.eup %6306 }
 0xb91   :  { %2897 = vrot.lane.b32.xlu1 %v6303_v48, %s6919_s21  ;;  %v6309_v37 = vpop.eup %6308 }
 0xb92   :  { %v6311_v5 = vpop.eup %6310 }
 0xb93   :  { %2899 = vrot.lane.b32.xlu0 %v6305_v54, %s6919_s21  ;;  %v6313_v27 = vpop.eup %6312 }
 0xb94   :  { %v6315_v1 = vpop.eup %6314  ;;  %v2820_v45 = vadd.f32 1.0, %v6313_v27 }
 0xb95   :  { %2901 = vrot.lane.b32.xlu1 %v6307_v40, %s6919_s21  ;;  %v6317_v62 = vpop.eup %6316  ;;  %v2821_v39 = vadd.f32 1.0, %v6315_v1 }
 0xb96   :  { %v6319_v20 = vpop.eup %6318  ;;  %v2819_v29 = vadd.f32 1.0, %v6317_v62  ;;  %6328 = vrcp.f32 %v2820_v45  ;;  %v2862_v45 = vrot.slane %v7907_v6, 7 }
 0xb97   :  { %2903 = vrot.lane.b32.xlu0 %v6309_v37, %s6919_s21  ;;  %v6321_v52 = vpop.eup %6320  ;;  %v2822_v31 = vadd.f32 1.0, %v6319_v20  ;;  %6330 = vrcp.f32 %v2821_v39  ;;  %v2863_v20 = vrot.slane %v7914_v44, 7 }
 0xb98   :  { %v6323_v22 = vpop.eup %6322  ;;  %v2823_v42 = vadd.f32 1.0, %v6321_v52  ;;  %6332 = vrcp.f32 %v2819_v29  ;;  %v2864_v52 = vrot.slane %v7912_v17, 7 }
 0xb99   :  { %2905 = vrot.lane.b32.xlu1 %v6311_v5, %s6919_s21  ;;  %v6325_v2 = vpop.eup %6324  ;;  %v2824_v26 = vadd.f32 1.0, %v6323_v22  ;;  %6334 = vrcp.f32 %v2822_v31 }
 0xb9a   :  { %v6327_v10 = vpop.eup %6326  ;;  %v2825_v53 = vadd.f32 1.0, %v6325_v2  ;;  %6336 = vrcp.f32 %v2823_v42  ;;  %v2865_v2 = vrot.slane %v7923_v13, 7 }
 0xb9b   :  { %v2826_v21 = vadd.f32 1.0, %v6327_v10  ;;  %6338 = vrcp.f32 %v2824_v26  ;;  %v2866_v10 = vrot.slane %v7921_v7, 7 }
 0xb9c   :  { %6340 = vrcp.f32 %v2825_v53 }
 0xb9d   :  { %6342 = vrcp.f32 %v2826_v21 }
 0xba3   :  { %v7977_v3 = vpop.eup %6328 }
 0xba4   :  { %v7979_v59 = vpop.eup %6330  ;;  %v2876_v47 = vmul.f32 %v7977_v3, %v2860_v35 }
 0xba5   :  { %v7984_v57 = vpop.eup %6332  ;;  %v2877_v32 = vmul.f32 %v7979_v59, %v2861_v60 }
 0xba6   :  { %v7987_v49 = vpop.eup %6334  ;;  %v2875_v61 = vmul.f32 %v7984_v57, %v2859_v46 }
 0xba7   :  { %v7992_v55 = vpop.eup %6336  ;;  %v2878_v39 = vmul.f32 %v7987_v49, %v2862_v45 }
 0xba8   :  { %v7995_v63 = vpop.eup %6338  ;;  %v2879_v6 = vmul.f32 %v7992_v55, %v2863_v20 }
 0xba9   :  { %v8000_v54 = vpop.eup %6340  ;;  %v2880_v42 = vmul.f32 %v7995_v63, %v2864_v52 }
 0xbaa   :  { %v8003_v37 = vpop.eup %6342  ;;  %v2881_v17 = vmul.f32 %v8000_v54, %v2865_v2 }
 0xbfd   :  { %v2894_v41 = vpop.permute.xlu0 %2893 }
 0xbfe   :  { %v2916_v11 = vmul.f32 %v7977_v3, %v2894_v41  ;;  %v2882_v41 = vmul.f32 %v8003_v37, %v2866_v10  ;;  %v8093_v10 = vld [vmem:[%s8875_s10 + $0x8] sm:$0xff] }
 0xbff   :  { %v2896_v16 = vpop.permute.xlu1 %2895 }
 0xc00   :  { %v2917_v28 = vmul.f32 %v7979_v59, %v2896_v16  ;;  %2933 = vrot.lane.b32.xlu0 %v2916_v11, %s6928_s9 }
 0xc01   :  { %v2892_v4 = vpop.permute.xlu0 %2891 }
 0xc02   :  { %2935 = vrot.lane.b32.xlu1 %v2917_v28, %s6928_s9  ;;  %v2915_v8 = vmul.f32 %v7984_v57, %v2892_v4 }
 0xc03   :  { %v2898_v30 = vpop.permute.xlu1 %2897 }
 0xc04   :  { %v2918_v14 = vmul.f32 %v7987_v49, %v2898_v30  ;;  %2931 = vrot.lane.b32.xlu0 %v2915_v8, %s6928_s9 }
 0xc05   :  { %v2900_v38 = vpop.permute.xlu0 %2899 }
 0xc06   :  { %2937 = vrot.lane.b32.xlu1 %v2918_v14, %s6928_s9  ;;  %v2919_v43 = vmul.f32 %v7992_v55, %v2900_v38 }
 0xc07   :  { %v2902_v34 = vpop.permute.xlu1 %2901 }
 0xc08   :  { %v2920_v48 = vmul.f32 %v7995_v63, %v2902_v34  ;;  %2939 = vrot.lane.b32.xlu0 %v2919_v43, %s6928_s9 }
 0xc09   :  { %v2904_v40 = vpop.permute.xlu0 %2903 }
 0xc0a   :  { %2941 = vrot.lane.b32.xlu1 %v2920_v48, %s6928_s9  ;;  %v2921_v5 = vmul.f32 %v8000_v54, %v2904_v40 }
 0xc0b   :  { %v2906_v25 = vpop.permute.xlu1 %2905 }
 0xc0c   :  { %v2922_v0 = vmul.f32 %v8003_v37, %v2906_v25  ;;  %2943 = vrot.lane.b32.xlu0 %v2921_v5, %s6928_s9 }
 0xc0e   :  { %2945 = vrot.lane.b32.xlu1 %v2922_v0, %s6928_s9 }
 0xc72   :  { %v2934_v51 = vpop.permute.xlu0 %2933 }
 0xc73   :  { %v8014_v27 = vadd.f32 %v2934_v51, %v2876_v47 }
 0xc74   :  { %v2936_v1 = vpop.permute.xlu1 %2935 }
 0xc75   :  { %v8017_v62 = vadd.f32 %v2936_v1, %v2877_v32  ;;  %6344 = vtanh.f32 %v8014_v27 }
 0xc76   :  { %v2932_v12 = vpop.permute.xlu0 %2931 }
 0xc77   :  { %6346 = vtanh.f32 %v8017_v62  ;;  %v8024_v29 = vadd.f32 %v2932_v12, %v2875_v61 }
 0xc78   :  { %v2938_v58 = vpop.permute.xlu1 %2937 }
 0xc79   :  { %v8027_v31 = vadd.f32 %v2938_v58, %v2878_v39  ;;  %6348 = vtanh.f32 %v8024_v29 }
 0xc7a   :  { %v2940_v22 = vpop.permute.xlu0 %2939 }
 0xc7b   :  { %6350 = vtanh.f32 %v8027_v31  ;;  %v8034_v26 = vadd.f32 %v2940_v22, %v2879_v6 }
 0xc7c   :  { %v2942_v44 = vpop.permute.xlu1 %2941 }
 0xc7d   :  { %v8037_v53 = vadd.f32 %v2942_v44, %v2880_v42  ;;  %6352 = vtanh.f32 %v8034_v26 }
 0xc7e   :  { %v2944_v21 = vpop.permute.xlu0 %2943 }
 0xc7f   :  { %6354 = vtanh.f32 %v8037_v53  ;;  %v8043_v11 = vadd.f32 %v2944_v21, %v2881_v17  ;;  %v8100_v17 = vld [vmem:[%s8875_s10] sm:$0xff] }
 0xc80   :  { %v2946_v16 = vpop.permute.xlu1 %2945 }
 0xc81   :  { %v8045_v13 = vadd.f32 %v2946_v16, %v2882_v41  ;;  %6356 = vtanh.f32 %v8043_v11 }
 0xc82   :  { %v6345_v28 = vpop.eup %6344 }
 0xc83   :  { %6358 = vtanh.f32 %v8045_v13  ;;  %2981 = vrot.lane.b32.xlu0 %v6345_v28, %s6919_s21 }
 0xc84   :  { %v6347_v7 = vpop.eup %6346 }
 0xc85   :  { %2983 = vrot.lane.b32.xlu1 %v6347_v7, %s6919_s21 }
 0xc86   :  { %v6349_v4 = vpop.eup %6348 }
 0xc87   :  { %2979 = vrot.lane.b32.xlu0 %v6349_v4, %s6919_s21 }
 0xc88   :  { %v6351_v8 = vpop.eup %6350 }
 0xc89   :  { %2985 = vrot.lane.b32.xlu1 %v6351_v8, %s6919_s21 }
 0xc8a   :  { %v6353_v30 = vpop.eup %6352 }
 0xc8b   :  { %2987 = vrot.lane.b32.xlu0 %v6353_v30, %s6919_s21 }
 0xc8c   :  { %v6355_v14 = vpop.eup %6354 }
 0xc8d   :  { %2989 = vrot.lane.b32.xlu1 %v6355_v14, %s6919_s21 }
 0xc8e   :  { %v6357_v38 = vpop.eup %6356 }
 0xc8f   :  { %2991 = vrot.lane.b32.xlu0 %v6357_v38, %s6919_s21 }
 0xc90   :  { %v6359_v43 = vpop.eup %6358 }
 0xc91   :  { %2993 = vrot.lane.b32.xlu1 %v6359_v43, %s6919_s21 }
 0xcf5   :  { %v2982_v34 = vpop.permute.xlu0 %2981 }
 0xcf6   :  { %v3004_v60 = vmul.f32 %v7977_v3, %v2982_v34 }
 0xcf7   :  { %v2984_v48 = vpop.permute.xlu1 %2983 }
 0xcf8   :  { %v3005_v40 = vmul.f32 %v7979_v59, %v2984_v48 }
 0xcf9   :  { %v2980_v5 = vpop.permute.xlu0 %2979 }
 0xcfa   :  { %v3003_v25 = vmul.f32 %v7984_v57, %v2980_v5  ;;  %v3021_v51 = vrot.slane %v3005_v40, 7 }
 0xcfb   :  { %v2986_v0 = vpop.permute.xlu1 %2985 }
 0xcfc   :  { %v3006_v35 = vmul.f32 %v7987_v49, %v2986_v0  ;;  %v3019_v47 = vrot.slane %v3003_v25, 1 }
 0xcfd   :  { %v2988_v46 = vpop.permute.xlu0 %2987 }
 0xcfe   :  { %v3023_v32 = vrot.slane %v3006_v35, 6  ;;  %v3020_v1 = vsel %vm2677_vm5, %v3004_v60, %v3019_v47  ;;  %v3007_v45 = vmul.f32 %v7992_v55, %v2988_v46 }
 0xcff   :  { %v2990_v61 = vpop.permute.xlu1 %2989  ;;  %v3022_v12 = vsel %vm2680_vm6, %v3021_v51, %v3020_v1 }
 0xd00   :  { %v3008_v59 = vmul.f32 %v7995_v63, %v2990_v61  ;;  %v3024_v57 = vsel %vm2683_vm7, %v3023_v32, %v3022_v12  ;;  %v3025_v39 = vrot.slane %v3007_v45, 5 }
 0xd01   :  { %v2992_v49 = vpop.permute.xlu0 %2991 }
 0xd02   :  { %v3027_v20 = vrot.slane %v3008_v59, 4  ;;  %v3026_v3 = vsel %vm2686_vm8, %v3025_v39, %v3024_v57  ;;  %v3009_v58 = vmul.f32 %v8000_v54, %v2992_v49  ;;  %v8077_v54 = vld [vmem:[%s8875_s10 + $0x18] sm:$0xff] }
 0xd03   :  { %v2994_v52 = vpop.permute.xlu1 %2993 }
 0xd04   :  { %v3028_v6 = vsel %vm2689_vm9, %v3027_v20, %v3026_v3  ;;  %v3010_v22 = vmul.f32 %v8003_v37, %v2994_v52  ;;  %v3029_v55 = vrot.slane %v3009_v58, 3  ;;  %v8086_v37 = vld [vmem:[%s8875_s10 + $0x10] sm:$0xff] }
 0xd06   :  { %v3031_v42 = vrot.slane %v3010_v22, 2  ;;  %v3030_v2 = vsel %vm2692_vm10, %v3029_v55, %v3028_v6 }
 0xd08   :  { %v3032_v63 = vsel %vm2695_vm11, %v3031_v42, %v3030_v2 }
 0xd09   :  { %3033 = vrot.lane.b32.xlu0 %v3032_v63, %s6928_s9 }
 0xd7b   :  { %v3034_v44 = vpop.permute.xlu0 %3033 }
 0xd7c   :  { %5924 = vmatmul.mubr.msk.f32.vlgmr.msra.gmra.mxu1 %vm255_vm1, %v3034_v44 }
 0xd7d   :  { %5927 = vmatpush3.msra.mxu1 %v8077_v54  ;;  %5934 = vmatprep.mubr.msk.f32.mxu1 %vm6927_vm4, %v6926_v33 }
 0xd7e   :  { %5928 = vmatprep.subr.mxu1 %v6926_v33 }
 0xd7f   :  { %5929 = vmatpush3.msra.mxu1 %v8086_v37 }
 0xd80   :  { %5930 = vmatprep.subr.mxu1 %v6926_v33 }
 0xd81   :  { %5931 = vmatpush3.msra.mxu1 %v8093_v10 }
 0xd82   :  { %5932 = vmatprep.subr.mxu1 %v6926_v33 }
 0xd83   :  { %5933 = vmatpush3.msra.mxu1 %v8100_v17 }
 0xd84   :  { %5937 = vmatprep.subr.mxu1 %v6926_v33 }
 0xe3c   :  { %v3103_v21 = vpop.f32.mrf.mxu1 }
 0xe3d   :  { %v3108_v41 = vrot.slane %v3103_v21, 6  ;;  %v3110_v7 = vrot.slane %v3103_v21, 1  ;;  %v3109_v4 = vrot.slane %v3103_v21, 7  ;;  %v3125_v8 = vadd.f32 %v3103_v21, %v7836_v24 }
 0xe3e   :  { %v5925_v16 = vpop.f32.mrf.mxu1  ;;  %v3111_v30 = vrot.slane %v3103_v21, 2  ;;  %v3112_v38 = vrot.slane %v3103_v21, 3  ;;  %v3113_v34 = vrot.slane %v3103_v21, 4  ;;  %v3114_v5 = vrot.slane %v3103_v21, 5 }
 0xe3f   :  { %v3123_v28 = vadd.f32 %v3108_v41, %v7830_v50  ;;  %v3126_v14 = vadd.f32 %v3110_v7, %v7839_v23  ;;  %v3124_v43 = vadd.f32 %v3109_v4, %v7832_v19  ;;  %v5527_v12 = vmul.f32 -1.442695, %v3125_v8 }
 0xe40   :  { %v3127_v48 = vadd.f32 %v3111_v30, %v7845_v36  ;;  %v3128_v25 = vadd.f32 %v3112_v38, %v7841_v15  ;;  %v3129_v0 = vadd.f32 %v3113_v34, %v7851_v18  ;;  %v3130_v35 = vadd.f32 %v3114_v5, %v7847_v56 }
 0xe41   :  { %6360 = vtanh.f32 %v3123_v28  ;;  %v5525_v61 = vmul.f32 -1.442695, %v3123_v28  ;;  %v5528_v59 = vmul.f32 -1.442695, %v3126_v14  ;;  %v5526_v57 = vmul.f32 -1.442695, %v3124_v43 }
 0xe42   :  { %6362 = vtanh.f32 %v3125_v8  ;;  %v5529_v39 = vmul.f32 -1.442695, %v3127_v48  ;;  %v5530_v49 = vmul.f32 -1.442695, %v3128_v25  ;;  %v5531_v3 = vmul.f32 -1.442695, %v3129_v0 }
 0xe43   :  { %6364 = vtanh.f32 %v3126_v14  ;;  %v5532_v52 = vmul.f32 -1.442695, %v3130_v35 }
 0xe44   :  { %6366 = vtanh.f32 %v3124_v43 }
 0xe45   :  { %6368 = vtanh.f32 %v3127_v48 }
 0xe46   :  { %6370 = vtanh.f32 %v3128_v25 }
 0xe47   :  { %6372 = vtanh.f32 %v3129_v0 }
 0xe48   :  { %6374 = vtanh.f32 %v3130_v35 }
 0xe49   :  { %6376 = vpow2.f32 %v5525_v61 }
 0xe4a   :  { %6378 = vpow2.f32 %v5527_v12 }
 0xe4b   :  { %6380 = vpow2.f32 %v5528_v59 }
 0xe4c   :  { %6382 = vpow2.f32 %v5526_v57 }
 0xe4d   :  { %6384 = vpow2.f32 %v5529_v39 }
 0xe4e   :  { %v6361_v40 = vpop.eup %6360  ;;  %6386 = vpow2.f32 %v5530_v49  ;;  %v3195_v49 = vrot.slane %v8024_v29, 7 }
 0xe4f   :  { %3227 = vrot.lane.b32.xlu1 %v6361_v40, %s6919_s21  ;;  %v6363_v60 = vpop.eup %6362  ;;  %6388 = vpow2.f32 %v5531_v3 }
 0xe50   :  { %v6365_v47 = vpop.eup %6364  ;;  %3231 = vrot.lane.b32.xlu0 %v6363_v60, %s6919_s21 }
 0xe51   :  { %v6367_v51 = vpop.eup %6366 }
 0xe52   :  { %v6369_v32 = vpop.eup %6368 }
 0xe53   :  { %3233 = vrot.lane.b32.xlu1 %v6365_v47, %s6919_s21  ;;  %v6371_v46 = vpop.eup %6370 }
 0xe54   :  { %3229 = vrot.lane.b32.xlu0 %v6367_v51, %s6919_s21  ;;  %v6373_v1 = vpop.eup %6372 }
 0xe55   :  { %v6375_v45 = vpop.eup %6374 }
 0xe56   :  { %v6377_v20 = vpop.eup %6376 }
 0xe57   :  { %3235 = vrot.lane.b32.xlu1 %v6369_v32, %s6919_s21  ;;  %v3155_v58 = vadd.f32 1.0, %v6377_v20  ;;  %v6379_v6 = vpop.eup %6378 }
 0xe58   :  { %3237 = vrot.lane.b32.xlu0 %v6371_v46, %s6919_s21  ;;  %v6381_v22 = vpop.eup %6380  ;;  %v3157_v55 = vadd.f32 1.0, %v6379_v6  ;;  %v3197_v6 = vrot.slane %v8017_v62, 7 }
 0xe59   :  { %6390 = vrcp.f32 %v3155_v58  ;;  %v6383_v42 = vpop.eup %6382  ;;  %v3158_v2 = vadd.f32 1.0, %v6381_v22  ;;  %v3198_v22 = vrot.slane %v8027_v31, 7 }
 0xe5a   :  { %6392 = vpow2.f32 %v5532_v52  ;;  %v6385_v63 = vpop.eup %6384  ;;  %v3156_v44 = vadd.f32 1.0, %v6383_v42 }
 0xe5b   :  { %3239 = vrot.lane.b32.xlu1 %v6373_v1, %s6919_s21  ;;  %6394 = vrcp.f32 %v3157_v55  ;;  %v6387_v21 = vpop.eup %6386  ;;  %v3159_v41 = vadd.f32 1.0, %v6385_v63  ;;  %v3196_v63 = vrot.slane %v8014_v27, 7 }
 0xe5c   :  { %3241 = vrot.lane.b32.xlu0 %v6375_v45, %s6919_s21  ;;  %6396 = vrcp.f32 %v3158_v2  ;;  %v6389_v16 = vpop.eup %6388  ;;  %v3160_v4 = vadd.f32 1.0, %v6387_v21  ;;  %v3199_v21 = vrot.slane %v8034_v26, 7 }
 0xe5d   :  { %6398 = vrcp.f32 %v3156_v44  ;;  %v3161_v14 = vadd.f32 1.0, %v6389_v16 }
 0xe5e   :  { %6400 = vrcp.f32 %v3159_v41 }
 0xe5f   :  { %6402 = vrcp.f32 %v3160_v4 }
 0xe60   :  { %6404 = vrcp.f32 %v3161_v14 }
 0xe66   :  { %v8120_v28 = vpop.eup %6390 }
 0xe67   :  { %v6393_v30 = vpop.eup %6392  ;;  %v3211_v3 = vmul.f32 %v8120_v28, %v3195_v49 }
 0xe68   :  { %v3162_v38 = vadd.f32 1.0, %v6393_v30  ;;  %v8124_v43 = vpop.eup %6394  ;;  %v3201_v30 = vrot.slane %v8043_v11, 7 }
 0xe69   :  { %v8126_v48 = vpop.eup %6396  ;;  %v3213_v55 = vmul.f32 %v8124_v43, %v3197_v6 }
 0xe6a   :  { %6406 = vrcp.f32 %v3162_v38  ;;  %v8131_v0 = vpop.eup %6398  ;;  %v3214_v2 = vmul.f32 %v8126_v48, %v3198_v22 }
 0xe6b   :  { %v8134_v60 = vpop.eup %6400  ;;  %v3212_v62 = vmul.f32 %v8131_v0, %v3196_v63 }
 0xe6c   :  { %v8139_v46 = vpop.eup %6402  ;;  %v3215_v31 = vmul.f32 %v8134_v60, %v3199_v21 }
 0xe6d   :  { %v8142_v45 = vpop.eup %6404 }
 0xe77   :  { %v8147_v57 = vpop.eup %6406 }
 0xec1   :  { %v3228_v7 = vpop.permute.xlu1 %3227 }
 0xec2   :  { %v3251_v8 = vmul.f32 %v8120_v28, %v3228_v7  ;;  %v3232_v34 = vpop.permute.xlu0 %3231  ;;  %v3200_v7 = vrot.slane %v8037_v53, 7  ;;  %v3202_v53 = vrot.slane %v8045_v13, 7 }
 0xec3   :  { %v3253_v40 = vmul.f32 %v8124_v43, %v3232_v34  ;;  %v3217_v34 = vmul.f32 %v8142_v45, %v3201_v30 }
 0xec4   :  { %3267 = vrot.lane.b32.xlu1 %v3251_v8, %s6928_s9  ;;  %v3216_v14 = vmul.f32 %v8139_v46, %v3200_v7  ;;  %v3218_v11 = vmul.f32 %v8147_v57, %v3202_v53 }
 0xec5   :  { %v3234_v5 = vpop.permute.xlu1 %3233  ;;  %3271 = vrot.lane.b32.xlu0 %v3253_v40, %s6928_s9 }
 0xec6   :  { %v3254_v25 = vmul.f32 %v8126_v48, %v3234_v5  ;;  %v3230_v35 = vpop.permute.xlu0 %3229 }
 0xec7   :  { %v3252_v47 = vmul.f32 %v8131_v0, %v3230_v35 }
 0xec8   :  { %3273 = vrot.lane.b32.xlu1 %v3254_v25, %s6928_s9 }
 0xec9   :  { %v3236_v51 = vpop.permute.xlu1 %3235  ;;  %3269 = vrot.lane.b32.xlu0 %v3252_v47, %s6928_s9 }
 0xeca   :  { %v3255_v32 = vmul.f32 %v8134_v60, %v3236_v51  ;;  %v3238_v1 = vpop.permute.xlu0 %3237 }
 0xecb   :  { %v3256_v61 = vmul.f32 %v8139_v46, %v3238_v1 }
 0xecc   :  { %3275 = vrot.lane.b32.xlu1 %v3255_v32, %s6928_s9 }
 0xecd   :  { %v3240_v12 = vpop.permute.xlu1 %3239  ;;  %3277 = vrot.lane.b32.xlu0 %v3256_v61, %s6928_s9 }
 0xece   :  { %v3257_v59 = vmul.f32 %v8142_v45, %v3240_v12  ;;  %v3242_v39 = vpop.permute.xlu0 %3241 }
 0xecf   :  { %v3258_v20 = vmul.f32 %v8147_v57, %v3242_v39 }
 0xed0   :  { %3279 = vrot.lane.b32.xlu1 %v3257_v59, %s6928_s9 }
 0xed1   :  { %3281 = vrot.lane.b32.xlu0 %v3258_v20, %s6928_s9 }
 0xf36   :  { %v3268_v58 = vpop.permute.xlu1 %3267 }
 0xf37   :  { %v8154_v52 = vadd.f32 %v3268_v58, %v3211_v3  ;;  %v3272_v42 = vpop.permute.xlu0 %3271 }
 0xf38   :  { %v8162_v44 = vadd.f32 %v3272_v42, %v3213_v55 }
 0xf39   :  { %6408 = vtanh.f32 %v8154_v52 }
 0xf3a   :  { %v3274_v29 = vpop.permute.xlu1 %3273  ;;  %6410 = vtanh.f32 %v8162_v44 }
 0xf3b   :  { %v8165_v41 = vadd.f32 %v3274_v29, %v3214_v2  ;;  %v3270_v16 = vpop.permute.xlu0 %3269 }
 0xf3c   :  { %v8172_v4 = vadd.f32 %v3270_v16, %v3212_v62 }
 0xf3d   :  { %6412 = vtanh.f32 %v8165_v41 }
 0xf3e   :  { %v3276_v27 = vpop.permute.xlu1 %3275  ;;  %6414 = vtanh.f32 %v8172_v4 }
 0xf3f   :  { %v8175_v26 = vadd.f32 %v3276_v27, %v3215_v31  ;;  %v3278_v38 = vpop.permute.xlu0 %3277 }
 0xf40   :  { %v8183_v40 = vadd.f32 %v3278_v38, %v3216_v14 }
 0xf41   :  { %6416 = vtanh.f32 %v8175_v26 }
 0xf42   :  { %v3280_v5 = vpop.permute.xlu1 %3279  ;;  %6418 = vtanh.f32 %v8183_v40 }
 0xf43   :  { %v8185_v25 = vadd.f32 %v3280_v5, %v3217_v34  ;;  %v3282_v35 = vpop.permute.xlu0 %3281 }
 0xf44   :  { %v8190_v47 = vadd.f32 %v3282_v35, %v3218_v11 }
 0xf45   :  { %6420 = vtanh.f32 %v8185_v25 }
 0xf46   :  { %v6409_v8 = vpop.eup %6408  ;;  %6422 = vtanh.f32 %v8190_v47 }
 0xf47   :  { %3315 = vrot.lane.b32.xlu1 %v6409_v8, %s6919_s21  ;;  %v6411_v51 = vpop.eup %6410 }
 0xf48   :  { %3319 = vrot.lane.b32.xlu0 %v6411_v51, %s6919_s21 }
 0xf4a   :  { %v6413_v32 = vpop.eup %6412 }
 0xf4b   :  { %3321 = vrot.lane.b32.xlu1 %v6413_v32, %s6919_s21  ;;  %v6415_v13 = vpop.eup %6414 }
 0xf4c   :  { %3317 = vrot.lane.b32.xlu0 %v6415_v13, %s6919_s21 }
 0xf4e   :  { %v6417_v1 = vpop.eup %6416 }
 0xf4f   :  { %3323 = vrot.lane.b32.xlu1 %v6417_v1, %s6919_s21  ;;  %v6419_v61 = vpop.eup %6418 }
 0xf50   :  { %3325 = vrot.lane.b32.xlu0 %v6419_v61, %s6919_s21 }
 0xf52   :  { %v6421_v12 = vpop.eup %6420 }
 0xf53   :  { %3327 = vrot.lane.b32.xlu1 %v6421_v12, %s6919_s21  ;;  %v6423_v59 = vpop.eup %6422 }
 0xf54   :  { %3329 = vrot.lane.b32.xlu0 %v6423_v59, %s6919_s21 }
 0xfb9   :  { %v3316_v39 = vpop.permute.xlu1 %3315 }
 0xfba   :  { %v3320_v20 = vpop.permute.xlu0 %3319  ;;  %v3339_v3 = vmul.f32 %v8120_v28, %v3316_v39 }
 0xfbb   :  { %v3341_v21 = vmul.f32 %v8124_v43, %v3320_v20 }
 0xfbc   :  { %v3355_v2 = vrot.slane %v3339_v3, 2 }
 0xfbd   :  { %v3322_v49 = vpop.permute.xlu1 %3321 }
 0xfbe   :  { %v3342_v58 = vmul.f32 %v8126_v48, %v3322_v49  ;;  %v3318_v6 = vpop.permute.xlu0 %3317 }
 0xfbf   :  { %v3340_v22 = vmul.f32 %v8131_v0, %v3318_v6 }
 0xfc0   :  { %v3359_v29 = vrot.slane %v3342_v58, 7 }
 0xfc1   :  { %v3324_v55 = vpop.permute.xlu1 %3323  ;;  %v3356_v63 = vrot.slane %v3340_v22, 1 }
 0xfc2   :  { %v3343_v42 = vmul.f32 %v8134_v60, %v3324_v55  ;;  %v3326_v62 = vpop.permute.xlu0 %3325 }
 0xfc3   :  { %v3357_v31 = vsel %vm2677_vm5, %v3356_v63, %v3355_v2  ;;  %v3344_v7 = vmul.f32 %v8139_v46, %v3326_v62 }
 0xfc4   :  { %v3361_v16 = vrot.slane %v3343_v42, 6  ;;  %v3358_v48 = vsel %vm2680_vm6, %v3341_v21, %v3357_v31 }
 0xfc5   :  { %v3328_v28 = vpop.permute.xlu1 %3327  ;;  %v3360_v0 = vsel %vm2683_vm7, %v3359_v29, %v3358_v48  ;;  %v3363_v8 = vrot.slane %v3344_v7, 5 }
 0xfc6   :  { %v3345_v27 = vmul.f32 %v8142_v45, %v3328_v28  ;;  %v3362_v60 = vsel %vm2686_vm8, %v3361_v16, %v3360_v0  ;;  %v3330_v30 = vpop.permute.xlu0 %3329 }
 0xfc7   :  { %v3346_v43 = vmul.f32 %v8147_v57, %v3330_v30  ;;  %v3364_v38 = vsel %vm2689_vm9, %v3363_v8, %v3362_v60 }
 0xfc8   :  { %v3365_v14 = vrot.slane %v3345_v27, 4 }
 0xfc9   :  { %v3367_v53 = vrot.slane %v3346_v43, 3 }
 0xfca   :  { %v3366_v34 = vsel %vm2692_vm10, %v3365_v14, %v3364_v38 }
 0xfcb   :  { %v3368_v46 = vsel %vm2695_vm11, %v3367_v53, %v3366_v34 }
 0xfcc   :  { %3369 = vrot.lane.b32.xlu1 %v3368_v46, %s6928_s9 }
0x103e   :  { %v3370_v5 = vpop.permute.xlu1 %3369 }
0x103f   :  { %5935 = vmatmul.mubr.msk.f32.vlgmr.msra.gmra.mxu1 %vm255_vm1, %v3370_v5 }
0x1040   :  { %5938 = vmatpush3.msra.mxu1 %v8077_v54  ;;  %5945 = vmatprep.mubr.msk.f32.mxu1 %vm6927_vm4, %v6926_v33 }
0x1041   :  { %5939 = vmatprep.subr.mxu1 %v6926_v33 }
0x1042   :  { %5940 = vmatpush3.msra.mxu1 %v8086_v37 }
0x1043   :  { %5941 = vmatprep.subr.mxu1 %v6926_v33 }
0x1044   :  { %5942 = vmatpush3.msra.mxu1 %v8093_v10 }
0x1045   :  { %5943 = vmatprep.subr.mxu1 %v6926_v33 }
0x1046   :  { %5944 = vmatpush3.msra.mxu1 %v8100_v17 }
0x1047   :  { %5948 = vmatprep.subr.mxu1 %v6926_v33 }
0x10ff   :  { %v3439_v45 = vpop.f32.mrf.mxu1 }
0x1100   :  { %v3445_v11 = vrot.slane %v3439_v45, 6  ;;  %v3447_v35 = vrot.slane %v3439_v45, 1  ;;  %v3444_v32 = vrot.slane %v3439_v45, 5  ;;  %v3462_v13 = vadd.f32 %v3439_v45, %v7839_v23 }
0x1101   :  { %v5936_v57 = vpop.f32.mrf.mxu1  ;;  %v3448_v1 = vrot.slane %v3439_v45, 2  ;;  %v3446_v12 = vrot.slane %v3439_v45, 7  ;;  %v3450_v39 = vrot.slane %v3439_v45, 4  ;;  %v3449_v49 = vrot.slane %v3439_v45, 3 }
0x1102   :  { %v3460_v51 = vadd.f32 %v3445_v11, %v7832_v19  ;;  %v3463_v61 = vadd.f32 %v3447_v35, %v7845_v36  ;;  %v3459_v59 = vadd.f32 %v3444_v32, %v7830_v50  ;;  %v5537_v31 = vmul.f32 -1.442695, %v3462_v13 }
0x1103   :  { %v3464_v20 = vadd.f32 %v3448_v1, %v7841_v15  ;;  %v3461_v3 = vadd.f32 %v3446_v12, %v7836_v24  ;;  %v3466_v58 = vadd.f32 %v3450_v39, %v7847_v56  ;;  %v3465_v6 = vadd.f32 %v3449_v49, %v7851_v18 }
0x1104   :  { %6424 = vtanh.f32 %v3460_v51  ;;  %v5535_v16 = vmul.f32 -1.442695, %v3460_v51  ;;  %v5538_v7 = vmul.f32 -1.442695, %v3463_v61  ;;  %v5534_v28 = vmul.f32 -1.442695, %v3459_v59 }
0x1105   :  { %6426 = vtanh.f32 %v3462_v13  ;;  %v5539_v48 = vmul.f32 -1.442695, %v3464_v20  ;;  %v5536_v27 = vmul.f32 -1.442695, %v3461_v3  ;;  %v5541_v0 = vmul.f32 -1.442695, %v3466_v58 }
0x1106   :  { %6428 = vtanh.f32 %v3463_v61  ;;  %v5540_v8 = vmul.f32 -1.442695, %v3465_v6 }
0x1107   :  { %6430 = vtanh.f32 %v3459_v59 }
0x1108   :  { %6432 = vtanh.f32 %v3464_v20 }
0x1109   :  { %6434 = vtanh.f32 %v3461_v3 }
0x110a   :  { %6436 = vtanh.f32 %v3466_v58 }
0x110b   :  { %6438 = vtanh.f32 %v3465_v6 }
0x110c   :  { %6440 = vpow2.f32 %v5535_v16 }
0x110d   :  { %6442 = vpow2.f32 %v5537_v31 }
0x110e   :  { %6444 = vpow2.f32 %v5538_v7 }
0x110f   :  { %6446 = vpow2.f32 %v5534_v28 }
0x1110   :  { %6448 = vpow2.f32 %v5539_v48 }
0x1111   :  { %v6425_v22 = vpop.eup %6424  ;;  %6450 = vpow2.f32 %v5536_v27 }
0x1112   :  { %3565 = vrot.lane.b32.xlu1 %v6425_v22, %s6919_s21  ;;  %v6427_v55 = vpop.eup %6426  ;;  %6452 = vpow2.f32 %v5541_v0  ;;  %v3532_v0 = vrot.slane %v8172_v4, 7 }
0x1113   :  { %3569 = vrot.lane.b32.xlu0 %v6427_v55, %s6919_s21  ;;  %v6429_v42 = vpop.eup %6428  ;;  %6454 = vpow2.f32 %v5540_v8  ;;  %v3534_v8 = vrot.slane %v8165_v41, 7  ;;  %v3536_v41 = vrot.slane %v8183_v40, 7 }
0x1114   :  { %v6431_v2 = vpop.eup %6430 }
0x1115   :  { %v6433_v63 = vpop.eup %6432 }
0x1116   :  { %3571 = vrot.lane.b32.xlu1 %v6429_v42, %s6919_s21  ;;  %v6435_v29 = vpop.eup %6434 }
0x1117   :  { %3563 = vrot.lane.b32.xlu0 %v6431_v2, %s6919_s21  ;;  %v6437_v21 = vpop.eup %6436 }
0x1118   :  { %v6439_v62 = vpop.eup %6438 }
0x1119   :  { %v6441_v60 = vpop.eup %6440 }
0x111a   :  { %3573 = vrot.lane.b32.xlu1 %v6433_v63, %s6919_s21  ;;  %v6443_v30 = vpop.eup %6442  ;;  %v3492_v14 = vadd.f32 1.0, %v6441_v60 }
0x111b   :  { %3567 = vrot.lane.b32.xlu0 %v6435_v29, %s6919_s21  ;;  %v6445_v43 = vpop.eup %6444  ;;  %v3494_v38 = vadd.f32 1.0, %v6443_v30 }
0x111c   :  { %v6447_v34 = vpop.eup %6446  ;;  %v3495_v53 = vadd.f32 1.0, %v6445_v43  ;;  %6456 = vrcp.f32 %v3492_v14  ;;  %v3535_v14 = vrot.slane %v8175_v26, 7 }
0x111d   :  { %v6449_v46 = vpop.eup %6448  ;;  %v3491_v5 = vadd.f32 1.0, %v6447_v34  ;;  %6458 = vrcp.f32 %v3494_v38 }
0x111e   :  { %3577 = vrot.lane.b32.xlu1 %v6437_v21, %s6919_s21  ;;  %v6451_v45 = vpop.eup %6450  ;;  %v3496_v57 = vadd.f32 1.0, %v6449_v46  ;;  %6460 = vrcp.f32 %v3495_v53  ;;  %v3531_v53 = vrot.slane %v8154_v52, 7 }
0x111f   :  { %3575 = vrot.lane.b32.xlu0 %v6439_v62, %s6919_s21  ;;  %v6453_v11 = vpop.eup %6452  ;;  %v3493_v35 = vadd.f32 1.0, %v6451_v45  ;;  %6462 = vrcp.f32 %v3491_v5 }
0x1120   :  { %v6455_v51 = vpop.eup %6454  ;;  %v3498_v32 = vadd.f32 1.0, %v6453_v11  ;;  %6464 = vrcp.f32 %v3496_v57  ;;  %v3533_v11 = vrot.slane %v8162_v44, 7 }
0x1121   :  { %v3497_v13 = vadd.f32 1.0, %v6455_v51  ;;  %6466 = vrcp.f32 %v3493_v35 }
0x1122   :  { %6468 = vrcp.f32 %v3498_v32  ;;  %v3538_v32 = vrot.slane %v8190_v47, 7 }
0x1123   :  { %6470 = vrcp.f32 %v3497_v13 }
0x1129   :  { %v8243_v1 = vpop.eup %6456 }
0x112a   :  { %v8246_v59 = vpop.eup %6458  ;;  %v3548_v60 = vmul.f32 %v8243_v1, %v3532_v0 }
0x112b   :  { %v8250_v49 = vpop.eup %6460  ;;  %v3550_v43 = vmul.f32 %v8246_v59, %v3534_v8 }
0x112c   :  { %v8254_v6 = vpop.eup %6462  ;;  %v3551_v4 = vmul.f32 %v8250_v49, %v3535_v14 }
0x112d   :  { %v8258_v42 = vpop.eup %6464  ;;  %v3547_v26 = vmul.f32 %v8254_v6, %v3531_v53 }
0x112e   :  { %v8262_v29 = vpop.eup %6466  ;;  %v3552_v52 = vmul.f32 %v8258_v42, %v3536_v41 }
0x112f   :  { %v8266_v16 = vpop.eup %6468  ;;  %v3549_v40 = vmul.f32 %v8262_v29, %v3533_v11 }
0x1130   :  { %v8270_v28 = vpop.eup %6470  ;;  %v3554_v44 = vmul.f32 %v8266_v16, %v3538_v32 }
0x1184   :  { %v3566_v61 = vpop.permute.xlu1 %3565 }
0x1185   :  { %v3588_v12 = vmul.f32 %v8243_v1, %v3566_v61  ;;  %v3570_v39 = vpop.permute.xlu0 %3569 }
0x1186   :  { %v3590_v20 = vmul.f32 %v8246_v59, %v3570_v39 }
0x1187   :  { %3605 = vrot.lane.b32.xlu1 %v3588_v12, %s6928_s9  ;;  %v3537_v12 = vrot.slane %v8185_v25, 7 }
0x1188   :  { %v3572_v3 = vpop.permute.xlu1 %3571  ;;  %3609 = vrot.lane.b32.xlu0 %v3590_v20, %s6928_s9 }
0x1189   :  { %v3591_v58 = vmul.f32 %v8250_v49, %v3572_v3  ;;  %v3564_v22 = vpop.permute.xlu0 %3563  ;;  %v3553_v47 = vmul.f32 %v8270_v28, %v3537_v12 }
0x118a   :  { %v3587_v55 = vmul.f32 %v8254_v6, %v3564_v22 }
0x118b   :  { %3611 = vrot.lane.b32.xlu1 %v3591_v58, %s6928_s9 }
0x118c   :  { %v3574_v2 = vpop.permute.xlu1 %3573  ;;  %3603 = vrot.lane.b32.xlu0 %v3587_v55, %s6928_s9 }
0x118d   :  { %v3592_v63 = vmul.f32 %v8258_v42, %v3574_v2  ;;  %v3568_v21 = vpop.permute.xlu0 %3567 }
0x118e   :  { %v3589_v62 = vmul.f32 %v8262_v29, %v3568_v21 }
0x118f   :  { %3613 = vrot.lane.b32.xlu1 %v3592_v63, %s6928_s9 }
0x1190   :  { %v3578_v31 = vpop.permute.xlu1 %3577  ;;  %3607 = vrot.lane.b32.xlu0 %v3589_v62, %s6928_s9 }
0x1191   :  { %v3594_v7 = vmul.f32 %v8266_v16, %v3578_v31  ;;  %v3576_v48 = vpop.permute.xlu0 %3575 }
0x1192   :  { %v3593_v27 = vmul.f32 %v8270_v28, %v3576_v48 }
0x1193   :  { %3617 = vrot.lane.b32.xlu1 %v3594_v7, %s6928_s9 }
0x1194   :  { %3615 = vrot.lane.b32.xlu0 %v3593_v27, %s6928_s9 }
0x11f9   :  { %v3606_v30 = vpop.permute.xlu1 %3605 }
0x11fa   :  { %v8280_v38 = vadd.f32 %v3606_v30, %v3548_v60  ;;  %v3610_v34 = vpop.permute.xlu0 %3609 }
0x11fb   :  { %v8283_v46 = vadd.f32 %v3610_v34, %v3550_v43 }
0x11fc   :  { %6472 = vtanh.f32 %v8280_v38 }
0x11fd   :  { %v3612_v5 = vpop.permute.xlu1 %3611  ;;  %6474 = vtanh.f32 %v8283_v46 }
0x11fe   :  { %v8290_v45 = vadd.f32 %v3612_v5, %v3551_v4  ;;  %v3604_v57 = vpop.permute.xlu0 %3603 }
0x11ff   :  { %v8293_v35 = vadd.f32 %v3604_v57, %v3547_v26 }
0x1200   :  { %6476 = vtanh.f32 %v8290_v45 }
0x1201   :  { %v3614_v51 = vpop.permute.xlu1 %3613  ;;  %6478 = vtanh.f32 %v8293_v35 }
0x1202   :  { %v8300_v13 = vadd.f32 %v3614_v51, %v3552_v52  ;;  %v3608_v61 = vpop.permute.xlu0 %3607 }
0x1203   :  { %v8303_v39 = vadd.f32 %v3608_v61, %v3549_v40 }
0x1204   :  { %6480 = vtanh.f32 %v8300_v13 }
0x1205   :  { %v3618_v20 = vpop.permute.xlu1 %3617  ;;  %6482 = vtanh.f32 %v8303_v39 }
0x1206   :  { %v8309_v3 = vadd.f32 %v3618_v20, %v3554_v44  ;;  %v3616_v58 = vpop.permute.xlu0 %3615 }
0x1207   :  { %v8311_v22 = vadd.f32 %v3616_v58, %v3553_v47 }
0x1208   :  { %6484 = vtanh.f32 %v8309_v3 }
0x1209   :  { %v6473_v55 = vpop.eup %6472  ;;  %6486 = vtanh.f32 %v8311_v22 }
0x120a   :  { %3653 = vrot.lane.b32.xlu1 %v6473_v55, %s6919_s21  ;;  %v6475_v25 = vpop.eup %6474 }
0x120b   :  { %3657 = vrot.lane.b32.xlu0 %v6475_v25, %s6919_s21 }
0x120d   :  { %v6477_v2 = vpop.eup %6476 }
0x120e   :  { %3659 = vrot.lane.b32.xlu1 %v6477_v2, %s6919_s21  ;;  %v6479_v63 = vpop.eup %6478 }
0x120f   :  { %3651 = vrot.lane.b32.xlu0 %v6479_v63, %s6919_s21 }
0x1211   :  { %v6481_v21 = vpop.eup %6480 }
0x1212   :  { %3661 = vrot.lane.b32.xlu1 %v6481_v21, %s6919_s21  ;;  %v6483_v62 = vpop.eup %6482 }
0x1213   :  { %3655 = vrot.lane.b32.xlu0 %v6483_v62, %s6919_s21 }
0x1215   :  { %v6485_v31 = vpop.eup %6484 }
0x1216   :  { %3665 = vrot.lane.b32.xlu1 %v6485_v31, %s6919_s21  ;;  %v6487_v7 = vpop.eup %6486 }
0x1217   :  { %3663 = vrot.lane.b32.xlu0 %v6487_v7, %s6919_s21 }
0x127c   :  { %v3654_v48 = vpop.permute.xlu1 %3653 }
0x127d   :  { %v3658_v27 = vpop.permute.xlu0 %3657  ;;  %v3676_v30 = vmul.f32 %v8243_v1, %v3654_v48 }
0x127e   :  { %v3678_v52 = vmul.f32 %v8246_v59, %v3658_v27 }
0x127f   :  { %v3692_v41 = vrot.slane %v3676_v30, 2 }
0x1280   :  { %v3660_v0 = vpop.permute.xlu1 %3659 }
0x1281   :  { %v3652_v8 = vpop.permute.xlu0 %3651  ;;  %v3679_v4 = vmul.f32 %v8250_v49, %v3660_v0 }
0x1282   :  { %v3675_v60 = vmul.f32 %v8254_v6, %v3652_v8 }
0x1283   :  { %v3697_v32 = vrot.slane %v3679_v4, 7 }
0x1284   :  { %v3662_v14 = vpop.permute.xlu1 %3661  ;;  %v3691_v43 = vrot.slane %v3675_v60, 3 }
0x1285   :  { %v3656_v34 = vpop.permute.xlu0 %3655  ;;  %v3680_v53 = vmul.f32 %v8258_v42, %v3662_v14 }
0x1286   :  { %v3677_v5 = vmul.f32 %v8262_v29, %v3656_v34  ;;  %v3693_v6 = vsel %vm2677_vm5, %v3692_v41, %v3691_v43 }
0x1287   :  { %v3699_v51 = vrot.slane %v3680_v53, 6 }
0x1288   :  { %v3666_v26 = vpop.permute.xlu1 %3665  ;;  %v3694_v57 = vrot.slane %v3677_v5, 1 }
0x1289   :  { %v3682_v11 = vmul.f32 %v8266_v16, %v3666_v26  ;;  %v3664_v1 = vpop.permute.xlu0 %3663 }
0x128a   :  { %v3695_v40 = vsel %vm2680_vm6, %v3694_v57, %v3693_v6  ;;  %v3681_v42 = vmul.f32 %v8270_v28, %v3664_v1 }
0x128b   :  { %v3696_v49 = vsel %vm2683_vm7, %v3678_v52, %v3695_v40  ;;  %v3703_v61 = vrot.slane %v3682_v11, 4 }
0x128c   :  { %v3698_v29 = vsel %vm2686_vm8, %v3697_v32, %v3696_v49  ;;  %v3701_v12 = vrot.slane %v3681_v42, 5 }
0x128d   :  { %v3700_v44 = vsel %vm2689_vm9, %v3699_v51, %v3698_v29 }
0x128e   :  { %v3702_v16 = vsel %vm2692_vm10, %v3701_v12, %v3700_v44 }
0x128f   :  { %v3704_v59 = vsel %vm2695_vm11, %v3703_v61, %v3702_v16 }
0x1290   :  { %3705 = vrot.lane.b32.xlu0 %v3704_v59, %s6928_s9 }
0x1302   :  { %v3706_v20 = vpop.permute.xlu0 %3705 }
0x1303   :  { %5946 = vmatmul.mubr.msk.f32.vlgmr.msra.gmra.mxu1 %vm255_vm1, %v3706_v20 }
0x1304   :  { %5949 = vmatpush3.msra.mxu1 %v8077_v54  ;;  %5956 = vmatprep.mubr.msk.f32.mxu1 %vm6927_vm4, %v6926_v33 }
0x1305   :  { %5950 = vmatprep.subr.mxu1 %v6926_v33 }
0x1306   :  { %5951 = vmatpush3.msra.mxu1 %v8086_v37 }
0x1307   :  { %5952 = vmatprep.subr.mxu1 %v6926_v33 }
0x1308   :  { %5953 = vmatpush3.msra.mxu1 %v8093_v10 }
0x1309   :  { %5954 = vmatprep.subr.mxu1 %v6926_v33 }
0x130a   :  { %5955 = vmatpush3.msra.mxu1 %v8100_v17 }
0x130b   :  { %5970 = vmatprep.subr.mxu1 %v6926_v33 }
0x13c3   :  { %v3775_v28 = vpop.f32.mrf.mxu1 }
0x13c4   :  { %v3780_v47 = vrot.slane %v3775_v28, 4  ;;  %v3782_v55 = vrot.slane %v3775_v28, 6  ;;  %v3784_v25 = vrot.slane %v3775_v28, 1  ;;  %v3781_v2 = vrot.slane %v3775_v28, 5 }
0x13c5   :  { %v5947_v54 = vpop.f32.mrf.mxu1  ;;  %v3799_v63 = vadd.f32 %v3775_v28, %v7845_v36  ;;  %v3785_v10 = vrot.slane %v3775_v28, 2  ;;  %v3783_v17 = vrot.slane %v3775_v28, 7  ;;  %v3786_v48 = vrot.slane %v3775_v28, 3 }
0x13c6   :  { %v3795_v58 = vadd.f32 %v3780_v47, %v7830_v50  ;;  %v3797_v37 = vadd.f32 %v3782_v55, %v7836_v24  ;;  %v3800_v21 = vadd.f32 %v3784_v25, %v7841_v15  ;;  %v3796_v62 = vadd.f32 %v3781_v2, %v7832_v19 }
0x13c7   :  { %v3801_v7 = vadd.f32 %v3785_v10, %v7851_v18  ;;  %v3798_v27 = vadd.f32 %v3783_v17, %v7839_v23  ;;  %v3802_v0 = vadd.f32 %v3786_v48, %v7847_v56  ;;  %v5547_v41 = vmul.f32 -1.442695, %v3799_v63 }
0x13c8   :  { %6488 = vtanh.f32 %v3795_v58  ;;  %v5543_v4 = vmul.f32 -1.442695, %v3795_v58  ;;  %v5545_v5 = vmul.f32 -1.442695, %v3797_v37  ;;  %v5548_v26 = vmul.f32 -1.442695, %v3800_v21 }
0x13c9   :  { %6490 = vtanh.f32 %v3797_v37  ;;  %v5544_v57 = vmul.f32 -1.442695, %v3796_v62  ;;  %v5549_v52 = vmul.f32 -1.442695, %v3801_v7  ;;  %v5546_v6 = vmul.f32 -1.442695, %v3798_v27 }
0x13ca   :  { %6492 = vtanh.f32 %v3799_v63  ;;  %v5550_v1 = vmul.f32 -1.442695, %v3802_v0 }
0x13cb   :  { %6494 = vtanh.f32 %v3800_v21 }
0x13cc   :  { %6496 = vtanh.f32 %v3796_v62 }
0x13cd   :  { %6498 = vtanh.f32 %v3801_v7 }
0x13ce   :  { %6500 = vtanh.f32 %v3798_v27 }
0x13cf   :  { %6502 = vtanh.f32 %v3802_v0 }
0x13d0   :  { %6504 = vpow2.f32 %v5543_v4 }
0x13d1   :  { %6506 = vpow2.f32 %v5545_v5 }
0x13d2   :  { %6508 = vpow2.f32 %v5547_v41  ;;  %v3867_v41 = vrot.slane %v8293_v35, 7 }
0x13d3   :  { %6510 = vpow2.f32 %v5548_v26 }
0x13d4   :  { %6512 = vpow2.f32 %v5544_v57 }
0x13d5   :  { %v6489_v31 = vpop.eup %6488  ;;  %6514 = vpow2.f32 %v5549_v52  ;;  %v3869_v52 = vrot.slane %v8303_v39, 7 }
0x13d6   :  { %3899 = vrot.lane.b32.xlu1 %v6489_v31, %s6919_s21  ;;  %v6491_v8 = vpop.eup %6490  ;;  %6516 = vpow2.f32 %v5546_v6  ;;  %v3871_v6 = vrot.slane %v8290_v45, 7  ;;  %v3873_v45 = vrot.slane %v8311_v22, 7 }
0x13d7   :  { %v6493_v60 = vpop.eup %6492 }
0x13d8   :  { %3907 = vrot.lane.b32.xlu0 %v6493_v60, %s6919_s21  ;;  %v6495_v30 = vpop.eup %6494 }
0x13d9   :  { %v6497_v14 = vpop.eup %6496 }
0x13da   :  { %3903 = vrot.lane.b32.xlu1 %v6491_v8, %s6919_s21  ;;  %v6499_v43 = vpop.eup %6498 }
0x13db   :  { %v6501_v34 = vpop.eup %6500 }
0x13dc   :  { %3901 = vrot.lane.b32.xlu0 %v6497_v14, %s6919_s21  ;;  %v6503_v53 = vpop.eup %6502 }
0x13dd   :  { %v6505_v11 = vpop.eup %6504 }
0x13de   :  { %3909 = vrot.lane.b32.xlu1 %v6495_v30, %s6919_s21  ;;  %v3827_v51 = vadd.f32 1.0, %v6505_v11  ;;  %v6507_v32 = vpop.eup %6506 }
0x13df   :  { %v6509_v40 = vpop.eup %6508  ;;  %v3829_v42 = vadd.f32 1.0, %v6507_v32  ;;  %v3872_v32 = vrot.slane %v8300_v13, 7 }
0x13e0   :  { %3905 = vrot.lane.b32.xlu0 %v6501_v34, %s6919_s21  ;;  %6518 = vrcp.f32 %v3827_v51  ;;  %v6511_v49 = vpop.eup %6510  ;;  %v3831_v61 = vadd.f32 1.0, %v6509_v40 }
0x13e1   :  { %6520 = vpow2.f32 %v5550_v1  ;;  %v6513_v29 = vpop.eup %6512  ;;  %v3832_v12 = vadd.f32 1.0, %v6511_v49  ;;  %v3868_v49 = vrot.slane %v8280_v38, 7 }
0x13e2   :  { %3911 = vrot.lane.b32.xlu1 %v6499_v43, %s6919_s21  ;;  %6522 = vrcp.f32 %v3829_v42  ;;  %v6515_v44 = vpop.eup %6514  ;;  %v3828_v59 = vadd.f32 1.0, %v6513_v29 }
0x13e3   :  { %v6517_v16 = vpop.eup %6516  ;;  %6524 = vrcp.f32 %v3831_v61  ;;  %v3833_v47 = vadd.f32 1.0, %v6515_v44 }
0x13e4   :  { %3913 = vrot.lane.b32.xlu0 %v6503_v53, %s6919_s21  ;;  %6526 = vrcp.f32 %v3832_v12  ;;  %v3830_v58 = vadd.f32 1.0, %v6517_v16 }
0x13e5   :  { %6528 = vrcp.f32 %v3828_v59  ;;  %v3870_v59 = vrot.slane %v8283_v46, 7 }
0x13e6   :  { %6530 = vrcp.f32 %v3833_v47 }
0x13e7   :  { %6532 = vrcp.f32 %v3830_v58 }
0x13ed   :  { %v8366_v20 = vpop.eup %6518 }
0x13ee   :  { %v6521_v55 = vpop.eup %6520  ;;  %v3883_v26 = vmul.f32 %v8366_v20, %v3867_v41 }
0x13ef   :  { %v3834_v25 = vadd.f32 1.0, %v6521_v55  ;;  %v8370_v37 = vpop.eup %6522  ;;  %v3874_v55 = vrot.slane %v8309_v3, 7 }
0x13f0   :  { %v8373_v10 = vpop.eup %6524  ;;  %v3885_v51 = vmul.f32 %v8370_v37, %v3869_v52 }
0x13f1   :  { %6534 = vrcp.f32 %v3834_v25  ;;  %v8377_v62 = vpop.eup %6526  ;;  %v3887_v40 = vmul.f32 %v8373_v10, %v3871_v6 }
0x13f2   :  { %v8381_v48 = vpop.eup %6528  ;;  %v3888_v39 = vmul.f32 %v8377_v62, %v3872_v32 }
0x13f3   :  { %v8385_v8 = vpop.eup %6530  ;;  %v3884_v13 = vmul.f32 %v8381_v48, %v3868_v49 }
0x13f4   :  { %v8389_v14 = vpop.eup %6532 }
0x13f5   :  { %v3886_v22 = vmul.f32 %v8389_v14, %v3870_v59 }
0x13fe   :  { %v8394_v53 = vpop.eup %6534 }
0x13ff   :  { %v3890_v46 = vmul.f32 %v8394_v53, %v3874_v55 }
0x1448   :  { %v3900_v28 = vpop.permute.xlu1 %3899 }
0x1449   :  { %v3923_v54 = vmul.f32 %v8366_v20, %v3900_v28  ;;  %v3889_v28 = vmul.f32 %v8385_v8, %v3873_v45 }
0x144a   :  { %v3908_v21 = vpop.permute.xlu0 %3907 }
0x144b   :  { %3939 = vrot.lane.b32.xlu1 %v3923_v54, %s6928_s9  ;;  %v3927_v17 = vmul.f32 %v8373_v10, %v3908_v21 }
0x144c   :  { %v3904_v2 = vpop.permute.xlu1 %3903 }
0x144d   :  { %v3925_v63 = vmul.f32 %v8370_v37, %v3904_v2  ;;  %3947 = vrot.lane.b32.xlu0 %v3927_v17, %s6928_s9 }
0x144e   :  { %v3902_v27 = vpop.permute.xlu0 %3901 }
0x144f   :  { %3943 = vrot.lane.b32.xlu1 %v3925_v63, %s6928_s9  ;;  %v3924_v0 = vmul.f32 %v8381_v48, %v3902_v27 }
0x1450   :  { %v3910_v31 = vpop.permute.xlu1 %3909 }
0x1451   :  { %v3928_v7 = vmul.f32 %v8377_v62, %v3910_v31  ;;  %3941 = vrot.lane.b32.xlu0 %v3924_v0, %s6928_s9 }
0x1452   :  { %v3906_v43 = vpop.permute.xlu0 %3905 }
0x1453   :  { %3949 = vrot.lane.b32.xlu1 %v3928_v7, %s6928_s9  ;;  %v3926_v34 = vmul.f32 %v8389_v14, %v3906_v43 }
0x1454   :  { %v3912_v60 = vpop.permute.xlu1 %3911 }
0x1455   :  { %v3929_v30 = vmul.f32 %v8385_v8, %v3912_v60  ;;  %3945 = vrot.lane.b32.xlu0 %v3926_v34, %s6928_s9 }
0x1456   :  { %v3914_v4 = vpop.permute.xlu0 %3913 }
0x1457   :  { %3951 = vrot.lane.b32.xlu1 %v3929_v30, %s6928_s9  ;;  %v3930_v5 = vmul.f32 %v8394_v53, %v3914_v4 }
0x1459   :  { %3953 = vrot.lane.b32.xlu0 %v3930_v5, %s6928_s9 }
0x14bd   :  { %v3940_v57 = vpop.permute.xlu1 %3939 }
0x14be   :  { %v8400_v11 = vadd.f32 %v3940_v57, %v3883_v26 }
0x14bf   :  { %v3948_v35 = vpop.permute.xlu0 %3947 }
0x14c0   :  { %6536 = vtanh.f32 %v8400_v11  ;;  %v8411_v61 = vadd.f32 %v3948_v35, %v3887_v40 }
0x14c1   :  { %v3944_v1 = vpop.permute.xlu1 %3943 }
0x14c2   :  { %v8408_v42 = vadd.f32 %v3944_v1, %v3885_v51 }
0x14c3   :  { %v3942_v16 = vpop.permute.xlu0 %3941 }
0x14c4   :  { %6538 = vtanh.f32 %v8408_v42  ;;  %v8421_v38 = vadd.f32 %v3942_v16, %v3884_v13 }
0x14c5   :  { %v3950_v29 = vpop.permute.xlu1 %3949  ;;  %6540 = vtanh.f32 %v8411_v61 }
0x14c6   :  { %v8418_v12 = vadd.f32 %v3950_v29, %v3888_v39 }
0x14c7   :  { %v3946_v58 = vpop.permute.xlu0 %3945 }
0x14c8   :  { %6542 = vtanh.f32 %v8418_v12  ;;  %v8431_v25 = vadd.f32 %v3946_v58, %v3886_v22  ;;  %v6767_v22 = vld [vmem:[%s8875_s10] sm:$0xff] }
0x14c9   :  { %v3952_v47 = vpop.permute.xlu1 %3951  ;;  %6544 = vtanh.f32 %v8421_v38 }
0x14ca   :  { %v8428_v54 = vadd.f32 %v3952_v47, %v3889_v28  ;;  %v6766_v47 = vld [vmem:[%s8875_s10 + $0x8] sm:$0xff] }
0x14cb   :  { %v3954_v2 = vpop.permute.xlu0 %3953 }
0x14cc   :  { %6546 = vtanh.f32 %v8428_v54  ;;  %v8436_v63 = vadd.f32 %v3954_v2, %v3890_v46 }
0x14cd   :  { %v6537_v44 = vpop.eup %6536  ;;  %6548 = vtanh.f32 %v8431_v25 }
0x14ce   :  { %3987 = vrot.lane.b32.xlu1 %v6537_v44, %s6919_s21  ;;  %6550 = vtanh.f32 %v8436_v63 }
0x14d1   :  { %v6539_v21 = vpop.eup %6538 }
0x14d2   :  { %3991 = vrot.lane.b32.xlu1 %v6539_v21, %s6919_s21  ;;  %v6541_v17 = vpop.eup %6540 }
0x14d3   :  { %3995 = vrot.lane.b32.xlu0 %v6541_v17, %s6919_s21 }
0x14d5   :  { %v6543_v3 = vpop.eup %6542 }
0x14d6   :  { %3997 = vrot.lane.b32.xlu1 %v6543_v3, %s6919_s21  ;;  %v6545_v31 = vpop.eup %6544 }
0x14d7   :  { %3989 = vrot.lane.b32.xlu0 %v6545_v31, %s6919_s21 }
0x14d9   :  { %v6547_v7 = vpop.eup %6546 }
0x14da   :  { %3999 = vrot.lane.b32.xlu1 %v6547_v7, %s6919_s21  ;;  %v6549_v27 = vpop.eup %6548 }
0x14db   :  { %3993 = vrot.lane.b32.xlu0 %v6549_v27, %s6919_s21  ;;  %v6551_v0 = vpop.eup %6550 }
0x14df   :  { %4001 = vrot.lane.b32.xlu0 %v6551_v0, %s6919_s21 }
0x1540   :  { %v3988_v60 = vpop.permute.xlu1 %3987 }
0x1541   :  { %v4011_v5 = vmul.f32 %v8366_v20, %v3988_v60 }
0x1543   :  { %v4027_v6 = vrot.slane %v4011_v5, 4 }
0x1544   :  { %v3992_v30 = vpop.permute.xlu1 %3991 }
0x1545   :  { %v3996_v43 = vpop.permute.xlu0 %3995  ;;  %v4013_v34 = vmul.f32 %v8370_v37, %v3992_v30 }
0x1546   :  { %v4015_v29 = vmul.f32 %v8373_v10, %v3996_v43  ;;  %v6764_v10 = vld [vmem:[%s8875_s10 + $0x18] sm:$0xff] }
0x1547   :  { %v4030_v57 = vrot.slane %v4013_v34, 2 }
0x1548   :  { %v3998_v4 = vpop.permute.xlu1 %3997 }
0x1549   :  { %v3990_v41 = vpop.permute.xlu0 %3989  ;;  %v4016_v1 = vmul.f32 %v8377_v62, %v3998_v4 }
0x154a   :  { %v4012_v26 = vmul.f32 %v8381_v48, %v3990_v41 }
0x154b   :  { %v4035_v20 = vrot.slane %v4016_v1, 7 }
0x154c   :  { %v4000_v52 = vpop.permute.xlu1 %3999  ;;  %v4028_v51 = vrot.slane %v4012_v26, 3 }
0x154d   :  { %v3994_v32 = vpop.permute.xlu0 %3993  ;;  %v4017_v40 = vmul.f32 %v8385_v8, %v4000_v52 }
0x154e   :  { %v4029_v35 = vsel %vm2677_vm5, %v4028_v51, %v4027_v6  ;;  %v4014_v49 = vmul.f32 %v8389_v14, %v3994_v32 }
0x154f   :  { %v4031_v37 = vsel %vm2680_vm6, %v4030_v57, %v4029_v35  ;;  %v4037_v45 = vrot.slane %v4017_v40, 6 }
0x1550   :  { %v4032_v39 = vrot.slane %v4014_v49, 1 }
0x1551   :  { %v4002_v48 = vpop.permute.xlu0 %4001 }
0x1552   :  { %v4033_v13 = vsel %vm2683_vm7, %v4032_v39, %v4031_v37  ;;  %v4018_v44 = vmul.f32 %v8394_v53, %v4002_v48  ;;  %v6765_v53 = vld [vmem:[%s8875_s10 + $0x10] sm:$0xff] }
0x1553   :  { %v4034_v62 = vsel %vm2686_vm8, %v4015_v29, %v4033_v13 }
0x1554   :  { %v4036_v8 = vsel %vm2689_vm9, %v4035_v20, %v4034_v62  ;;  %v4039_v16 = vrot.slane %v4018_v44, 5 }
0x1555   :  { %v4038_v59 = vsel %vm2692_vm10, %v4037_v45, %v4036_v8 }
0x1556   :  { %v4040_v14 = vsel %vm2695_vm11, %v4039_v16, %v4038_v59 }
0x1557   :  { %4041 = vrot.lane.b32.xlu1 %v4040_v14, %s6928_s9 }
0x15c9   :  { %v4042_v28 = vpop.permute.xlu1 %4041 }
0x15ca   :  { %5957 = vmatmul.mubr.msk.f32.vlgmr.msra.gmra.mxu1 %vm255_vm1, %v4042_v28 }
0x15cb   :  { %5971 = vmatpush3.msra.mxu1 %v6764_v10  ;;  %5978 = vmatprep.mubr.msk.f32.mxu1 %vm6927_vm4, %v6926_v33 }
0x15cc   :  { %5972 = vmatprep.subr.mxu1 %v6926_v33 }
0x15cd   :  { %5973 = vmatpush3.msra.mxu1 %v6765_v53 }
0x15ce   :  { %5974 = vmatprep.subr.mxu1 %v6926_v33 }
0x15cf   :  { %5975 = vmatpush3.msra.mxu1 %v6766_v47 }
0x15d0   :  { %5976 = vmatprep.subr.mxu1 %v6926_v33 }
0x15d1   :  { %5977 = vmatpush3.msra.mxu1 %v6767_v22 }
0x15d2   :  { %5989 = vmatprep.subr.mxu1 %v6926_v33 }
0x168a   :  { %v4111_v58 = vpop.f32.mrf.mxu1 }
0x168b   :  { %v4116_v55 = vrot.slane %v4111_v58, 3  ;;  %v4117_v21 = vrot.slane %v4111_v58, 4  ;;  %v4118_v17 = vrot.slane %v4111_v58, 5  ;;  %v4119_v3 = vrot.slane %v4111_v58, 6 }
0x168c   :  { %v5958_v46 = vpop.f32.mrf.mxu1  ;;  %v4120_v7 = vrot.slane %v4111_v58, 7  ;;  %v4121_v0 = vrot.slane %v4111_v58, 1  ;;  %v4122_v34 = vrot.slane %v4111_v58, 2  ;;  %v4136_v5 = vadd.f32 %v4111_v58, %v7841_v15 }
0x168d   :  { %v4131_v2 = vadd.f32 %v4116_v55, %v7830_v50  ;;  %v4132_v31 = vadd.f32 %v4117_v21, %v7832_v19  ;;  %v4133_v27 = vadd.f32 %v4118_v17, %v7836_v24  ;;  %v4134_v60 = vadd.f32 %v4119_v3, %v7839_v23 }
0x168e   :  { %v4135_v30 = vadd.f32 %v4120_v7, %v7845_v36  ;;  %v4137_v4 = vadd.f32 %v4121_v0, %v7851_v18  ;;  %v4138_v41 = vadd.f32 %v4122_v34, %v7847_v56  ;;  %v5557_v48 = vmul.f32 -1.442695, %v4136_v5 }
0x168f   :  { %6552 = vtanh.f32 %v4131_v2  ;;  %v5552_v40 = vmul.f32 -1.442695, %v4131_v2  ;;  %v5553_v35 = vmul.f32 -1.442695, %v4132_v31  ;;  %v5554_v49 = vmul.f32 -1.442695, %v4133_v27 }
0x1690   :  { %6554 = vtanh.f32 %v4132_v31  ;;  %v5555_v37 = vmul.f32 -1.442695, %v4134_v60  ;;  %v5556_v39 = vmul.f32 -1.442695, %v4135_v30  ;;  %v5558_v29 = vmul.f32 -1.442695, %v4137_v4 }
0x1691   :  { %6556 = vtanh.f32 %v4133_v27  ;;  %v5559_v13 = vmul.f32 -1.442695, %v4138_v41 }
0x1692   :  { %6558 = vtanh.f32 %v4134_v60 }
0x1693   :  { %6560 = vtanh.f32 %v4135_v30 }
0x1694   :  { %6562 = vtanh.f32 %v4137_v4 }
0x1695   :  { %6564 = vtanh.f32 %v4136_v5 }
0x1696   :  { %6566 = vtanh.f32 %v4138_v41 }
0x1697   :  { %6568 = vpow2.f32 %v5552_v40 }
0x1698   :  { %6570 = vpow2.f32 %v5553_v35 }
0x1699   :  { %6572 = vpow2.f32 %v5554_v49  ;;  %v4203_v49 = vrot.slane %v8400_v11, 7 }
0x169a   :  { %6574 = vpow2.f32 %v5555_v37 }
0x169b   :  { %6576 = vpow2.f32 %v5556_v39 }
0x169c   :  { %v6553_v43 = vpop.eup %6552  ;;  %6578 = vpow2.f32 %v5558_v29  ;;  %v4204_v29 = vrot.slane %v8421_v38, 7 }
0x169d   :  { %4235 = vrot.lane.b32.xlu0 %v6553_v43, %s6919_s21  ;;  %v6555_v26 = vpop.eup %6554  ;;  %6580 = vpow2.f32 %v5557_v48  ;;  %v4205_v48 = vrot.slane %v8408_v42, 7 }
0x169e   :  { %v6557_v57 = vpop.eup %6556  ;;  %4237 = vrot.lane.b32.xlu1 %v6555_v26, %s6919_s21 }
0x169f   :  { %v6559_v52 = vpop.eup %6558 }
0x16a0   :  { %v6561_v6 = vpop.eup %6560 }
0x16a1   :  { %4239 = vrot.lane.b32.xlu0 %v6557_v57, %s6919_s21  ;;  %v6563_v51 = vpop.eup %6562 }
0x16a2   :  { %4241 = vrot.lane.b32.xlu1 %v6559_v52, %s6919_s21  ;;  %v6565_v1 = vpop.eup %6564 }
0x16a3   :  { %v6567_v32 = vpop.eup %6566 }
0x16a4   :  { %v6569_v20 = vpop.eup %6568 }
0x16a5   :  { %4243 = vrot.lane.b32.xlu0 %v6561_v6, %s6919_s21  ;;  %v4163_v45 = vadd.f32 1.0, %v6569_v20  ;;  %v6571_v44 = vpop.eup %6570 }
0x16a6   :  { %4247 = vrot.lane.b32.xlu1 %v6563_v51, %s6919_s21  ;;  %v6573_v62 = vpop.eup %6572  ;;  %v4164_v8 = vadd.f32 1.0, %v6571_v44 }
0x16a7   :  { %6582 = vrcp.f32 %v4163_v45  ;;  %v6575_v16 = vpop.eup %6574  ;;  %v4165_v59 = vadd.f32 1.0, %v6573_v62  ;;  %v4206_v62 = vrot.slane %v8431_v25, 7 }
0x16a8   :  { %6584 = vpow2.f32 %v5559_v13  ;;  %v6577_v14 = vpop.eup %6576  ;;  %v4166_v28 = vadd.f32 1.0, %v6575_v16  ;;  %v4207_v16 = vrot.slane %v8411_v61, 7 }
0x16a9   :  { %4245 = vrot.lane.b32.xlu0 %v6565_v1, %s6919_s21  ;;  %6586 = vrcp.f32 %v4164_v8  ;;  %v6579_v10 = vpop.eup %6578  ;;  %v4167_v53 = vadd.f32 1.0, %v6577_v14 }
0x16aa   :  { %4249 = vrot.lane.b32.xlu1 %v6567_v32, %s6919_s21  ;;  %6588 = vrcp.f32 %v4165_v59  ;;  %v6581_v47 = vpop.eup %6580  ;;  %v4169_v58 = vadd.f32 1.0, %v6579_v10 }
0x16ab   :  { %6590 = vrcp.f32 %v4166_v28  ;;  %v4168_v2 = vadd.f32 1.0, %v6581_v47  ;;  %v4209_v28 = vrot.slane %v8428_v54, 7  ;;  %v4210_v54 = vrot.slane %v8436_v63, 7 }
0x16ac   :  { %6592 = vrcp.f32 %v4167_v53  ;;  %v4208_v53 = vrot.slane %v8418_v12, 7 }
0x16ad   :  { %6594 = vrcp.f32 %v4169_v58 }
0x16ae   :  { %6596 = vrcp.f32 %v4168_v2 }
0x16b4   :  { %v8497_v22 = vpop.eup %6582 }
0x16b5   :  { %v6585_v46 = vpop.eup %6584  ;;  %v4219_v37 = vmul.f32 %v8497_v22, %v4203_v49 }
0x16b6   :  { %v4170_v17 = vadd.f32 1.0, %v6585_v46  ;;  %v8501_v3 = vpop.eup %6586 }
0x16b7   :  { %v8503_v7 = vpop.eup %6588  ;;  %v4220_v45 = vmul.f32 %v8501_v3, %v4204_v29 }
0x16b8   :  { %6598 = vrcp.f32 %v4170_v17  ;;  %v8508_v30 = vpop.eup %6590  ;;  %v4221_v44 = vmul.f32 %v8503_v7, %v4205_v48 }
0x16b9   :  { %v8511_v34 = vpop.eup %6592  ;;  %v4222_v38 = vmul.f32 %v8508_v30, %v4206_v62 }
0x16ba   :  { %v8516_v26 = vpop.eup %6594  ;;  %v4223_v42 = vmul.f32 %v8511_v34, %v4207_v16 }
0x16bb   :  { %v8519_v52 = vpop.eup %6596  ;;  %v4225_v58 = vmul.f32 %v8516_v26, %v4209_v28 }
0x16bc   :  { %v4224_v46 = vmul.f32 %v8519_v52, %v4208_v53 }
0x16c5   :  { %v8524_v32 = vpop.eup %6598 }
0x16c6   :  { %v4226_v17 = vmul.f32 %v8524_v32, %v4210_v54 }
0x170f   :  { %v4236_v55 = vpop.permute.xlu0 %4235 }
0x1710   :  { %v4259_v21 = vmul.f32 %v8497_v22, %v4236_v55  ;;  %v4238_v31 = vpop.permute.xlu1 %4237 }
0x1711   :  { %v4260_v27 = vmul.f32 %v8501_v3, %v4238_v31 }
0x1712   :  { %4275 = vrot.lane.b32.xlu0 %v4259_v21, %s6928_s9 }
0x1713   :  { %v4240_v0 = vpop.permute.xlu0 %4239  ;;  %4277 = vrot.lane.b32.xlu1 %v4260_v27, %s6928_s9 }
0x1714   :  { %v4261_v60 = vmul.f32 %v8503_v7, %v4240_v0  ;;  %v4242_v43 = vpop.permute.xlu1 %4241 }
0x1715   :  { %v4262_v4 = vmul.f32 %v8508_v30, %v4242_v43 }
0x1716   :  { %4279 = vrot.lane.b32.xlu0 %v4261_v60, %s6928_s9 }
0x1717   :  { %v4244_v5 = vpop.permute.xlu0 %4243  ;;  %4281 = vrot.lane.b32.xlu1 %v4262_v4, %s6928_s9 }
0x1718   :  { %v4263_v41 = vmul.f32 %v8511_v34, %v4244_v5  ;;  %v4248_v57 = vpop.permute.xlu1 %4247 }
0x1719   :  { %v4265_v6 = vmul.f32 %v8516_v26, %v4248_v57 }
0x171a   :  { %4283 = vrot.lane.b32.xlu0 %v4263_v41, %s6928_s9 }
0x171b   :  { %v4246_v51 = vpop.permute.xlu0 %4245  ;;  %4287 = vrot.lane.b32.xlu1 %v4265_v6, %s6928_s9 }
0x171c   :  { %v4264_v1 = vmul.f32 %v8519_v52, %v4246_v51  ;;  %v4250_v40 = vpop.permute.xlu1 %4249 }
0x171d   :  { %v4266_v35 = vmul.f32 %v8524_v32, %v4250_v40 }
0x171e   :  { %4285 = vrot.lane.b32.xlu0 %v4264_v1, %s6928_s9 }
0x171f   :  { %4289 = vrot.lane.b32.xlu1 %v4266_v35, %s6928_s9 }
0x1784   :  { %v4276_v39 = vpop.permute.xlu0 %4275 }
0x1785   :  { %v8531_v20 = vadd.f32 %v4276_v39, %v4219_v37  ;;  %v4278_v13 = vpop.permute.xlu1 %4277 }
0x1786   :  { %v8539_v8 = vadd.f32 %v4278_v13, %v4220_v45 }
0x1787   :  { %6600 = vtanh.f32 %v8531_v20 }
0x1788   :  { %v4280_v11 = vpop.permute.xlu0 %4279  ;;  %6602 = vtanh.f32 %v8539_v8 }
0x1789   :  { %v8542_v59 = vadd.f32 %v4280_v11, %v4221_v44  ;;  %v4282_v14 = vpop.permute.xlu1 %4281 }
0x178a   :  { %v8549_v10 = vadd.f32 %v4282_v14, %v4222_v38 }
0x178b   :  { %6604 = vtanh.f32 %v8542_v59 }
0x178c   :  { %v4284_v25 = vpop.permute.xlu0 %4283  ;;  %6606 = vtanh.f32 %v8549_v10 }
0x178d   :  { %v8552_v47 = vadd.f32 %v4284_v25, %v4223_v42  ;;  %v4288_v55 = vpop.permute.xlu1 %4287 }
0x178e   :  { %v8560_v2 = vadd.f32 %v4288_v55, %v4225_v58 }
0x178f   :  { %6608 = vtanh.f32 %v8552_v47 }
0x1790   :  { %v4286_v21 = vpop.permute.xlu0 %4285  ;;  %6610 = vtanh.f32 %v8560_v2 }
0x1791   :  { %v8562_v12 = vadd.f32 %v4286_v21, %v4224_v46  ;;  %v4290_v31 = vpop.permute.xlu1 %4289  ;;  %v6055_v46 = vld [vmem:[#allocation13] sm:$0xff]  }
0x1792   :  { %v8567_v27 = vadd.f32 %v4290_v31, %v4226_v17 }
0x1793   :  { %6612 = vtanh.f32 %v8562_v12 }
0x1794   :  { %v6601_v61 = vpop.eup %6600  ;;  %6614 = vtanh.f32 %v8567_v27 }
0x1795   :  { %4323 = vrot.lane.b32.xlu0 %v6601_v61, %s6919_s21  ;;  %v6603_v0 = vpop.eup %6602 }
0x1796   :  { %4325 = vrot.lane.b32.xlu1 %v6603_v0, %s6919_s21 }
0x1798   :  { %v6605_v60 = vpop.eup %6604 }
0x1799   :  { %4327 = vrot.lane.b32.xlu0 %v6605_v60, %s6919_s21  ;;  %v6607_v63 = vpop.eup %6606 }
0x179a   :  { %4329 = vrot.lane.b32.xlu1 %v6607_v63, %s6919_s21 }
0x179c   :  { %v6609_v43 = vpop.eup %6608 }
0x179d   :  { %4331 = vrot.lane.b32.xlu0 %v6609_v43, %s6919_s21  ;;  %v6611_v4 = vpop.eup %6610 }
0x179e   :  { %4335 = vrot.lane.b32.xlu1 %v6611_v4, %s6919_s21 }
0x17a0   :  { %v6613_v5 = vpop.eup %6612 }
0x17a1   :  { %4333 = vrot.lane.b32.xlu0 %v6613_v5, %s6919_s21  ;;  %v6615_v41 = vpop.eup %6614 }
0x17a2   :  { %4337 = vrot.lane.b32.xlu1 %v6615_v41, %s6919_s21 }
0x1807   :  { %v4324_v57 = vpop.permute.xlu0 %4323 }
0x1808   :  { %v4347_v6 = vmul.f32 %v8497_v22, %v4324_v57  ;;  %v4326_v51 = vpop.permute.xlu1 %4325 }
0x1809   :  { %v4348_v1 = vmul.f32 %v8501_v3, %v4326_v51 }
0x180a   :  { %v4363_v40 = vrot.slane %v4347_v6, 5 }
0x180b   :  { %v4328_v35 = vpop.permute.xlu0 %4327  ;;  %v4364_v37 = vrot.slane %v4348_v1, 4 }
0x180c   :  { %v4349_v49 = vmul.f32 %v8503_v7, %v4328_v35  ;;  %v4330_v39 = vpop.permute.xlu1 %4329 }
0x180d   :  { %v4365_v48 = vsel %vm2677_vm5, %v4364_v37, %v4363_v40  ;;  %v4350_v45 = vmul.f32 %v8508_v30, %v4330_v39 }
0x180e   :  { %v4366_v29 = vrot.slane %v4349_v49, 3 }
0x180f   :  { %v4332_v13 = vpop.permute.xlu0 %4331  ;;  %v4368_v22 = vrot.slane %v4350_v45, 2 }
0x1810   :  { %v4367_v44 = vsel %vm2680_vm6, %v4366_v29, %v4365_v48  ;;  %v4351_v62 = vmul.f32 %v8511_v34, %v4332_v13  ;;  %v4336_v11 = vpop.permute.xlu1 %4335 }
0x1811   :  { %v4353_v3 = vmul.f32 %v8516_v26, %v4336_v11  ;;  %v4369_v38 = vsel %vm2683_vm7, %v4368_v22, %v4367_v44  ;;  %v6054_v26 = vld [vmem:[#allocation13 + $0x8] sm:$0xff]  }
0x1812   :  { %v4370_v16 = vrot.slane %v4351_v62, 1 }
0x1813   :  { %v4334_v7 = vpop.permute.xlu0 %4333  ;;  %v4373_v28 = vrot.slane %v4353_v3, 7 }
0x1814   :  { %v4371_v14 = vsel %vm2686_vm8, %v4370_v16, %v4369_v38  ;;  %v4352_v42 = vmul.f32 %v8519_v52, %v4334_v7  ;;  %v4338_v25 = vpop.permute.xlu1 %4337  ;;  %v5076_v52 = vpack.c.b16 %v7814_v9, %v7814_v9 }
0x1815   :  { %v4354_v53 = vmul.f32 %v8524_v32, %v4338_v25 }
0x1816   :  { %v4372_v30 = vsel %vm2689_vm9, %v4352_v42, %v4371_v14 }
0x1817   :  { %v4374_v34 = vsel %vm2692_vm10, %v4373_v28, %v4372_v30  ;;  %v4375_v61 = vrot.slane %v4354_v53, 6 }
0x1819   :  { %v4376_v58 = vsel %vm2695_vm11, %v4375_v61, %v4374_v34 }
0x181a   :  { %4377 = vrot.lane.b32.xlu0 %v4376_v58, %s6928_s9 }
0x188c   :  { %v4378_v55 = vpop.permute.xlu0 %4377 }
0x188d   :  { %5968 = vmatmul.mubr.msk.f32.vlgmr.msra.gmra.mxu0 %vm255_vm1, %v4378_v55 }
0x188e   :  { %5982 = vmatpush3.bf16.msra.mxu0 %v6054_v26  ;;  %5985 = vmatprep.mubr.msk.bf16.mxu0 %vm6927_vm4, %v6926_v33 }
0x188f   :  { %5983 = vmatprep.subr.bf16.mxu0 %v6926_v33 }
0x1892   :  { %5984 = vmatpush3.bf16.msra.mxu0 %v6055_v46 }
0x1893   :  { %6000 = vmatprep.subr.mxu0 %v6926_v33 }
0x1895   :  { %5986 = vmatmul.mubr.msk.bf16.vlgmr.msra.gmra.mxu0 %vm255_vm1, %v5076_v52 }
0x1896   :  { %6008 = vmatprep.mubr.msk.f32.mxu0 %vm6927_vm4, %v6926_v33 }
0x194d   :  { %v4447_v32 = vpop.f32.mrf.mxu0 }
0x194e   :  { %v4452_v54 = vrot.slane %v4447_v32, 2  ;;  %v4453_v31 = vrot.slane %v4447_v32, 3  ;;  %v4454_v0 = vrot.slane %v4447_v32, 4  ;;  %v4455_v63 = vrot.slane %v4447_v32, 5 }
0x194f   :  { %v5969_v21 = vpop.f32.mrf.mxu0  ;;  %v4456_v4 = vrot.slane %v4447_v32, 6  ;;  %v4457_v57 = vrot.slane %v4447_v32, 7  ;;  %v4458_v1 = vrot.slane %v4447_v32, 1  ;;  %v4473_v39 = vadd.f32 %v4447_v32, %v7851_v18 }
0x1950   :  { %v4467_v17 = vadd.f32 %v4452_v54, %v7830_v50  ;;  %v4468_v9 = vadd.f32 %v4453_v31, %v7832_v19  ;;  %v4469_v5 = vadd.f32 %v4454_v0, %v7836_v24  ;;  %v4470_v6 = vadd.f32 %v4455_v63, %v7839_v23 }
0x1951   :  { %v4471_v40 = vadd.f32 %v4456_v4, %v7845_v36  ;;  %v4472_v49 = vadd.f32 %v4457_v57, %v7841_v15  ;;  %v4474_v37 = vadd.f32 %v4458_v1, %v7847_v56  ;;  %v5567_v30 = vmul.f32 -1.442695, %v4473_v39 }
0x1952   :  { %6616 = vtanh.f32 %v4467_v17  ;;  %v5561_v11 = vmul.f32 -1.442695, %v4467_v17  ;;  %v5562_v16 = vmul.f32 -1.442695, %v4468_v9  ;;  %v5563_v3 = vmul.f32 -1.442695, %v4469_v5 }
0x1953   :  { %6618 = vtanh.f32 %v4468_v9  ;;  %v5564_v38 = vmul.f32 -1.442695, %v4470_v6  ;;  %v5565_v7 = vmul.f32 -1.442695, %v4471_v40  ;;  %v5566_v42 = vmul.f32 -1.442695, %v4472_v49 }
0x1954   :  { %6620 = vtanh.f32 %v4469_v5  ;;  %v5568_v28 = vmul.f32 -1.442695, %v4474_v37 }
0x1955   :  { %v8604_v60 = vpop.f32.mrf.mxu0  ;;  %6622 = vtanh.f32 %v4470_v6 }
0x1956   :  { %6624 = vtanh.f32 %v4471_v40 }
0x1957   :  { %v5987_v43 = vpop.f32.mrf.mxu0  ;;  %6626 = vtanh.f32 %v4472_v49 }
0x1958   :  { %6628 = vtanh.f32 %v4474_v37 }
0x1959   :  { %v5129_v41 = vpop.f32.mrf.mxu0  ;;  %6630 = vtanh.f32 %v4473_v39 }
0x195a   :  { %6632 = vpow2.f32 %v5561_v11 }
0x195b   :  { %v5988_v51 = vpop.f32.mrf.mxu0  ;;  %6634 = vpow2.f32 %v5562_v16 }
0x195c   :  { %6636 = vpow2.f32 %v5563_v3  ;;  %v4539_v3 = vrot.slane %v8531_v20, 7 }
0x195d   :  { %6638 = vpow2.f32 %v5564_v38 }
0x195e   :  { %6640 = vpow2.f32 %v5565_v7 }
0x195f   :  { %v6617_v35 = vpop.eup %6616  ;;  %6642 = vpow2.f32 %v5566_v42  ;;  %v4540_v42 = vrot.slane %v8539_v8, 7 }
0x1960   :  { %4571 = vrot.lane.b32.xlu1 %v6617_v35, %s6919_s21  ;;  %v6619_v29 = vpop.eup %6618  ;;  %6644 = vpow2.f32 %v5568_v28  ;;  %v4541_v28 = vrot.slane %v8542_v59, 7 }
0x1961   :  { %v6621_v48 = vpop.eup %6620  ;;  %4573 = vrot.lane.b32.xlu0 %v6619_v29, %s6919_s21 }
0x1962   :  { %v6623_v45 = vpop.eup %6622 }
0x1963   :  { %v6625_v13 = vpop.eup %6624 }
0x1964   :  { %4575 = vrot.lane.b32.xlu1 %v6621_v48, %s6919_s21  ;;  %v6627_v44 = vpop.eup %6626 }
0x1965   :  { %4577 = vrot.lane.b32.xlu0 %v6623_v45, %s6919_s21  ;;  %v6629_v62 = vpop.eup %6628 }
0x1966   :  { %v6631_v22 = vpop.eup %6630 }
0x1967   :  { %v6633_v14 = vpop.eup %6632 }
0x1968   :  { %4579 = vrot.lane.b32.xlu1 %v6625_v13, %s6919_s21  ;;  %v4499_v25 = vadd.f32 1.0, %v6633_v14  ;;  %v6635_v53 = vpop.eup %6634 }
0x1969   :  { %4581 = vrot.lane.b32.xlu0 %v6627_v44, %s6919_s21  ;;  %v6637_v34 = vpop.eup %6636  ;;  %v4500_v61 = vadd.f32 1.0, %v6635_v53 }
0x196a   :  { %6646 = vrcp.f32 %v4499_v25  ;;  %v6639_v58 = vpop.eup %6638  ;;  %v4501_v26 = vadd.f32 1.0, %v6637_v34  ;;  %v4542_v34 = vrot.slane %v8549_v10, 7 }
0x196b   :  { %6648 = vpow2.f32 %v5567_v30  ;;  %v6641_v55 = vpop.eup %6640  ;;  %v4502_v46 = vadd.f32 1.0, %v6639_v58  ;;  %v4543_v58 = vrot.slane %v8552_v47, 7 }
0x196c   :  { %4585 = vrot.lane.b32.xlu1 %v6629_v62, %s6919_s21  ;;  %6650 = vrcp.f32 %v4500_v61  ;;  %v6643_v52 = vpop.eup %6642  ;;  %v4503_v32 = vadd.f32 1.0, %v6641_v55 }
0x196d   :  { %4583 = vrot.lane.b32.xlu0 %v6631_v22, %s6919_s21  ;;  %6652 = vrcp.f32 %v4501_v26  ;;  %v6645_v54 = vpop.eup %6644  ;;  %v4504_v17 = vadd.f32 1.0, %v6643_v52 }
0x196e   :  { %6654 = vrcp.f32 %v4502_v46  ;;  %v4506_v63 = vadd.f32 1.0, %v6645_v54  ;;  %v4544_v46 = vrot.slane %v8562_v12, 7  ;;  %v4545_v12 = vrot.slane %v8560_v2, 7 }
0x196f   :  { %6656 = vrcp.f32 %v4503_v32  ;;  %v4546_v32 = vrot.slane %v8567_v27, 7 }
0x1970   :  { %6658 = vrcp.f32 %v4504_v17 }
0x1971   :  { %6660 = vrcp.f32 %v4506_v63 }
0x1977   :  { %v8621_v21 = vpop.eup %6646 }
0x1978   :  { %v6649_v0 = vpop.eup %6648  ;;  %v4555_v38 = vmul.f32 %v8621_v21, %v4539_v3 }
0x1979   :  { %v4505_v43 = vadd.f32 1.0, %v6649_v0  ;;  %v8625_v4 = vpop.eup %6650 }
0x197a   :  { %v8627_v41 = vpop.eup %6652  ;;  %v4556_v25 = vmul.f32 %v8625_v4, %v4540_v42 }
0x197b   :  { %6662 = vrcp.f32 %v4505_v43  ;;  %v8632_v1 = vpop.eup %6654  ;;  %v4557_v53 = vmul.f32 %v8627_v41, %v4541_v28 }
0x197c   :  { %v8635_v35 = vpop.eup %6656  ;;  %v4558_v8 = vmul.f32 %v8632_v1, %v4542_v34 }
0x197d   :  { %v8640_v29 = vpop.eup %6658  ;;  %v4559_v59 = vmul.f32 %v8635_v35, %v4543_v58 }
0x197e   :  { %v8643_v45 = vpop.eup %6660  ;;  %v4560_v17 = vmul.f32 %v8640_v29, %v4544_v46 }
0x197f   :  { %v4562_v0 = vmul.f32 %v8643_v45, %v4546_v32 }
0x1988   :  { %v8648_v22 = vpop.eup %6662 }
0x1989   :  { %v4561_v43 = vmul.f32 %v8648_v22, %v4545_v12 }
0x19d2   :  { %v4572_v31 = vpop.permute.xlu1 %4571 }
0x19d3   :  { %v4595_v9 = vmul.f32 %v8621_v21, %v4572_v31  ;;  %v4574_v5 = vpop.permute.xlu0 %4573 }
0x19d4   :  { %v4596_v57 = vmul.f32 %v8625_v4, %v4574_v5 }
0x19d5   :  { %4611 = vrot.lane.b32.xlu1 %v4595_v9, %s6928_s9 }
0x19d6   :  { %v4576_v6 = vpop.permute.xlu1 %4575  ;;  %4613 = vrot.lane.b32.xlu0 %v4596_v57, %s6928_s9 }
0x19d7   :  { %v4597_v51 = vmul.f32 %v8627_v41, %v4576_v6  ;;  %v4578_v40 = vpop.permute.xlu0 %4577 }
0x19d8   :  { %v4598_v49 = vmul.f32 %v8632_v1, %v4578_v40 }
0x19d9   :  { %4615 = vrot.lane.b32.xlu1 %v4597_v51, %s6928_s9 }
0x19da   :  { %v4580_v37 = vpop.permute.xlu1 %4579  ;;  %4617 = vrot.lane.b32.xlu0 %v4598_v49, %s6928_s9 }
0x19db   :  { %v4599_v39 = vmul.f32 %v8635_v35, %v4580_v37  ;;  %v4582_v48 = vpop.permute.xlu0 %4581 }
0x19dc   :  { %v4600_v13 = vmul.f32 %v8640_v29, %v4582_v48 }
0x19dd   :  { %4619 = vrot.lane.b32.xlu1 %v4599_v39, %s6928_s9 }
0x19de   :  { %v4586_v44 = vpop.permute.xlu1 %4585  ;;  %4621 = vrot.lane.b32.xlu0 %v4600_v13, %s6928_s9 }
0x19df   :  { %v4602_v62 = vmul.f32 %v8643_v45, %v4586_v44  ;;  %v4584_v11 = vpop.permute.xlu0 %4583 }
0x19e0   :  { %v4601_v16 = vmul.f32 %v8648_v22, %v4584_v11 }
0x19e1   :  { %4625 = vrot.lane.b32.xlu1 %v4602_v62, %s6928_s9 }
0x19e2   :  { %4623 = vrot.lane.b32.xlu0 %v4601_v16, %s6928_s9 }
0x1a47   :  { %v4612_v7 = vpop.permute.xlu1 %4611 }
0x1a48   :  { %v8655_v14 = vadd.f32 %v4612_v7, %v4555_v38  ;;  %v4614_v30 = vpop.permute.xlu0 %4613 }
0x1a49   :  { %v8663_v61 = vadd.f32 %v4614_v30, %v4556_v25 }
0x1a4a   :  { %6664 = vtanh.f32 %v8655_v14 }
0x1a4b   :  { %v4616_v20 = vpop.permute.xlu1 %4615  ;;  %6666 = vtanh.f32 %v8663_v61 }
0x1a4c   :  { %v8666_v26 = vadd.f32 %v4616_v20, %v4557_v53  ;;  %v4618_v55 = vpop.permute.xlu0 %4617 }
0x1a4d   :  { %v8673_v52 = vadd.f32 %v4618_v55, %v4558_v8 }
0x1a4e   :  { %6668 = vtanh.f32 %v8666_v26 }
0x1a4f   :  { %v4620_v10 = vpop.permute.xlu1 %4619  ;;  %6670 = vtanh.f32 %v8673_v52 }
0x1a50   :  { %v8676_v54 = vadd.f32 %v4620_v10, %v4559_v59  ;;  %v4622_v31 = vpop.permute.xlu0 %4621 }
0x1a51   :  { %v8684_v63 = vadd.f32 %v4622_v31, %v4560_v17 }
0x1a52   :  { %6672 = vtanh.f32 %v8676_v54 }
0x1a53   :  { %v4626_v9 = vpop.permute.xlu1 %4625  ;;  %6674 = vtanh.f32 %v8684_v63 }
0x1a54   :  { %v8686_v27 = vadd.f32 %v4626_v9, %v4562_v0  ;;  %v4624_v5 = vpop.permute.xlu0 %4623 }
0x1a55   :  { %v8691_v57 = vadd.f32 %v4624_v5, %v4561_v43 }
0x1a56   :  { %6676 = vtanh.f32 %v8686_v27 }
0x1a57   :  { %v6665_v47 = vpop.eup %6664  ;;  %6678 = vtanh.f32 %v8691_v57 }
0x1a58   :  { %4659 = vrot.lane.b32.xlu1 %v6665_v47, %s6919_s21  ;;  %v6667_v6 = vpop.eup %6666 }
0x1a59   :  { %4661 = vrot.lane.b32.xlu0 %v6667_v6, %s6919_s21 }
0x1a5b   :  { %v6669_v51 = vpop.eup %6668 }
0x1a5c   :  { %4663 = vrot.lane.b32.xlu1 %v6669_v51, %s6919_s21  ;;  %v6671_v2 = vpop.eup %6670 }
0x1a5d   :  { %4665 = vrot.lane.b32.xlu0 %v6671_v2, %s6919_s21 }
0x1a5f   :  { %v6673_v40 = vpop.eup %6672 }
0x1a60   :  { %4667 = vrot.lane.b32.xlu1 %v6673_v40, %s6919_s21  ;;  %v6675_v49 = vpop.eup %6674 }
0x1a61   :  { %4669 = vrot.lane.b32.xlu0 %v6675_v49, %s6919_s21 }
0x1a63   :  { %v6677_v37 = vpop.eup %6676 }
0x1a64   :  { %4673 = vrot.lane.b32.xlu1 %v6677_v37, %s6919_s21  ;;  %v6679_v39 = vpop.eup %6678 }
0x1a65   :  { %4671 = vrot.lane.b32.xlu0 %v6679_v39, %s6919_s21 }
0x1aca   :  { %v4660_v48 = vpop.permute.xlu1 %4659 }
0x1acb   :  { %v4683_v13 = vmul.f32 %v8621_v21, %v4660_v48  ;;  %v4662_v44 = vpop.permute.xlu0 %4661 }
0x1acc   :  { %v4684_v62 = vmul.f32 %v8625_v4, %v4662_v44 }
0x1acd   :  { %v4699_v11 = vrot.slane %v4683_v13, 6 }
0x1ace   :  { %v4664_v16 = vpop.permute.xlu1 %4663  ;;  %v4700_v38 = vrot.slane %v4684_v62, 5 }
0x1acf   :  { %v4685_v3 = vmul.f32 %v8627_v41, %v4664_v16  ;;  %v4666_v7 = vpop.permute.xlu0 %4665 }
0x1ad0   :  { %v4701_v28 = vsel %vm2677_vm5, %v4700_v38, %v4699_v11  ;;  %v4686_v25 = vmul.f32 %v8632_v1, %v4666_v7 }
0x1ad1   :  { %v4702_v42 = vrot.slane %v4685_v3, 4 }
0x1ad2   :  { %v4668_v30 = vpop.permute.xlu1 %4667  ;;  %v4704_v21 = vrot.slane %v4686_v25, 3 }
0x1ad3   :  { %v4703_v53 = vsel %vm2680_vm6, %v4702_v42, %v4701_v28  ;;  %v4687_v34 = vmul.f32 %v8635_v35, %v4668_v30  ;;  %v4670_v20 = vpop.permute.xlu0 %4669 }
0x1ad4   :  { %v4688_v4 = vmul.f32 %v8640_v29, %v4670_v20  ;;  %v4705_v8 = vsel %vm2683_vm7, %v4704_v21, %v4703_v53 }
0x1ad5   :  { %v4706_v58 = vrot.slane %v4687_v34, 2 }
0x1ad6   :  { %v4674_v41 = vpop.permute.xlu1 %4673  ;;  %v4708_v46 = vrot.slane %v4688_v4, 1 }
0x1ad7   :  { %v4707_v55 = vsel %vm2686_vm8, %v4706_v58, %v4705_v8  ;;  %v4690_v59 = vmul.f32 %v8643_v45, %v4674_v41  ;;  %v4672_v10 = vpop.permute.xlu0 %4671 }
0x1ad8   :  { %v4689_v32 = vmul.f32 %v8648_v22, %v4672_v10  ;;  %v4709_v47 = vsel %vm2689_vm9, %v4708_v46, %v4707_v55 }
0x1ad9   :  { %v4711_v1 = vrot.slane %v4690_v59, 7 }
0x1ada   :  { %v4710_v35 = vsel %vm2692_vm10, %v4689_v32, %v4709_v47 }
0x1adb   :  { %v4712_v17 = vsel %vm2695_vm11, %v4711_v1, %v4710_v35  ;;  %v5578_v35 = vld [vmem:[%s8877_s12] ss:$0 sm:$0xff] }
0x1adc   :  { %4713 = vrot.lane.b32.xlu1 %v4712_v17, %s6928_s9 }
0x1b4e   :  { %v4714_v29 = vpop.permute.xlu1 %4713 }
0x1b4f   :  { %5979 = vmatmul.mubr.msk.f32.vlgmr.msra.gmra.mxu1 %vm255_vm1, %v4714_v29  ;;  %v5127_v29 = vadd.f32 %v5578_v35, %v8604_v60 }
0x1b50   :  { %5997 = vmatprep.mubr.msk.f32.mxu1 %vm6927_vm4, %v6926_v33 }
0x1c0f   :  { %v4783_v45 = vpop.f32.mrf.mxu1 }
0x1c10   :  { %v4788_v31 = vrot.slane %v4783_v45, 1  ;;  %v4789_v22 = vrot.slane %v4783_v45, 2  ;;  %v4790_v9 = vrot.slane %v4783_v45, 3  ;;  %v4791_v43 = vrot.slane %v4783_v45, 4 }
0x1c11   :  { %v5980_v0 = vpop.f32.mrf.mxu1  ;;  %v4792_v6 = vrot.slane %v4783_v45, 5  ;;  %v4793_v2 = vrot.slane %v4783_v45, 6  ;;  %v4794_v49 = vrot.slane %v4783_v45, 7 }
0x1c12   :  { %v4803_v12 = vadd.f32 %v4788_v31, %v7830_v50  ;;  %v4804_v5 = vadd.f32 %v4789_v22, %v7832_v19  ;;  %v4805_v51 = vadd.f32 %v4790_v9, %v7836_v24  ;;  %v4806_v40 = vadd.f32 %v4791_v43, %v7839_v23 }
0x1c13   :  { %v4807_v37 = vadd.f32 %v4792_v6, %v7845_v36  ;;  %v4808_v50 = vadd.f32 %v4793_v2, %v7841_v15  ;;  %v4809_v48 = vadd.f32 %v4794_v49, %v7851_v18  ;;  %v4810_v19 = vadd.f32 %v4783_v45, %v7847_v56 }
0x1c14   :  { %6680 = vtanh.f32 %v4803_v12  ;;  %v5570_v44 = vmul.f32 -1.442695, %v4803_v12  ;;  %v5571_v62 = vmul.f32 -1.442695, %v4804_v5  ;;  %v5572_v11 = vmul.f32 -1.442695, %v4805_v51 }
0x1c15   :  { %6682 = vtanh.f32 %v4804_v5  ;;  %v5573_v16 = vmul.f32 -1.442695, %v4806_v40  ;;  %v5574_v3 = vmul.f32 -1.442695, %v4807_v37  ;;  %v5575_v7 = vmul.f32 -1.442695, %v4808_v50 }
0x1c16   :  { %6684 = vtanh.f32 %v4805_v51  ;;  %v5576_v42 = vmul.f32 -1.442695, %v4809_v48  ;;  %v5577_v25 = vmul.f32 -1.442695, %v4810_v19 }
0x1c17   :  { %6686 = vtanh.f32 %v4806_v40 }
0x1c18   :  { %6688 = vtanh.f32 %v4807_v37 }
0x1c19   :  { %6690 = vtanh.f32 %v4808_v50 }
0x1c1a   :  { %6692 = vtanh.f32 %v4809_v48 }
0x1c1b   :  { %6694 = vtanh.f32 %v4810_v19 }
0x1c1c   :  { %6696 = vpow2.f32 %v5570_v44 }
0x1c1d   :  { %6698 = vpow2.f32 %v5571_v62 }
0x1c1e   :  { %6700 = vpow2.f32 %v5572_v11 }
0x1c1f   :  { %6702 = vpow2.f32 %v5573_v16  ;;  %v4876_v16 = vrot.slane %v8663_v61, 7 }
0x1c20   :  { %6704 = vpow2.f32 %v5574_v3  ;;  %v4877_v3 = vrot.slane %v8666_v26, 7  ;;  %v4880_v26 = vrot.slane %v8684_v63, 7 }
0x1c21   :  { %v6681_v39 = vpop.eup %6680  ;;  %6706 = vpow2.f32 %v5575_v7 }
0x1c22   :  { %4907 = vrot.lane.b32.xlu0 %v6681_v39, %s6919_s21  ;;  %v6683_v24 = vpop.eup %6682  ;;  %6708 = vpow2.f32 %v5576_v42 }
0x1c23   :  { %v6685_v23 = vpop.eup %6684  ;;  %4909 = vrot.lane.b32.xlu1 %v6683_v24, %s6919_s21 }
0x1c24   :  { %v6687_v36 = vpop.eup %6686 }
0x1c25   :  { %v6689_v13 = vpop.eup %6688 }
0x1c26   :  { %4911 = vrot.lane.b32.xlu0 %v6685_v23, %s6919_s21  ;;  %v6691_v15 = vpop.eup %6690 }
0x1c27   :  { %4913 = vrot.lane.b32.xlu1 %v6687_v36, %s6919_s21  ;;  %v6693_v18 = vpop.eup %6692 }
0x1c28   :  { %v6695_v56 = vpop.eup %6694 }
0x1c29   :  { %v6697_v38 = vpop.eup %6696 }
0x1c2a   :  { %4915 = vrot.lane.b32.xlu0 %v6689_v13, %s6919_s21  ;;  %v4835_v28 = vadd.f32 1.0, %v6697_v38  ;;  %v6699_v30 = vpop.eup %6698  ;;  %v5582_v13 = vmul.f32 -1.442695, %v5127_v29 }
0x1c2b   :  { %4917 = vrot.lane.b32.xlu1 %v6691_v15, %s6919_s21  ;;  %v6701_v53 = vpop.eup %6700  ;;  %v4836_v34 = vadd.f32 1.0, %v6699_v30  ;;  %v4875_v15 = vrot.slane %v8655_v14, 7  ;;  %v4879_v30 = vrot.slane %v8676_v54, 7 }
0x1c2c   :  { %6710 = vrcp.f32 %v4835_v28  ;;  %v6703_v21 = vpop.eup %6702  ;;  %v4837_v20 = vadd.f32 1.0, %v6701_v53  ;;  %v4878_v28 = vrot.slane %v8673_v52, 7 }
0x1c2d   :  { %6712 = vpow2.f32 %v5577_v25  ;;  %v6705_v58 = vpop.eup %6704  ;;  %v4838_v4 = vadd.f32 1.0, %v6703_v21 }
0x1c2e   :  { %4919 = vrot.lane.b32.xlu0 %v6693_v18, %s6919_s21  ;;  %6714 = vrcp.f32 %v4836_v34  ;;  %v6707_v8 = vpop.eup %6706  ;;  %v4839_v41 = vadd.f32 1.0, %v6705_v58 }
0x1c2f   :  { %4921 = vrot.lane.b32.xlu1 %v6695_v56, %s6919_s21  ;;  %6716 = vrcp.f32 %v4837_v20  ;;  %v6709_v55 = vpop.eup %6708  ;;  %v4840_v46 = vadd.f32 1.0, %v6707_v8 }
0x1c30   :  { %6718 = vrcp.f32 %v4838_v4  ;;  %v4841_v32 = vadd.f32 1.0, %v6709_v55  ;;  %v4881_v4 = vrot.slane %v8691_v57, 7 }
0x1c31   :  { %6720 = vrcp.f32 %v4839_v41 }
0x1c32   :  { %6722 = vrcp.f32 %v4840_v46  ;;  %v4882_v46 = vrot.slane %v8686_v27, 7  ;;  %v5157_v27 = vld [vmem:[%s8879_s14 + $0x18] sm:$0xff] }
0x1c33   :  { %6724 = vrcp.f32 %v4841_v32  ;;  %5990 = vmatpush3.msra.mxu1 %v5157_v27 }
0x1c34   :  { %5991 = vmatprep.subr.mxu1 %v6926_v33 }
0x1c39   :  { %v8736_v59 = vpop.eup %6710 }
0x1c3a   :  { %v6713_v1 = vpop.eup %6712  ;;  %v4891_v18 = vmul.f32 %v8736_v59, %v4875_v15 }
0x1c3b   :  { %v4842_v17 = vadd.f32 1.0, %v6713_v1  ;;  %v8744_v45 = vpop.eup %6714 }
0x1c3c   :  { %v8746_v0 = vpop.eup %6716  ;;  %v4892_v38 = vmul.f32 %v8744_v45, %v4876_v16 }
0x1c3d   :  { %6726 = vrcp.f32 %v4842_v17  ;;  %v8751_v43 = vpop.eup %6718  ;;  %v4893_v42 = vmul.f32 %v8746_v0, %v4877_v3 }
0x1c3e   :  { %6728 = vtanh.f32 %v5127_v29  ;;  %v8754_v60 = vpop.eup %6720  ;;  %v4894_v34 = vmul.f32 %v8751_v43, %v4878_v28 }
0x1c3f   :  { %v8759_v40 = vpop.eup %6722  ;;  %6730 = vpow2.f32 %v5582_v13  ;;  %v4895_v61 = vmul.f32 %v8754_v60, %v4879_v30 }
0x1c40   :  { %v8762_v37 = vpop.eup %6724  ;;  %v4896_v41 = vmul.f32 %v8759_v40, %v4880_v26 }
0x1c41   :  { %v4897_v55 = vmul.f32 %v8762_v37, %v4881_v4 }
0x1c4a   :  { %v8767_v19 = vpop.eup %6726 }
0x1c4b   :  { %v6729_v36 = vpop.eup %6728  ;;  %v4898_v32 = vmul.f32 %v8767_v19, %v4882_v46 }
0x1c4c   :  { %v6731_v62 = vpop.eup %6730 }
0x1c4d   :  { %v5135_v11 = vadd.f32 1.0, %v6731_v62 }
0x1c94   :  { %v4908_v10 = vpop.permute.xlu0 %4907 }
0x1c95   :  { %v4931_v47 = vmul.f32 %v8736_v59, %v4908_v10  ;;  %v4910_v31 = vpop.permute.xlu1 %4909 }
0x1c96   :  { %v4932_v12 = vmul.f32 %v8744_v45, %v4910_v31 }
0x1c97   :  { %4947 = vrot.lane.b32.xlu0 %v4931_v47, %s6928_s9 }
0x1c98   :  { %v4912_v22 = vpop.permute.xlu0 %4911  ;;  %4949 = vrot.lane.b32.xlu1 %v4932_v12, %s6928_s9 }
0x1c99   :  { %v4933_v9 = vmul.f32 %v8746_v0, %v4912_v22  ;;  %v4914_v5 = vpop.permute.xlu1 %4913  ;;  %v5153_v22 = vld [vmem:[%s8878_s13 + $0x18] sm:$0xff] }
0x1c9a   :  { %v4934_v6 = vmul.f32 %v8751_v43, %v4914_v5  ;;  %6001 = vmatpush3.msra.mxu0 %v5153_v22  ;;  %v5156_v5 = vld [vmem:[%s8879_s14 + $0x10] sm:$0xff] }
0x1c9b   :  { %4951 = vrot.lane.b32.xlu0 %v4933_v9, %s6928_s9  ;;  %6002 = vmatprep.subr.mxu0 %v6926_v33 }
0x1c9c   :  { %v4916_v51 = vpop.permute.xlu0 %4915  ;;  %4953 = vrot.lane.b32.xlu1 %v4934_v6, %s6928_s9  ;;  %v5152_v6 = vld [vmem:[%s8878_s13 + $0x10] sm:$0xff]  ;;  %5992 = vmatpush3.msra.mxu1 %v5156_v5 }
0x1c9d   :  { %v4935_v2 = vmul.f32 %v8754_v60, %v4916_v51  ;;  %v4918_v49 = vpop.permute.xlu1 %4917  ;;  %6003 = vmatpush3.msra.mxu0 %v5152_v6  ;;  %5993 = vmatprep.subr.mxu1 %v6926_v33 }
0x1c9e   :  { %v4936_v39 = vmul.f32 %v8759_v40, %v4918_v49  ;;  %v5151_v49 = vld [vmem:[%s8878_s13 + $0x8] sm:$0xff]  ;;  %6004 = vmatprep.subr.mxu0 %v6926_v33 }
0x1c9f   :  { %4955 = vrot.lane.b32.xlu0 %v4935_v2, %s6928_s9  ;;  %v5155_v2 = vld [vmem:[%s8879_s14 + $0x8] sm:$0xff]  ;;  %6005 = vmatpush3.msra.mxu0 %v5151_v49 }
0x1ca0   :  { %v4920_v50 = vpop.permute.xlu0 %4919  ;;  %4957 = vrot.lane.b32.xlu1 %v4936_v39, %s6928_s9  ;;  %5994 = vmatpush3.msra.mxu1 %v5155_v2 }
0x1ca1   :  { %v4937_v48 = vmul.f32 %v8762_v37, %v4920_v50  ;;  %v4922_v24 = vpop.permute.xlu1 %4921  ;;  %5995 = vmatprep.subr.mxu1 %v6926_v33  ;;  %6006 = vmatprep.subr.mxu0 %v6926_v33 }
0x1ca2   :  { %v4938_v23 = vmul.f32 %v8767_v19, %v4922_v24  ;;  %v5150_v24 = vld [vmem:[%s8878_s13] sm:$0xff] }
0x1ca3   :  { %4959 = vrot.lane.b32.xlu0 %v4937_v48, %s6928_s9  ;;  %v5154_v48 = vld [vmem:[%s8879_s14] sm:$0xff]  ;;  %6007 = vmatpush3.msra.mxu0 %v5150_v24 }
0x1ca4   :  { %4961 = vrot.lane.b32.xlu1 %v4938_v23, %s6928_s9  ;;  %5996 = vmatpush3.msra.mxu1 %v5154_v48 }
0x1ca5   :  { %6011 = vmatprep.subr.mxu1 %v6926_v33 }
0x1ca7   :  { %5140 = vrot.lane.b32.xlu0 %v6729_v36, %s6919_s21 }
0x1d09   :  { %v4948_v56 = vpop.permute.xlu0 %4947 }
0x1d0a   :  { %v4971_v44 = vadd.f32 %v4948_v56, %v4891_v18  ;;  %v4950_v7 = vpop.permute.xlu1 %4949 }
0x1d0b   :  { %v4972_v14 = vadd.f32 %v4950_v7, %v4892_v38 }
0x1d0c   :  { %6732 = vtanh.f32 %v4971_v44 }
0x1d0d   :  { %6734 = vrcp.f32 %v5135_v11  ;;  %v4952_v25 = vpop.permute.xlu0 %4951 }
0x1d0e   :  { %v4973_v53 = vadd.f32 %v4952_v25, %v4893_v42  ;;  %6736 = vtanh.f32 %v4972_v14  ;;  %v4954_v21 = vpop.permute.xlu1 %4953 }
0x1d0f   :  { %v4974_v20 = vadd.f32 %v4954_v21, %v4894_v34 }
0x1d10   :  { %6738 = vtanh.f32 %v4973_v53 }
0x1d11   :  { %v4956_v58 = vpop.permute.xlu0 %4955  ;;  %6740 = vtanh.f32 %v4974_v20 }
0x1d12   :  { %v4975_v8 = vadd.f32 %v4956_v58, %v4895_v61  ;;  %v4958_v54 = vpop.permute.xlu1 %4957 }
0x1d13   :  { %v4976_v10 = vadd.f32 %v4958_v54, %v4896_v41  ;;  %v5336_v54 = vld [vmem:[%s8880_s15] sm:$0xff] }
0x1d14   :  { %6742 = vtanh.f32 %v4975_v8 }
0x1d15   :  { %v4960_v1 = vpop.permute.xlu0 %4959  ;;  %6744 = vtanh.f32 %v4976_v10 }
0x1d16   :  { %v4977_v63 = vadd.f32 %v4960_v1, %v4897_v55  ;;  %v4962_v57 = vpop.permute.xlu1 %4961 }
0x1d17   :  { %v4978_v35 = vadd.f32 %v4962_v57, %v4898_v32 }
0x1d18   :  { %6746 = vtanh.f32 %v4977_v63 }
0x1d19   :  { %v6733_v52 = vpop.eup %6732  ;;  %v5141_v17 = vpop.permute.xlu0 %5140  ;;  %6748 = vtanh.f32 %v4978_v35 }
0x1d1a   :  { %4995 = vrot.lane.b32.xlu1 %v6733_v52, %s6919_s21  ;;  %v8790_v47 = vpop.eup %6734 }
0x1d1b   :  { %v5143_v29 = vmul.f32 %v8790_v47, %v5141_v17  ;;  %v6737_v31 = vpop.eup %6736 }
0x1d1c   :  { %4997 = vrot.lane.b32.xlu0 %v6737_v31, %s6919_s21 }
0x1d1d   :  { %6750 = vtanh.f32 %v5143_v29  ;;  %v6739_v12 = vpop.eup %6738  ;;  %v5586_v29 = vld [vmem:[#allocation2] ss:$0 sm:$0xff] }
0x1d1e   :  { %4999 = vrot.lane.b32.xlu1 %v6739_v12, %s6919_s21  ;;  %v6741_v9 = vpop.eup %6740 }
0x1d20   :  { %5001 = vrot.lane.b32.xlu0 %v6741_v9, %s6919_s21 }
0x1d21   :  { %v6743_v51 = vpop.eup %6742 }
0x1d22   :  { %5003 = vrot.lane.b32.xlu1 %v6743_v51, %s6919_s21  ;;  %v6745_v39 = vpop.eup %6744 }
0x1d24   :  { %5005 = vrot.lane.b32.xlu0 %v6745_v39, %s6919_s21 }
0x1d25   :  { %v6747_v50 = vpop.eup %6746 }
0x1d26   :  { %5007 = vrot.lane.b32.xlu1 %v6747_v50, %s6919_s21  ;;  %v6749_v23 = vpop.eup %6748 }
0x1d28   :  { %5009 = vrot.lane.b32.xlu0 %v6749_v23, %s6919_s21 }
0x1d2a   :  { %v6751_v36 = vpop.eup %6750 }
0x1d2b   :  { %5146 = vrot.lane.b32.xlu1 %v6751_v36, %s6925_s29 }
0x1d8c   :  { %v4996_v13 = vpop.permute.xlu1 %4995 }
0x1d8d   :  { %v5019_v15 = vmul.f32 %v8736_v59, %v4996_v13 }
0x1d8e   :  { %v4998_v18 = vpop.permute.xlu0 %4997 }
0x1d8f   :  { %v5020_v56 = vmul.f32 %v8744_v45, %v4998_v18  ;;  %v5241_v44 = vrot.slane %v5019_v15, 7 }
0x1d90   :  { %v5000_v62 = vpop.permute.xlu1 %4999 }
0x1d91   :  { %v5021_v11 = vmul.f32 %v8746_v0, %v5000_v62  ;;  %v5242_v16 = vrot.slane %v5020_v56, 6 }
0x1d92   :  { %v5002_v3 = vpop.permute.xlu0 %5001 }
0x1d93   :  { %v5244_v38 = vrot.slane %v5021_v11, 5  ;;  %v5243_v7 = vsel %vm2677_vm5, %v5242_v16, %v5241_v44  ;;  %v5022_v42 = vmul.f32 %v8751_v43, %v5002_v3 }
0x1d94   :  { %v5004_v28 = vpop.permute.xlu1 %5003 }
0x1d95   :  { %v5245_v14 = vsel %vm2680_vm6, %v5244_v38, %v5243_v7  ;;  %v5023_v25 = vmul.f32 %v8754_v60, %v5004_v28  ;;  %v5246_v59 = vrot.slane %v5022_v42, 4 }
0x1d96   :  { %v5006_v30 = vpop.permute.xlu0 %5005 }
0x1d97   :  { %v5248_v53 = vrot.slane %v5023_v25, 3  ;;  %v5024_v45 = vmul.f32 %v8759_v40, %v5006_v30  ;;  %v5247_v34 = vsel %vm2683_vm7, %v5246_v59, %v5245_v14 }
0x1d98   :  { %v5008_v0 = vpop.permute.xlu1 %5007 }
0x1d99   :  { %v5249_v21 = vsel %vm2686_vm8, %v5248_v53, %v5247_v34  ;;  %v5025_v61 = vmul.f32 %v8762_v37, %v5008_v0  ;;  %v5250_v26 = vrot.slane %v5024_v45, 2 }
0x1d9a   :  { %v5010_v20 = vpop.permute.xlu0 %5009 }
0x1d9b   :  { %v5252_v43 = vrot.slane %v5025_v61, 1  ;;  %v5026_v58 = vmul.f32 %v8767_v19, %v5010_v20  ;;  %v5251_v4 = vsel %vm2689_vm9, %v5250_v26, %v5249_v21  ;;  %v5337_v19 = vld [vmem:[%s8880_s15 + $0x8] sm:$0xff] }
0x1d9d   :  { %v5147_v60 = vpop.permute.xlu1 %5146  ;;  %v5253_v8 = vsel %vm2692_vm10, %v5252_v43, %v5251_v4 }
0x1d9e   :  { %v5149_v52 = vmul.f32 %v8790_v47, %v5147_v60  ;;  %v5254_v40 = vsel %vm2695_vm11, %v5026_v58, %v5253_v8 }
0x1d9f   :  { %5255 = vrot.lane.b32.xlu1 %v5254_v40, %s6928_s9 }
0x1da0   :  { %5159 = vrot.lane.b32.xlu0 %v5149_v52, %s6928_s9 }
0x1e11   :  { %v5256_v37 = vpop.permute.xlu1 %5255 }
0x1e12   :  { %v5160_v41 = vpop.permute.xlu0 %5159  ;;  %6009 = vmatmul.mubr.msk.f32.vlgmr.msra.gmra.mxu0 %vm255_vm1, %v5256_v37 }
0x1e13   :  { %5998 = vmatmul.mubr.msk.f32.vlgmr.msra.gmra.mxu1 %vm255_vm1, %v5160_v41 }
0x1e14   :  { %6015 = vmatprep.mubr.msk.f32.mxu1 %vm6927_vm4, %v6926_v33  ;;  %6012 = vmatpush3.msra.mxu1 %v5337_v19 }
0x1e15   :  { %6013 = vmatprep.subr.mxu1 %v6926_v33 }
0x1e16   :  { %6014 = vmatpush3.msra.mxu1 %v5336_v54 }
0x1ed2   :  { %v5325_v46 = vpop.f32.mrf.mxu0 }
0x1ed3   :  { %v5229_v55 = vpop.f32.mrf.mxu1 }
0x1ed4   :  { %v5326_v10 = vadd.f32 %v5325_v46, %v5229_v55  ;;  %v6010_v63 = vpop.f32.mrf.mxu0 }
0x1ed5   :  { %v5999_v1 = vpop.f32.mrf.mxu1 }
0x1ed6   :  { %v5585_v32 = vmul.f32 -1.442695, %v5326_v10 }
0x1ed8   :  { %6752 = vpow2.f32 %v5585_v32 }
0x1ee5   :  { %v6753_v57 = vpop.eup %6752 }
0x1ee6   :  { %v5332_v47 = vadd.f32 1.0, %v6753_v57 }
0x1ee8   :  { %6754 = vrcp.f32 %v5332_v47 }
0x1ef5   :  { %v6755_v35 = vpop.eup %6754 }
0x1ef6   :  { %v5335_v17 = vmul.f32 %v6755_v35, %v5326_v10 }
0x1ef8   :  { %6016 = vmatmul.mubr.msk.f32.vlgmr.msra.gmra.mxu1 %vm177_vm0, %v5335_v17 }
0x1fb8   :  { %v5414_v31 = vpop.f32.mrf.mxu1 }
0x1fb9   :  { %v5415_v12 = vadd.f32 %v5586_v29, %v5414_v31 }
0x1fba   :  { %v6017_v33 = vpop.f32.mrf.mxu1 }
0x1fbb   :  { %5419 = vst.msk [vmem:[%s8882_s17] sm:$0xff] %vm5418_vm12, %v5415_v12 }
0x1fbc   :  { %5424 = vsyncpa [#allocation4], 1 }
0x1fbd   :  { %5425 = vsyncpa [#allocation6], 1 }
0x1fbe   :  { %5426 = vsyncpa [#allocation9], 1 }
0x1fbf   :  { %5427 = vsyncpa [#allocation12], 1 }

</bundles_post_ra>
